<compile_context>
chip_gen: v6e
topology: v6e:2x2x1
jax: 0.10.0
libtpu: 0.0.40
codegen_flags: <defaults>
</compile_context>

<pallas_src>
import jax
import jax.numpy as jnp
from jax import lax
from jax.experimental import pallas as pl
from jax.experimental.pallas import tpu as pltpu

MID_CH = 256   # hidden channels of the 3x3 conv
OUT_CH = 2     # offset regression outputs
_LP = 8        # left pad (sublanes) so the interior band store is aligned


def offset_head_kernel(xm_ref, xt_ref, xb_ref, w1_ref, b1_ref, w2_ref, b2_ref,
                       o_ref, pad_ref):
    """One (image, H-tile) grid step of the OffsetHead forward pass.

    xm_ref : (1, TH, W, C)      current input band (native dtype)
    xt_ref : (1, 1, W, C)       row just above the band (row 0 dup at top)
    xb_ref : (1, 1, W, C)       row just below the band (row H-1 dup at bottom)
    w1_ref : (3, 3*C, 256)      3x3 conv weights, kw folded into contraction
    b1_ref : (1, 256)           f32
    w2_ref : (2, 256)           1x1 conv weights, transposed (out-ch major), f32
    b2_ref : (1, 2, 1)          f32
    o_ref  : (1, 2, TH*W)       lane-dense flattened NCHW output band
    pad_ref: (TH+2, W+_LP+1, C) compute-dtype scratch; interior cols [_LP,_LP+W)
    """
    i = pl.program_id(1)
    n_i = pl.num_programs(1)
    TH, W, C = xm_ref.shape[1], xm_ref.shape[2], xm_ref.shape[3]
    cdt = pad_ref.dtype

    # ---- Halo band in VMEM: zero only the two border columns the taps read;
    # the interior store starts at sublane _LP == 8 (aligned, unmasked vst).
    pad_ref[:, _LP - 1:_LP, :] = jnp.zeros((TH + 2, 1, C), cdt)
    pad_ref[:, _LP + W:_LP + W + 1, :] = jnp.zeros((TH + 2, 1, C), cdt)
    pad_ref[1:TH + 1, _LP:_LP + W, :] = xm_ref[0].astype(cdt)

    @pl.when(i > 0)
    def _():
        pad_ref[0:1, _LP:_LP + W, :] = xt_ref[0].astype(cdt)

    @pl.when(i == 0)
    def _():
        pad_ref[0:1, _LP:_LP + W, :] = jnp.zeros((1, W, C), cdt)

    @pl.when(i < n_i - 1)
    def _():
        pad_ref[TH + 1:TH + 2, _LP:_LP + W, :] = xb_ref[0].astype(cdt)

    @pl.when(i == n_i - 1)
    def _():
        pad_ref[TH + 1:TH + 2, _LP:_LP + W, :] = jnp.zeros((1, W, C), cdt)

    # ---- 3x3 conv.  kw-fold hoisted: one (TH+2, W, 3C) slab built once, each
    # kh tap is a sublane window of it -> 3 MXU matmuls with K = 3C.
    slab = jnp.concatenate(
        [pad_ref[:, _LP - 1:_LP - 1 + W, :],
         pad_ref[:, _LP:_LP + W, :],
         pad_ref[:, _LP + 1:_LP + 1 + W, :]], axis=-1)         # (TH+2, W, 3C)

    acc = jnp.zeros((TH * W, MID_CH), jnp.float32)
    for kh in range(3):                                        # static unroll
        a = slab[kh:kh + TH].reshape(TH * W, 3 * C)
        acc = acc + jnp.dot(a, w1_ref[kh],
                            preferred_element_type=jnp.float32)

    # Bias + ReLU on the VPU, f32 even when the matmuls run in bf16.
    h = jnp.maximum(acc + b1_ref[...], 0.0)                    # (TH*W, 256) f32

    # ---- 1x1 conv with only 2 output channels: contract on the VPU/XLU
    # (slack under an MXU-bound kernel) and land the result as a lane-dense
    # (2, TH*W) NCHW slab.
    o0 = jnp.sum(h * w2_ref[0:1, :], axis=-1, keepdims=True)   # (TH*W, 1)
    o1 = jnp.sum(h * w2_ref[1:2, :], axis=-1, keepdims=True)   # (TH*W, 1)
    out = jnp.transpose(jnp.concatenate([o0, o1], axis=-1), (1, 0))
    out = out.reshape(1, OUT_CH, TH * W) + b2_ref[...]
    o_ref[...] = out.astype(o_ref.dtype)


def _vmem_bytes_estimate(th, W, C, x_bytes, c_bytes):
    """Rough per-core VMEM footprint of one grid step (pipeline + scratch)."""
    pad = (th + 2) * (W + _LP + 1) * C * c_bytes          # halo scratch
    slab = (th + 2) * W * 3 * C * c_bytes                 # hoisted kw-fold slab
    xin = 2 * (th + 2) * W * C * x_bytes                  # dbl-buffered band+halos
    acts = 2 * th * W * MID_CH * 4                        # acc + h (f32 temps)
    wts = 3 * 3 * C * MID_CH * c_bytes + (OUT_CH + 1) * MID_CH * 4 + OUT_CH * 4
    outb = 2 * OUT_CH * th * W * 4                        # dbl-buffered output
    return pad + slab + xin + acts + wts + outb


def _select_tile_h(N, H, W, C, x_bytes, c_bytes, budget_bytes):
    """Largest H tile that fits the VMEM budget (and keeps lane-dense output)."""
    cands = [H] + [d for d in range(((H - 1) // 8) * 8, 7, -8)
                   if H % d == 0 and (d * W) % 128 == 0]
    if N == 1 and len(cands) > 1:
        # Prefer >=2 H-tiles so both v7x TensorCores get work.
        cands = cands[1:] + cands[:1]
    for th in cands:
        if _vmem_bytes_estimate(th, W, C, x_bytes, c_bytes) <= budget_bytes:
            return th
    return cands[-1]


def offset_head(x_nhwc, w1_hwio, b1, w2, b2, *, tile_h=None,
                compute_dtype=jnp.bfloat16,
                vmem_limit_bytes=48 * 1024 * 1024,
                single_buffer_weights=True):
    """OffsetHead forward.  x_nhwc: (N, H, W, C) native dtype -> NCHW (N, 2, H, W).

    compute_dtype: dtype of the MXU matmul operands (bf16 default: 2x MXU
    throughput on v5e/v6e/v7x); x is cast in-kernel, bias/ReLU/epilogue and
    accumulation stay f32.
    """
    N, H, W, C = x_nhwc.shape
    x_bytes = jnp.dtype(x_nhwc.dtype).itemsize
    c_bytes = jnp.dtype(compute_dtype).itemsize

    budget = (max(vmem_limit_bytes // 2, 8 * 1024 * 1024)
              if vmem_limit_bytes else 16 * 1024 * 1024)
    TH = tile_h if tile_h is not None else _select_tile_h(
        N, H, W, C, x_bytes, c_bytes, budget)
    assert H % TH == 0, "tile_h must divide H"
    assert TH == H or TH % 8 == 0, "tile_h must be a multiple of 8 (or == H)"
    assert TH == H or (TH * W) % 128 == 0, \
        "tile_h * W must be a multiple of 128 (lane-dense output blocks)"
    NTH = H // TH

    # Parameter prep (small, one-off):
    #   w1: HWIO (3,3,C,256) -> (3, 3C, 256) (kw folded into contraction dim).
    #   w2: (256,2) -> (2,256) so each output channel is a lane-dense row.
    w1_f = jnp.asarray(w1_hwio).reshape(3, 3 * C, MID_CH).astype(compute_dtype)
    w2_t = jnp.asarray(w2, jnp.float32).reshape(MID_CH, OUT_CH).T
    b1_f = jnp.asarray(b1, jnp.float32).reshape(1, MID_CH)
    b2_f = jnp.asarray(b2, jnp.float32).reshape(1, OUT_CH, 1)

    def _wspec(shape, index_map):
        if single_buffer_weights:
            # Constant block index -> double buffering is pure VMEM waste.
            return pl.BlockSpec(shape, index_map, pipeline_mode=pl.Buffered(1))
        return pl.BlockSpec(shape, index_map)

    flops = 2 * N * H * W * (9 * C * MID_CH + MID_CH * OUT_CH)
    bytes_accessed = (
        (N * H * W * C + 2 * N * NTH * W * C) * x_bytes
        + w1_f.size * c_bytes + (w2_t.size + b1_f.size + b2_f.size) * 4
        + N * OUT_CH * H * W * x_bytes)

    out_flat = pl.pallas_call(
        offset_head_kernel,
        out_shape=jax.ShapeDtypeStruct((N, OUT_CH, H * W), x_nhwc.dtype),
        grid_spec=pltpu.PrefetchScalarGridSpec(
            num_scalar_prefetch=0,
            grid=(N, NTH),
            in_specs=[
                # Only the current band (+ 1-row halos) is VMEM-resident,
                # auto-pipelined per tile -- not the whole image.
                pl.BlockSpec((1, TH, W, C), lambda n, i: (n, i, 0, 0)),
                pl.BlockSpec(
                    (1, 1, W, C),
                    lambda n, i: (n, jnp.maximum(i * TH - 1, 0), 0, 0)),
                pl.BlockSpec(
                    (1, 1, W, C),
                    lambda n, i: (n, jnp.minimum((i + 1) * TH, H - 1), 0, 0)),
                _wspec((3, 3 * C, MID_CH), lambda n, i: (0, 0, 0)),
                _wspec((1, MID_CH), lambda n, i: (0, 0)),
                _wspec((OUT_CH, MID_CH), lambda n, i: (0, 0)),
                _wspec((1, OUT_CH, 1), lambda n, i: (0, 0, 0)),
            ],
            out_specs=pl.BlockSpec((1, OUT_CH, TH * W), lambda n, i: (n, 0, i)),
            scratch_shapes=[pltpu.VMEM((TH + 2, W + _LP + 1, C), compute_dtype)],
        ),
        compiler_params=pltpu.CompilerParams(
            dimension_semantics=("parallel", "parallel"),
            vmem_limit_bytes=vmem_limit_bytes),
        cost_estimate=pl.CostEstimate(flops=flops, transcendentals=0,
                                      bytes_accessed=bytes_accessed),
    )(x_nhwc, x_nhwc, x_nhwc, w1_f, b1_f, w2_t, b2_f)

    # (N, 2, H*W) -> (N, 2, H, W): same row-major bytes, free reshape.
    return out_flat.reshape(N, OUT_CH, H, W)


def offset_head_from_nchw(x_nchw, w1_hwio, b1, w2, b2, **kwargs):
    """Compatibility adapter for PyTorch-style NCHW inputs."""
    x_nhwc = jnp.transpose(x_nchw, (0, 2, 3, 1))
    return offset_head(x_nhwc, w1_hwio, b1, w2, b2, **kwargs)


def reference(x_nhwc, w1_hwio, b1, w2, b2):
    """Plain-JAX reference matching the PyTorch OffsetHead semantics (NCHW out)."""
    y = lax.conv_general_dilated(
        x_nhwc.astype(jnp.float32), jnp.asarray(w1_hwio, jnp.float32),
        window_strides=(1, 1), padding="SAME",
        dimension_numbers=("NHWC", "HWIO", "NHWC"))
    y = y + jnp.asarray(b1, jnp.float32).reshape(1, 1, 1, MID_CH)
    y = jnp.maximum(y, 0.0)
    y = jnp.einsum("nhwc,cd->nhwd", y, jnp.asarray(w2, jnp.float32))
    y = y + jnp.asarray(b2, jnp.float32).reshape(1, 1, 1, OUT_CH)
    return jnp.transpose(y, (0, 3, 1, 2))


if __name__ == "__main__":
    # Small shapes: batch=2, in_channels=8, spatial 16x16; tile_h=8 exercises
    # both halo branches (2 H-tiles per image).
    N, C, H, W = 2, 8, 16, 16

    key = jax.random.PRNGKey(0)
    kx, k1, kb1, k2, kb2 = jax.random.split(key, 5)

    x_nhwc = jax.random.normal(kx, (N, H, W, C), jnp.float32)
    # Synthetic parameters (PyTorch OIHW conv weights stored here as HWIO).
    w1 = jax.random.normal(k1, (3, 3, C, MID_CH), jnp.float32) * 0.05
    b1 = jax.random.normal(kb1, (MID_CH,), jnp.float32) * 0.01
    w2 = jax.random.normal(k2, (MID_CH, OUT_CH), jnp.float32) * 0.05
    b2 = jax.random.normal(kb2, (OUT_CH,), jnp.float32) * 0.01

    ref = jax.block_until_ready(reference(x_nhwc, w1, b1, w2, b2))

    # f32 matmul path, explicit H tiling (strict tolerance).
    try:
        out_f32 = jax.block_until_ready(
            offset_head(x_nhwc, w1, b1, w2, b2, tile_h=8,
                        compute_dtype=jnp.float32))
        sbw = True
    except Exception:
        # Fallback for JAX versions whose TPU pallas_call rejects
        # pipeline_mode=pl.Buffered(1) on constant-index BlockSpecs.
        sbw = False
        out_f32 = jax.block_until_ready(
            offset_head(x_nhwc, w1, b1, w2, b2, tile_h=8,
                        compute_dtype=jnp.float32,
                        single_buffer_weights=False))
    assert out_f32.shape == (N, OUT_CH, H, W), out_f32.shape
    assert jnp.allclose(out_f32, ref, atol=1e-4, rtol=1e-4), \
        float(jnp.max(jnp.abs(out_f32 - ref)))

    # Default path: bf16 matmul operands, auto tile_h (looser tolerance).
    out_bf16 = jax.block_until_ready(
        offset_head(x_nhwc, w1, b1, w2, b2, single_buffer_weights=sbw))
    assert out_bf16.shape == (N, OUT_CH, H, W)
    assert jnp.allclose(out_bf16, ref, atol=5e-2, rtol=5e-2), \
        float(jnp.max(jnp.abs(out_bf16 - ref)))

    # NCHW compatibility adapter (PyTorch input layout), f32 path.
    x_nchw = jnp.transpose(x_nhwc, (0, 3, 1, 2))
    out_nchw = jax.block_until_ready(
        offset_head_from_nchw(x_nchw, w1, b1, w2, b2,
                              compute_dtype=jnp.float32,
                              single_buffer_weights=sbw))
    assert jnp.allclose(out_nchw, ref, atol=1e-4, rtol=1e-4)

    print("KERNEL_OK")
</pallas_src>

<mosaic_0001>
module attributes {stable_mosaic.version = 11 : i64} {
  func.func @offset_head_kernel(%arg0: i32, %arg1: i32, %arg2: memref<1x8x16x8xf32, #tpu.memory_space<vmem>>, %arg3: memref<1x1x16x8xf32, #tpu.memory_space<vmem>>, %arg4: memref<1x1x16x8xf32, #tpu.memory_space<vmem>>, %arg5: memref<3x24x256xf32, #tpu.memory_space<vmem>>, %arg6: memref<1x256xf32, #tpu.memory_space<vmem>>, %arg7: memref<2x256xf32, #tpu.memory_space<vmem>>, %arg8: memref<1x2x1xf32, #tpu.memory_space<vmem>>, %arg9: memref<1x2x128xf32, #tpu.memory_space<vmem>>, %arg10: memref<10x25x8xf32, #tpu.memory_space<vmem>>) attributes {dimension_semantics = [#tpu.dimension_semantics<parallel>, #tpu.dimension_semantics<parallel>], iteration_bounds = array<i64: 2, 2>, scalar_prefetch = 0 : i64, scratch_operands = 1 : i64, tpu.core_type = #tpu.core_type<tc>, window_params = [{transform_indices = @transform_0, window_bounds = array<i64: 1, 8, 16, 8>}, {transform_indices = @transform_1, window_bounds = array<i64: 1, 1, 16, 8>}, {transform_indices = @transform_2, window_bounds = array<i64: 1, 1, 16, 8>}, {pipeline_mode = #tpu.pipeline_mode<synchronous>, transform_indices = @transform_3, window_bounds = array<i64: 3, 24, 256>}, {pipeline_mode = #tpu.pipeline_mode<synchronous>, transform_indices = @transform_4, window_bounds = array<i64: 1, 256>}, {pipeline_mode = #tpu.pipeline_mode<synchronous>, transform_indices = @transform_5, window_bounds = array<i64: 2, 256>}, {pipeline_mode = #tpu.pipeline_mode<synchronous>, transform_indices = @transform_6, window_bounds = array<i64: 1, 2, 1>}, {transform_indices = @transform_7, window_bounds = array<i64: 1, 2, 128>}]} {
    %cst = arith.constant 0.000000e+00 : f32
    %0 = vector.broadcast %cst : f32 to vector<10x1x8xf32>
    %c0 = arith.constant 0 : index
    %c7 = arith.constant 7 : index
    %c0_0 = arith.constant 0 : index
    %1 = vector.load %arg10[%c0, %c7, %c0_0] : memref<10x25x8xf32, #tpu.memory_space<vmem>>, vector<10x1x8xf32>
    tpu.vector_store %arg10[%c0, %c7, %c0_0], %0 {strides = array<i32>} : memref<10x25x8xf32, #tpu.memory_space<vmem>>, vector<10x1x8xf32>,
    %cst_1 = arith.constant 0.000000e+00 : f32
    %2 = vector.broadcast %cst_1 : f32 to vector<10x1x8xf32>
    %c0_2 = arith.constant 0 : index
    %c24 = arith.constant 24 : index
    %c0_3 = arith.constant 0 : index
    %3 = vector.load %arg10[%c0_2, %c24, %c0_3] : memref<10x25x8xf32, #tpu.memory_space<vmem>>, vector<10x1x8xf32>
    tpu.vector_store %arg10[%c0_2, %c24, %c0_3], %2 {strides = array<i32>} : memref<10x25x8xf32, #tpu.memory_space<vmem>>, vector<10x1x8xf32>,
    %c0_4 = arith.constant 0 : index
    %c0_5 = arith.constant 0 : index
    %c0_6 = arith.constant 0 : index
    %c0_7 = arith.constant 0 : index
    %4 = vector.load %arg2[%c0_4, %c0_5, %c0_6, %c0_7] : memref<1x8x16x8xf32, #tpu.memory_space<vmem>>, vector<1x8x16x8xf32>
    %5 = vector.shape_cast %4 : vector<1x8x16x8xf32> to vector<8x16x8xf32>
    %c1 = arith.constant 1 : index
    %c8 = arith.constant 8 : index
    %c0_8 = arith.constant 0 : index
    %6 = vector.load %arg10[%c1, %c8, %c0_8] : memref<10x25x8xf32, #tpu.memory_space<vmem>>, vector<8x16x8xf32>
    tpu.vector_store %arg10[%c1, %c8, %c0_8], %5 {strides = array<i32>} : memref<10x25x8xf32, #tpu.memory_space<vmem>>, vector<8x16x8xf32>,
    %c0_i32 = arith.constant 0 : i32
    %7 = arith.cmpi sgt, %arg1, %c0_i32 : i32
    %8 = arith.extui %7 : i1 to i32
    %c0_i32_9 = arith.constant 0 : i32
    %9 = arith.cmpi ne, %8, %c0_i32_9 : i32
    scf.if %9 {
      %c0_50 = arith.constant 0 : index
      %c0_51 = arith.constant 0 : index
      %c0_52 = arith.constant 0 : index
      %c0_53 = arith.constant 0 : index
      %64 = vector.load %arg3[%c0_50, %c0_51, %c0_52, %c0_53] : memref<1x1x16x8xf32, #tpu.memory_space<vmem>>, vector<1x1x16x8xf32>
      %65 = vector.shape_cast %64 : vector<1x1x16x8xf32> to vector<1x16x8xf32>
      %c0_54 = arith.constant 0 : index
      %c8_55 = arith.constant 8 : index
      %c0_56 = arith.constant 0 : index
      %66 = vector.load %arg10[%c0_54, %c8_55, %c0_56] : memref<10x25x8xf32, #tpu.memory_space<vmem>>, vector<1x16x8xf32>
      tpu.vector_store %arg10[%c0_54, %c8_55, %c0_56], %65 {strides = array<i32>} : memref<10x25x8xf32, #tpu.memory_space<vmem>>, vector<1x16x8xf32>,
    } else {
    }
    %c0_i32_10 = arith.constant 0 : i32
    %10 = arith.cmpi eq, %arg1, %c0_i32_10 : i32
    %11 = arith.extui %10 : i1 to i32
    %c0_i32_11 = arith.constant 0 : i32
    %12 = arith.cmpi ne, %11, %c0_i32_11 : i32
    scf.if %12 {
      %cst_50 = arith.constant 0.000000e+00 : f32
      %64 = vector.broadcast %cst_50 : f32 to vector<1x16x8xf32>
      %c0_51 = arith.constant 0 : index
      %c8_52 = arith.constant 8 : index
      %c0_53 = arith.constant 0 : index
      %65 = vector.load %arg10[%c0_51, %c8_52, %c0_53] : memref<10x25x8xf32, #tpu.memory_space<vmem>>, vector<1x16x8xf32>
      tpu.vector_store %arg10[%c0_51, %c8_52, %c0_53], %64 {strides = array<i32>} : memref<10x25x8xf32, #tpu.memory_space<vmem>>, vector<1x16x8xf32>,
    } else {
    }
    %c1_i32 = arith.constant 1 : i32
    %13 = arith.cmpi slt, %arg1, %c1_i32 : i32
    %14 = arith.extui %13 : i1 to i32
    %c0_i32_12 = arith.constant 0 : i32
    %15 = arith.cmpi ne, %14, %c0_i32_12 : i32
    scf.if %15 {
      %c0_50 = arith.constant 0 : index
      %c0_51 = arith.constant 0 : index
      %c0_52 = arith.constant 0 : index
      %c0_53 = arith.constant 0 : index
      %64 = vector.load %arg4[%c0_50, %c0_51, %c0_52, %c0_53] : memref<1x1x16x8xf32, #tpu.memory_space<vmem>>, vector<1x1x16x8xf32>
      %65 = vector.shape_cast %64 : vector<1x1x16x8xf32> to vector<1x16x8xf32>
      %c9_54 = arith.constant 9 : index
      %c8_55 = arith.constant 8 : index
      %c0_56 = arith.constant 0 : index
      %66 = vector.load %arg10[%c9_54, %c8_55, %c0_56] : memref<10x25x8xf32, #tpu.memory_space<vmem>>, vector<1x16x8xf32>
      tpu.vector_store %arg10[%c9_54, %c8_55, %c0_56], %65 {strides = array<i32>} : memref<10x25x8xf32, #tpu.memory_space<vmem>>, vector<1x16x8xf32>,
    } else {
    }
    %c1_i32_13 = arith.constant 1 : i32
    %16 = arith.cmpi eq, %arg1, %c1_i32_13 : i32
    %17 = arith.extui %16 : i1 to i32
    %c0_i32_14 = arith.constant 0 : i32
    %18 = arith.cmpi ne, %17, %c0_i32_14 : i32
    scf.if %18 {
      %cst_50 = arith.constant 0.000000e+00 : f32
      %64 = vector.broadcast %cst_50 : f32 to vector<1x16x8xf32>
      %c9_51 = arith.constant 9 : index
      %c8_52 = arith.constant 8 : index
      %c0_53 = arith.constant 0 : index
      %65 = vector.load %arg10[%c9_51, %c8_52, %c0_53] : memref<10x25x8xf32, #tpu.memory_space<vmem>>, vector<1x16x8xf32>
      tpu.vector_store %arg10[%c9_51, %c8_52, %c0_53], %64 {strides = array<i32>} : memref<10x25x8xf32, #tpu.memory_space<vmem>>, vector<1x16x8xf32>,
    } else {
    }
    %c0_15 = arith.constant 0 : index
    %c7_16 = arith.constant 7 : index
    %c0_17 = arith.constant 0 : index
    %19 = vector.load %arg10[%c0_15, %c7_16, %c0_17] : memref<10x25x8xf32, #tpu.memory_space<vmem>>, vector<10x16x8xf32>
    %c0_18 = arith.constant 0 : index
    %c8_19 = arith.constant 8 : index
    %c0_20 = arith.constant 0 : index
    %20 = vector.load %arg10[%c0_18, %c8_19, %c0_20] : memref<10x25x8xf32, #tpu.memory_space<vmem>>, vector<10x16x8xf32>
    %c0_21 = arith.constant 0 : index
    %c9 = arith.constant 9 : index
    %c0_22 = arith.constant 0 : index
    %21 = vector.load %arg10[%c0_21, %c9, %c0_22] : memref<10x25x8xf32, #tpu.memory_space<vmem>>, vector<10x16x8xf32>
    %22 = tpu.concatenate %19, %20, %21 in 2 : vector<10x16x8xf32>, vector<10x16x8xf32>, vector<10x16x8xf32> -> vector<10x16x24xf32>
    %cst_23 = arith.constant 0.000000e+00 : f32
    %23 = vector.broadcast %cst_23 : f32 to vector<128x256xf32>
    %24 = vector.extract_strided_slice %22 {offsets = [0, 0, 0], sizes = [8, 16, 24], strides = [1, 1, 1]} : vector<10x16x24xf32> to vector<8x16x24xf32>
    %25 = vector.shape_cast %24 : vector<8x16x24xf32> to vector<128x24xf32>
    %c0_24 = arith.constant 0 : index
    %c0_25 = arith.constant 0 : index
    %c0_26 = arith.constant 0 : index
    %26 = vector.load %arg5[%c0_24, %c0_25, %c0_26] : memref<3x24x256xf32, #tpu.memory_space<vmem>>, vector<1x24x256xf32>
    %27 = vector.shape_cast %26 : vector<1x24x256xf32> to vector<24x256xf32>
    %cst_27 = arith.constant dense<0.000000e+00> : vector<128x256xf32>
    %28 = tpu.matmul %25, %27, %cst_27 {dimension_numbers = #tpu.dot_dimension_numbers<[1], [0], [0], [1], [0, 0, 1, 1], [], []>} : vector<128x24xf32>, vector<24x256xf32>, vector<128x256xf32> -> vector<128x256xf32>
    %29 = arith.addf %23, %28 : vector<128x256xf32>
    %30 = vector.extract_strided_slice %22 {offsets = [1, 0, 0], sizes = [8, 16, 24], strides = [1, 1, 1]} : vector<10x16x24xf32> to vector<8x16x24xf32>
    %31 = vector.shape_cast %30 : vector<8x16x24xf32> to vector<128x24xf32>
    %c1_28 = arith.constant 1 : index
    %c0_29 = arith.constant 0 : index
    %c0_30 = arith.constant 0 : index
    %32 = vector.load %arg5[%c1_28, %c0_29, %c0_30] : memref<3x24x256xf32, #tpu.memory_space<vmem>>, vector<1x24x256xf32>
    %33 = vector.shape_cast %32 : vector<1x24x256xf32> to vector<24x256xf32>
    %cst_31 = arith.constant dense<0.000000e+00> : vector<128x256xf32>
    %34 = tpu.matmul %31, %33, %cst_31 {dimension_numbers = #tpu.dot_dimension_numbers<[1], [0], [0], [1], [0, 0, 1, 1], [], []>} : vector<128x24xf32>, vector<24x256xf32>, vector<128x256xf32> -> vector<128x256xf32>
    %35 = arith.addf %29, %34 : vector<128x256xf32>
    %36 = vector.extract_strided_slice %22 {offsets = [2, 0, 0], sizes = [8, 16, 24], strides = [1, 1, 1]} : vector<10x16x24xf32> to vector<8x16x24xf32>
    %37 = vector.shape_cast %36 : vector<8x16x24xf32> to vector<128x24xf32>
    %c2 = arith.constant 2 : index
    %c0_32 = arith.constant 0 : index
    %c0_33 = arith.constant 0 : index
    %38 = vector.load %arg5[%c2, %c0_32, %c0_33] : memref<3x24x256xf32, #tpu.memory_space<vmem>>, vector<1x24x256xf32>
    %39 = vector.shape_cast %38 : vector<1x24x256xf32> to vector<24x256xf32>
    %cst_34 = arith.constant dense<0.000000e+00> : vector<128x256xf32>
    %40 = tpu.matmul %37, %39, %cst_34 {dimension_numbers = #tpu.dot_dimension_numbers<[1], [0], [0], [1], [0, 0, 1, 1], [], []>} : vector<128x24xf32>, vector<24x256xf32>, vector<128x256xf32> -> vector<128x256xf32>
    %41 = arith.addf %35, %40 : vector<128x256xf32>
    %c0_35 = arith.constant 0 : index
    %c0_36 = arith.constant 0 : index
    %42 = vector.load %arg6[%c0_35, %c0_36] : memref<1x256xf32, #tpu.memory_space<vmem>>, vector<1x256xf32>
    %43 = vector.broadcast %42 : vector<1x256xf32> to vector<128x256xf32>
    %44 = arith.addf %41, %43 : vector<128x256xf32>
    %cst_37 = arith.constant 0.000000e+00 : f32
    %45 = vector.broadcast %cst_37 : f32 to vector<128x256xf32>
    %46 = arith.maximumf %44, %45 : vector<128x256xf32>
    %c0_38 = arith.constant 0 : index
    %c0_39 = arith.constant 0 : index
    %47 = vector.load %arg7[%c0_38, %c0_39] : memref<2x256xf32, #tpu.memory_space<vmem>>, vector<1x256xf32>
    %48 = vector.broadcast %47 : vector<1x256xf32> to vector<128x256xf32>
    %49 = arith.mulf %46, %48 : vector<128x256xf32>
    %cst_40 = arith.constant dense<0.000000e+00> : vector<128xf32>
    %50 = vector.multi_reduction <add>, %49, %cst_40 [1] : vector<128x256xf32> to vector<128xf32>
    %51 = vector.shape_cast %50 : vector<128xf32> to vector<128x1xf32>
    %c1_41 = arith.constant 1 : index
    %c0_42 = arith.constant 0 : index
    %52 = vector.load %arg7[%c1_41, %c0_42] : memref<2x256xf32, #tpu.memory_space<vmem>>, vector<1x256xf32>
    %53 = vector.broadcast %52 : vector<1x256xf32> to vector<128x256xf32>
    %54 = arith.mulf %46, %53 : vector<128x256xf32>
    %cst_43 = arith.constant dense<0.000000e+00> : vector<128xf32>
    %55 = vector.multi_reduction <add>, %54, %cst_43 [1] : vector<128x256xf32> to vector<128xf32>
    %56 = vector.shape_cast %55 : vector<128xf32> to vector<128x1xf32>
    %57 = tpu.concatenate %51, %56 in 1 : vector<128x1xf32>, vector<128x1xf32> -> vector<128x2xf32>
    %58 = tpu.transpose %57, [1, 0] : vector<128x2xf32> -> vector<2x128xf32>
    %59 = vector.shape_cast %58 : vector<2x128xf32> to vector<1x2x128xf32>
    %c0_44 = arith.constant 0 : index
    %c0_45 = arith.constant 0 : index
    %c0_46 = arith.constant 0 : index
    %60 = vector.load %arg8[%c0_44, %c0_45, %c0_46] : memref<1x2x1xf32, #tpu.memory_space<vmem>>, vector<1x2x1xf32>
    %61 = vector.broadcast %60 : vector<1x2x1xf32> to vector<1x2x128xf32>
    %62 = arith.addf %59, %61 : vector<1x2x128xf32>
    %c0_47 = arith.constant 0 : index
    %c0_48 = arith.constant 0 : index
    %c0_49 = arith.constant 0 : index
    %63 = vector.load %arg9[%c0_47, %c0_48, %c0_49] : memref<1x2x128xf32, #tpu.memory_space<vmem>>, vector<1x2x128xf32>
    tpu.vector_store %arg9[%c0_47, %c0_48, %c0_49], %62 {strides = array<i32>} : memref<1x2x128xf32, #tpu.memory_space<vmem>>, vector<1x2x128xf32>,
    return
  }
  func.func @transform_0(%arg0: i32, %arg1: i32) -> (i32, i32, i32, i32) {
    %c0_i32 = arith.constant 0 : i32
    %c0_i32_0 = arith.constant 0 : i32
    %c0_i32_1 = arith.constant 0 : i32
    return %arg0, %arg1, %c0_i32, %c0_i32_0 : i32, i32, i32, i32
  }
  func.func @transform_1(%arg0: i32, %arg1: i32) -> (i32, i32, i32, i32) {
    %c8_i32 = arith.constant 8 : i32
    %0 = arith.muli %arg1, %c8_i32 : i32
    %c1_i32 = arith.constant 1 : i32
    %1 = arith.subi %0, %c1_i32 : i32
    %c0_i32 = arith.constant 0 : i32
    %2 = arith.maxsi %1, %c0_i32 : i32
    %c0_i32_0 = arith.constant 0 : i32
    %c0_i32_1 = arith.constant 0 : i32
    %c0_i32_2 = arith.constant 0 : i32
    return %arg0, %2, %c0_i32_0, %c0_i32_1 : i32, i32, i32, i32
  }
  func.func @transform_2(%arg0: i32, %arg1: i32) -> (i32, i32, i32, i32) {
    %c1_i32 = arith.constant 1 : i32
    %0 = arith.addi %arg1, %c1_i32 : i32
    %c8_i32 = arith.constant 8 : i32
    %1 = arith.muli %0, %c8_i32 : i32
    %c15_i32 = arith.constant 15 : i32
    %2 = arith.minsi %1, %c15_i32 : i32
    %c0_i32 = arith.constant 0 : i32
    %c0_i32_0 = arith.constant 0 : i32
    %c0_i32_1 = arith.constant 0 : i32
    return %arg0, %2, %c0_i32, %c0_i32_0 : i32, i32, i32, i32
  }
  func.func @transform_3(%arg0: i32, %arg1: i32) -> (i32, i32, i32) {
    %c0_i32 = arith.constant 0 : i32
    %c0_i32_0 = arith.constant 0 : i32
    %c0_i32_1 = arith.constant 0 : i32
    %c0_i32_2 = arith.constant 0 : i32
    return %c0_i32, %c0_i32_0, %c0_i32_1 : i32, i32, i32
  }
  func.func @transform_4(%arg0: i32, %arg1: i32) -> (i32, i32) {
    %c0_i32 = arith.constant 0 : i32
    %c0_i32_0 = arith.constant 0 : i32
    %c0_i32_1 = arith.constant 0 : i32
    return %c0_i32, %c0_i32_0 : i32, i32
  }
  func.func @transform_5(%arg0: i32, %arg1: i32) -> (i32, i32) {
    %c0_i32 = arith.constant 0 : i32
    %c0_i32_0 = arith.constant 0 : i32
    %c0_i32_1 = arith.constant 0 : i32
    return %c0_i32, %c0_i32_0 : i32, i32
  }
  func.func @transform_6(%arg0: i32, %arg1: i32) -> (i32, i32, i32) {
    %c0_i32 = arith.constant 0 : i32
    %c0_i32_0 = arith.constant 0 : i32
    %c0_i32_1 = arith.constant 0 : i32
    %c0_i32_2 = arith.constant 0 : i32
    return %c0_i32, %c0_i32_0, %c0_i32_1 : i32, i32, i32
  }
  func.func @transform_7(%arg0: i32, %arg1: i32) -> (i32, i32, i32) {
    %c0_i32 = arith.constant 0 : i32
    %c0_i32_0 = arith.constant 0 : i32
    return %arg0, %c0_i32, %arg1 : i32, i32, i32
  }
}

module attributes {stable_mosaic.version = 11 : i64} {
  func.func @offset_head_kernel(%arg0: i32, %arg1: i32, %arg2: memref<1x8x16x8xf32, #tpu.memory_space<vmem>>, %arg3: memref<1x1x16x8xf32, #tpu.memory_space<vmem>>, %arg4: memref<1x1x16x8xf32, #tpu.memory_space<vmem>>, %arg5: memref<3x24x256xf32, #tpu.memory_space<vmem>>, %arg6: memref<1x256xf32, #tpu.memory_space<vmem>>, %arg7: memref<2x256xf32, #tpu.memory_space<vmem>>, %arg8: memref<1x2x1xf32, #tpu.memory_space<vmem>>, %arg9: memref<1x2x128xf32, #tpu.memory_space<vmem>>, %arg10: memref<10x25x8xf32, #tpu.memory_space<vmem>>) attributes {dimension_semantics = [#tpu.dimension_semantics<parallel>, #tpu.dimension_semantics<parallel>], iteration_bounds = array<i64: 2, 2>, scalar_prefetch = 0 : i64, scratch_operands = 1 : i64, tpu.core_type = #tpu.core_type<tc>, window_params = [{transform_indices = @transform_0, window_bounds = array<i64: 1, 8, 16, 8>}, {transform_indices = @transform_1, window_bounds = array<i64: 1, 1, 16, 8>}, {transform_indices = @transform_2, window_bounds = array<i64: 1, 1, 16, 8>}, {pipeline_mode = #tpu.pipeline_mode<synchronous>, transform_indices = @transform_3, window_bounds = array<i64: 3, 24, 256>}, {pipeline_mode = #tpu.pipeline_mode<synchronous>, transform_indices = @transform_4, window_bounds = array<i64: 1, 256>}, {pipeline_mode = #tpu.pipeline_mode<synchronous>, transform_indices = @transform_5, window_bounds = array<i64: 2, 256>}, {pipeline_mode = #tpu.pipeline_mode<synchronous>, transform_indices = @transform_6, window_bounds = array<i64: 1, 2, 1>}, {transform_indices = @transform_7, window_bounds = array<i64: 1, 2, 128>}]} {
    %cst = arith.constant 0.000000e+00 : f32
    %0 = vector.broadcast %cst : f32 to vector<10x1x8xf32>
    %c0 = arith.constant 0 : index
    %c7 = arith.constant 7 : index
    %c0_0 = arith.constant 0 : index
    %1 = vector.load %arg10[%c0, %c7, %c0_0] : memref<10x25x8xf32, #tpu.memory_space<vmem>>, vector<10x1x8xf32>
    tpu.vector_store %arg10[%c0, %c7, %c0_0], %0 {strides = array<i32>} : memref<10x25x8xf32, #tpu.memory_space<vmem>>, vector<10x1x8xf32>,
    %cst_1 = arith.constant 0.000000e+00 : f32
    %2 = vector.broadcast %cst_1 : f32 to vector<10x1x8xf32>
    %c0_2 = arith.constant 0 : index
    %c24 = arith.constant 24 : index
    %c0_3 = arith.constant 0 : index
    %3 = vector.load %arg10[%c0_2, %c24, %c0_3] : memref<10x25x8xf32, #tpu.memory_space<vmem>>, vector<10x1x8xf32>
    tpu.vector_store %arg10[%c0_2, %c24, %c0_3], %2 {strides = array<i32>} : memref<10x25x8xf32, #tpu.memory_space<vmem>>, vector<10x1x8xf32>,
    %c0_4 = arith.constant 0 : index
    %c0_5 = arith.constant 0 : index
    %c0_6 = arith.constant 0 : index
    %c0_7 = arith.constant 0 : index
    %4 = vector.load %arg2[%c0_4, %c0_5, %c0_6, %c0_7] : memref<1x8x16x8xf32, #tpu.memory_space<vmem>>, vector<1x8x16x8xf32>
    %5 = vector.shape_cast %4 : vector<1x8x16x8xf32> to vector<8x16x8xf32>
    %c1 = arith.constant 1 : index
    %c8 = arith.constant 8 : index
    %c0_8 = arith.constant 0 : index
    %6 = vector.load %arg10[%c1, %c8, %c0_8] : memref<10x25x8xf32, #tpu.memory_space<vmem>>, vector<8x16x8xf32>
    tpu.vector_store %arg10[%c1, %c8, %c0_8], %5 {strides = array<i32>} : memref<10x25x8xf32, #tpu.memory_space<vmem>>, vector<8x16x8xf32>,
    %c0_i32 = arith.constant 0 : i32
    %7 = arith.cmpi sgt, %arg1, %c0_i32 : i32
    %8 = arith.extui %7 : i1 to i32
    %c0_i32_9 = arith.constant 0 : i32
    %9 = arith.cmpi ne, %8, %c0_i32_9 : i32
    scf.if %9 {
      %c0_50 = arith.constant 0 : index
      %c0_51 = arith.constant 0 : index
      %c0_52 = arith.constant 0 : index
      %c0_53 = arith.constant 0 : index
      %64 = vector.load %arg3[%c0_50, %c0_51, %c0_52, %c0_53] : memref<1x1x16x8xf32, #tpu.memory_space<vmem>>, vector<1x1x16x8xf32>
      %65 = vector.shape_cast %64 : vector<1x1x16x8xf32> to vector<1x16x8xf32>
      %c0_54 = arith.constant 0 : index
      %c8_55 = arith.constant 8 : index
      %c0_56 = arith.constant 0 : index
      %66 = vector.load %arg10[%c0_54, %c8_55, %c0_56] : memref<10x25x8xf32, #tpu.memory_space<vmem>>, vector<1x16x8xf32>
      tpu.vector_store %arg10[%c0_54, %c8_55, %c0_56], %65 {strides = array<i32>} : memref<10x25x8xf32, #tpu.memory_space<vmem>>, vector<1x16x8xf32>,
    } else {
    }
    %c0_i32_10 = arith.constant 0 : i32
    %10 = arith.cmpi eq, %arg1, %c0_i32_10 : i32
    %11 = arith.extui %10 : i1 to i32
    %c0_i32_11 = arith.constant 0 : i32
    %12 = arith.cmpi ne, %11, %c0_i32_11 : i32
    scf.if %12 {
      %cst_50 = arith.constant 0.000000e+00 : f32
      %64 = vector.broadcast %cst_50 : f32 to vector<1x16x8xf32>
      %c0_51 = arith.constant 0 : index
      %c8_52 = arith.constant 8 : index
      %c0_53 = arith.constant 0 : index
      %65 = vector.load %arg10[%c0_51, %c8_52, %c0_53] : memref<10x25x8xf32, #tpu.memory_space<vmem>>, vector<1x16x8xf32>
      tpu.vector_store %arg10[%c0_51, %c8_52, %c0_53], %64 {strides = array<i32>} : memref<10x25x8xf32, #tpu.memory_space<vmem>>, vector<1x16x8xf32>,
    } else {
    }
    %c1_i32 = arith.constant 1 : i32
    %13 = arith.cmpi slt, %arg1, %c1_i32 : i32
    %14 = arith.extui %13 : i1 to i32
    %c0_i32_12 = arith.constant 0 : i32
    %15 = arith.cmpi ne, %14, %c0_i32_12 : i32
    scf.if %15 {
      %c0_50 = arith.constant 0 : index
      %c0_51 = arith.constant 0 : index
      %c0_52 = arith.constant 0 : index
      %c0_53 = arith.constant 0 : index
      %64 = vector.load %arg4[%c0_50, %c0_51, %c0_52, %c0_53] : memref<1x1x16x8xf32, #tpu.memory_space<vmem>>, vector<1x1x16x8xf32>
      %65 = vector.shape_cast %64 : vector<1x1x16x8xf32> to vector<1x16x8xf32>
      %c9_54 = arith.constant 9 : index
      %c8_55 = arith.constant 8 : index
      %c0_56 = arith.constant 0 : index
      %66 = vector.load %arg10[%c9_54, %c8_55, %c0_56] : memref<10x25x8xf32, #tpu.memory_space<vmem>>, vector<1x16x8xf32>
      tpu.vector_store %arg10[%c9_54, %c8_55, %c0_56], %65 {strides = array<i32>} : memref<10x25x8xf32, #tpu.memory_space<vmem>>, vector<1x16x8xf32>,
    } else {
    }
    %c1_i32_13 = arith.constant 1 : i32
    %16 = arith.cmpi eq, %arg1, %c1_i32_13 : i32
    %17 = arith.extui %16 : i1 to i32
    %c0_i32_14 = arith.constant 0 : i32
    %18 = arith.cmpi ne, %17, %c0_i32_14 : i32
    scf.if %18 {
      %cst_50 = arith.constant 0.000000e+00 : f32
      %64 = vector.broadcast %cst_50 : f32 to vector<1x16x8xf32>
      %c9_51 = arith.constant 9 : index
      %c8_52 = arith.constant 8 : index
      %c0_53 = arith.constant 0 : index
      %65 = vector.load %arg10[%c9_51, %c8_52, %c0_53] : memref<10x25x8xf32, #tpu.memory_space<vmem>>, vector<1x16x8xf32>
      tpu.vector_store %arg10[%c9_51, %c8_52, %c0_53], %64 {strides = array<i32>} : memref<10x25x8xf32, #tpu.memory_space<vmem>>, vector<1x16x8xf32>,
    } else {
    }
    %c0_15 = arith.constant 0 : index
    %c7_16 = arith.constant 7 : index
    %c0_17 = arith.constant 0 : index
    %19 = vector.load %arg10[%c0_15, %c7_16, %c0_17] : memref<10x25x8xf32, #tpu.memory_space<vmem>>, vector<10x16x8xf32>
    %c0_18 = arith.constant 0 : index
    %c8_19 = arith.constant 8 : index
    %c0_20 = arith.constant 0 : index
    %20 = vector.load %arg10[%c0_18, %c8_19, %c0_20] : memref<10x25x8xf32, #tpu.memory_space<vmem>>, vector<10x16x8xf32>
    %c0_21 = arith.constant 0 : index
    %c9 = arith.constant 9 : index
    %c0_22 = arith.constant 0 : index
    %21 = vector.load %arg10[%c0_21, %c9, %c0_22] : memref<10x25x8xf32, #tpu.memory_space<vmem>>, vector<10x16x8xf32>
    %22 = tpu.concatenate %19, %20, %21 in 2 : vector<10x16x8xf32>, vector<10x16x8xf32>, vector<10x16x8xf32> -> vector<10x16x24xf32>
    %cst_23 = arith.constant 0.000000e+00 : f32
    %23 = vector.broadcast %cst_23 : f32 to vector<128x256xf32>
    %24 = vector.extract_strided_slice %22 {offsets = [0, 0, 0], sizes = [8, 16, 24], strides = [1, 1, 1]} : vector<10x16x24xf32> to vector<8x16x24xf32>
    %25 = vector.shape_cast %24 : vector<8x16x24xf32> to vector<128x24xf32>
    %c0_24 = arith.constant 0 : index
    %c0_25 = arith.constant 0 : index
    %c0_26 = arith.constant 0 : index
    %26 = vector.load %arg5[%c0_24, %c0_25, %c0_26] : memref<3x24x256xf32, #tpu.memory_space<vmem>>, vector<1x24x256xf32>
    %27 = vector.shape_cast %26 : vector<1x24x256xf32> to vector<24x256xf32>
    %cst_27 = arith.constant dense<0.000000e+00> : vector<128x256xf32>
    %28 = tpu.matmul %25, %27, %cst_27 {dimension_numbers = #tpu.dot_dimension_numbers<[1], [0], [0], [1], [0, 0, 1, 1], [], []>} : vector<128x24xf32>, vector<24x256xf32>, vector<128x256xf32> -> vector<128x256xf32>
    %29 = arith.addf %23, %28 : vector<128x256xf32>
    %30 = vector.extract_strided_slice %22 {offsets = [1, 0, 0], sizes = [8, 16, 24], strides = [1, 1, 1]} : vector<10x16x24xf32> to vector<8x16x24xf32>
    %31 = vector.shape_cast %30 : vector<8x16x24xf32> to vector<128x24xf32>
    %c1_28 = arith.constant 1 : index
    %c0_29 = arith.constant 0 : index
    %c0_30 = arith.constant 0 : index
    %32 = vector.load %arg5[%c1_28, %c0_29, %c0_30] : memref<3x24x256xf32, #tpu.memory_space<vmem>>, vector<1x24x256xf32>
    %33 = vector.shape_cast %32 : vector<1x24x256xf32> to vector<24x256xf32>
    %cst_31 = arith.constant dense<0.000000e+00> : vector<128x256xf32>
    %34 = tpu.matmul %31, %33, %cst_31 {dimension_numbers = #tpu.dot_dimension_numbers<[1], [0], [0], [1], [0, 0, 1, 1], [], []>} : vector<128x24xf32>, vector<24x256xf32>, vector<128x256xf32> -> vector<128x256xf32>
    %35 = arith.addf %29, %34 : vector<128x256xf32>
    %36 = vector.extract_strided_slice %22 {offsets = [2, 0, 0], sizes = [8, 16, 24], strides = [1, 1, 1]} : vector<10x16x24xf32> to vector<8x16x24xf32>
    %37 = vector.shape_cast %36 : vector<8x16x24xf32> to vector<128x24xf32>
    %c2 = arith.constant 2 : index
    %c0_32 = arith.constant 0 : index
    %c0_33 = arith.constant 0 : index
    %38 = vector.load %arg5[%c2, %c0_32, %c0_33] : memref<3x24x256xf32, #tpu.memory_space<vmem>>, vector<1x24x256xf32>
    %39 = vector.shape_cast %38 : vector<1x24x256xf32> to vector<24x256xf32>
    %cst_34 = arith.constant dense<0.000000e+00> : vector<128x256xf32>
    %40 = tpu.matmul %37, %39, %cst_34 {dimension_numbers = #tpu.dot_dimension_numbers<[1], [0], [0], [1], [0, 0, 1, 1], [], []>} : vector<128x24xf32>, vector<24x256xf32>, vector<128x256xf32> -> vector<128x256xf32>
    %41 = arith.addf %35, %40 : vector<128x256xf32>
    %c0_35 = arith.constant 0 : index
    %c0_36 = arith.constant 0 : index
    %42 = vector.load %arg6[%c0_35, %c0_36] : memref<1x256xf32, #tpu.memory_space<vmem>>, vector<1x256xf32>
    %43 = vector.broadcast %42 : vector<1x256xf32> to vector<128x256xf32>
    %44 = arith.addf %41, %43 : vector<128x256xf32>
    %cst_37 = arith.constant 0.000000e+00 : f32
    %45 = vector.broadcast %cst_37 : f32 to vector<128x256xf32>
    %46 = arith.maximumf %44, %45 : vector<128x256xf32>
    %c0_38 = arith.constant 0 : index
    %c0_39 = arith.constant 0 : index
    %47 = vector.load %arg7[%c0_38, %c0_39] : memref<2x256xf32, #tpu.memory_space<vmem>>, vector<1x256xf32>
    %48 = vector.broadcast %47 : vector<1x256xf32> to vector<128x256xf32>
    %49 = arith.mulf %46, %48 : vector<128x256xf32>
    %cst_40 = arith.constant dense<0.000000e+00> : vector<128xf32>
    %50 = vector.multi_reduction <add>, %49, %cst_40 [1] : vector<128x256xf32> to vector<128xf32>
    %51 = vector.shape_cast %50 : vector<128xf32> to vector<128x1xf32>
    %c1_41 = arith.constant 1 : index
    %c0_42 = arith.constant 0 : index
    %52 = vector.load %arg7[%c1_41, %c0_42] : memref<2x256xf32, #tpu.memory_space<vmem>>, vector<1x256xf32>
    %53 = vector.broadcast %52 : vector<1x256xf32> to vector<128x256xf32>
    %54 = arith.mulf %46, %53 : vector<128x256xf32>
    %cst_43 = arith.constant dense<0.000000e+00> : vector<128xf32>
    %55 = vector.multi_reduction <add>, %54, %cst_43 [1] : vector<128x256xf32> to vector<128xf32>
    %56 = vector.shape_cast %55 : vector<128xf32> to vector<128x1xf32>
    %57 = tpu.concatenate %51, %56 in 1 : vector<128x1xf32>, vector<128x1xf32> -> vector<128x2xf32>
    %58 = tpu.transpose %57, [1, 0] : vector<128x2xf32> -> vector<2x128xf32>
    %59 = vector.shape_cast %58 : vector<2x128xf32> to vector<1x2x128xf32>
    %c0_44 = arith.constant 0 : index
    %c0_45 = arith.constant 0 : index
    %c0_46 = arith.constant 0 : index
    %60 = vector.load %arg8[%c0_44, %c0_45, %c0_46] : memref<1x2x1xf32, #tpu.memory_space<vmem>>, vector<1x2x1xf32>
    %61 = vector.broadcast %60 : vector<1x2x1xf32> to vector<1x2x128xf32>
    %62 = arith.addf %59, %61 : vector<1x2x128xf32>
    %c0_47 = arith.constant 0 : index
    %c0_48 = arith.constant 0 : index
    %c0_49 = arith.constant 0 : index
    %63 = vector.load %arg9[%c0_47, %c0_48, %c0_49] : memref<1x2x128xf32, #tpu.memory_space<vmem>>, vector<1x2x128xf32>
    tpu.vector_store %arg9[%c0_47, %c0_48, %c0_49], %62 {strides = array<i32>} : memref<1x2x128xf32, #tpu.memory_space<vmem>>, vector<1x2x128xf32>,
    return
  }
  func.func @transform_0(%arg0: i32, %arg1: i32) -> (i32, i32, i32, i32) {
    %c0_i32 = arith.constant 0 : i32
    %c0_i32_0 = arith.constant 0 : i32
    %c0_i32_1 = arith.constant 0 : i32
    return %arg0, %arg1, %c0_i32, %c0_i32_0 : i32, i32, i32, i32
  }
  func.func @transform_1(%arg0: i32, %arg1: i32) -> (i32, i32, i32, i32) {
    %c8_i32 = arith.constant 8 : i32
    %0 = arith.muli %arg1, %c8_i32 : i32
    %c1_i32 = arith.constant 1 : i32
    %1 = arith.subi %0, %c1_i32 : i32
    %c0_i32 = arith.constant 0 : i32
    %2 = arith.maxsi %1, %c0_i32 : i32
    %c0_i32_0 = arith.constant 0 : i32
    %c0_i32_1 = arith.constant 0 : i32
    %c0_i32_2 = arith.constant 0 : i32
    return %arg0, %2, %c0_i32_0, %c0_i32_1 : i32, i32, i32, i32
  }
  func.func @transform_2(%arg0: i32, %arg1: i32) -> (i32, i32, i32, i32) {
    %c1_i32 = arith.constant 1 : i32
    %0 = arith.addi %arg1, %c1_i32 : i32
    %c8_i32 = arith.constant 8 : i32
    %1 = arith.muli %0, %c8_i32 : i32
    %c15_i32 = arith.constant 15 : i32
    %2 = arith.minsi %1, %c15_i32 : i32
    %c0_i32 = arith.constant 0 : i32
    %c0_i32_0 = arith.constant 0 : i32
    %c0_i32_1 = arith.constant 0 : i32
    return %arg0, %2, %c0_i32, %c0_i32_0 : i32, i32, i32, i32
  }
  func.func @transform_3(%arg0: i32, %arg1: i32) -> (i32, i32, i32) {
    %c0_i32 = arith.constant 0 : i32
    %c0_i32_0 = arith.constant 0 : i32
    %c0_i32_1 = arith.constant 0 : i32
    %c0_i32_2 = arith.constant 0 : i32
    return %c0_i32, %c0_i32_0, %c0_i32_1 : i32, i32, i32
  }
  func.func @transform_4(%arg0: i32, %arg1: i32) -> (i32, i32) {
    %c0_i32 = arith.constant 0 : i32
    %c0_i32_0 = arith.constant 0 : i32
    %c0_i32_1 = arith.constant 0 : i32
    return %c0_i32, %c0_i32_0 : i32, i32
  }
  func.func @transform_5(%arg0: i32, %arg1: i32) -> (i32, i32) {
    %c0_i32 = arith.constant 0 : i32
    %c0_i32_0 = arith.constant 0 : i32
    %c0_i32_1 = arith.constant 0 : i32
    return %c0_i32, %c0_i32_0 : i32, i32
  }
  func.func @transform_6(%arg0: i32, %arg1: i32) -> (i32, i32, i32) {
    %c0_i32 = arith.constant 0 : i32
    %c0_i32_0 = arith.constant 0 : i32
    %c0_i32_1 = arith.constant 0 : i32
    %c0_i32_2 = arith.constant 0 : i32
    return %c0_i32, %c0_i32_0, %c0_i32_1 : i32, i32, i32
  }
  func.func @transform_7(%arg0: i32, %arg1: i32) -> (i32, i32, i32) {
    %c0_i32 = arith.constant 0 : i32
    %c0_i32_0 = arith.constant 0 : i32
    return %arg0, %c0_i32, %arg1 : i32, i32, i32
  }
}

</mosaic_0001>

<bundles_post_ra>
// kernel: tpu_custom_call.1
= control target key start
LH: loop header
LB: loop body
LE: loop exit
PB: predicated region body
PF: predicated region fallthrough
CT: control target
= control target key end

     0   :  { %s2928_s0 = inlined_call_operand.vmem [shape: f32[2,16,16,8], index: 0, kind: input, shape index: {}]   ;;  %s2929_s1 = inlined_call_operand.vmem [shape: f32[2,16,16,8], index: 1, kind: input, shape index: {}]   ;;  %s2930_s2 = inlined_call_operand.vmem [shape: f32[2,16,16,8], index: 2, kind: input, shape index: {}]   ;;  %s2931_s3 = inlined_call_operand.vmem [shape: f32[3,24,256], index: 3, kind: input, shape index: {}]   ;;  %s2932_s4 = inlined_call_operand.vmem [shape: f32[1,256], index: 4, kind: input, shape index: {}]   ;;  %s2933_s5 = inlined_call_operand.vmem [shape: f32[2,256], index: 5, kind: input, shape index: {}]   ;;  %s2934_s6 = inlined_call_operand.vmem [shape: f32[1,2,1], index: 6, kind: input, shape index: {}]   ;;  %s2935_s7 = inlined_call_operand.hbm [shape: f32[2,2,256], index: 7, kind: output, shape index: {}]  }
   0x1   :  { %2941 = sst [smem:[#allocation10_spill]] %s2928_s0 }
   0x2   :  { %12 = vsyncpa [#allocation4], 0 }
   0x3   :  { %14 = vsyncpa [#allocation4 + $0x1], 0  ;;  %s2169_s24 = smov 0   ;;  %s2171_s25 = smov 0  }
   0x4   :  { %s2173_s26 = smov 0   ;;  %s2175_s27 = smov 0  }
   0x5   :  { %s2177_s28 = smov 0   ;;  %s2179_s29 = smov 0  }
   0x6   :  { %s2181_s30 = smov 0   ;;  %s2183_s8 = smov 0  }
   0x7 LB: > { %2942 = sst [smem:[#allocation6_spill]] %s2112_s29  ;;  %s1833_s9 = sadd.s32 4294967295, %s2120_s8   ;;  %s2120_s8 = sphi %s2183_s8, %s20_s8   ;;  %s2116_s30 = sphi %s2181_s30, %s2954_s30   ;;  %s2112_s29 = sphi %s2179_s29, %s2953_s29   ;;  %s2108_s28 = sphi %s2177_s28, %s2952_s28   ;;  %s2104_s27 = sphi %s2175_s27, %s2951_s27   ;;  %s2100_s26 = sphi %s2173_s26, %s2957_s26   ;;  %s2096_s25 = sphi %s2171_s25, %s2956_s25   ;;  %s2092_s24 = sphi %s2169_s24, %s2955_s24  }
   0x8   : > { %2943 = sst [smem:[#allocation7_spill]] %s2116_s30  ;;  %s1834_s10 = sadd.s32 4294967294, %s2120_s8  }
   0x9   : > { %s29_s11 = sadd.s32 1, %s2112_s29  ;;  %s32_s12 = sadd.s32 1, %s2116_s30 }
   0xa   : > { %p30_p0 = scmp.ge.s32.totalorder %s29_s11, 2  ;;  %p235_p1 = scmp.ne.s32.totalorder %s2100_s26, %s2096_s25 }
   0xb   : > { %p236_p2 = scmp.eq.s32.totalorder %s1833_s9, 3  ;;  %p241_p5 = scmp.ne.s32.totalorder %s2096_s25, %s2092_s24 }
   0xc   : > { %s2959_s11 = smov (%p30_p0, %s29_s11), 0  ;;  %s2961_s12 = smov (!%p30_p0, %s32_s12), %s2116_s30 }
   0xd   : > { %2944 = sst [smem:[#allocation8_spill]] %s2959_s11  ;;  %s221_s13 = ssub.s32 %s2112_s29, %s2959_s11 }
   0xe   : > { %p2220_p3 = por %p236_p2, %p235_p1  ;;  %p34_p4 = scmp.ge.s32.totalorder %s2961_s12, 2 }
   0xf   : > { %p242_p6 = scmp.eq.s32.totalorder %s1834_s10, 3  ;;  %p1843_p7 = scmp.ge.s32.totalorder %s2120_s8, 1 }
  0x10   : > { %s2963_s12 = smov (%p34_p4, %s2961_s12), 0  ;;  %p326_p9 = scmp.lt.s32.totalorder %s2120_s8, 5 }
  0x11   : > { %2946 = sst [smem:[#allocation9_spill]] %s2963_s12  ;;  %p2229_p8 = por %p242_p6, %p241_p5 }
  0x12   : > { %s220_s16 = ssub.s32 %s2116_s30, %s2963_s12  ;;  %s225_s17 = sadd.s32 1, %s2100_s26 }
  0x13   : > { %s222_s18 = sor.u32 %s221_s13, %s220_s16  ;;  %p327_p10 = pnand %p1843_p7, %p326_p9 }
  0x14   : > { %p223_p11 = scmp.eq.s32.totalorder %s222_s18, 0  ;;  %s2936_s20 = sand.u32 (!%p327_p10), 1, %s2096_s25  }
  0x15   : > { %330 = sbr.rel (%p327_p10) target bundleno = 747 (0x2eb), region = 48  ;;  %s2242_s21 = sshll.u32 (!%p327_p10), %s2104_s27, 3 }
  0x16   : > { %s2238_s19 = scalar_select %p223_p11, %s2100_s26, %s225_s17  }
  0x17   : > { %s2246_s22 = sshll.u32 (!%p327_p10), %s2936_s20, 1  ;;  %p390_p12 = scmp.lt.s32.totalorder (!%p327_p10), %s2108_s28, 1 }
  0x18   : > { %p392_p13 = scmp.lt.s32.totalorder (!%p327_p10), %s2242_s21, 15  ;;  %s1850_s13 = sadd.s32 (!%p327_p10), 4294967295, %s2242_s21 }
  0x19   : > { %p402_p0 = scmp.gt.s32.totalorder (!%p327_p10), %s1850_s13, 0  ;;  %p1851_p1 = scmp.lt.s32.totalorder (!%p327_p10), %s1850_s13, 15 }
  0x1a   : > { %vm434_vm0 = vcmask 57344   ;;  %v2122_v0 = vmov 0.0   ;;  %s391_s23 = scalar_select %p390_p12, %s2108_s28, 1  ;;  %vm472_vm1 = vcmask 64512  }
  0x1b   : > { %435 = vst.msk [vmem:[#allocation2 + $0x7] sm:$0x1] %vm434_vm0, %v2122_v0  ;;  %436 = vst.msk [vmem:[#allocation2 + $0x27] sm:$0x1] %vm434_vm0, %v2122_v0  ;;  %s393_s9 = scalar_select %p392_p13, %s2242_s21, 15 }
  0x1c   : > { %437 = vst.msk [vmem:[#allocation2 + $0x47] sm:$0x1] %vm434_vm0, %v2122_v0  ;;  %438 = vst.msk [vmem:[#allocation2 + $0x67] sm:$0x1] %vm434_vm0, %v2122_v0  ;;  %s2292_s10 = sshll.u32 %s391_s23, 5  ;;  %s1943_s20 = sadd.s32 8, %s2242_s21 }
  0x1d   : > { %439 = vst.msk [vmem:[#allocation2 + $0x87] sm:$0x1] %vm434_vm0, %v2122_v0  ;;  %440 = vst.msk [vmem:[#allocation2 + $0xa7] sm:$0x1] %vm434_vm0, %v2122_v0  ;;  %s1846_s16 = sshll.u32 %s393_s9, 1  ;;  %s2948_s0 = sld [smem:[#allocation10_spill]] }
  0x1e   : > { %441 = vst.msk [vmem:[#allocation2 + $0xc7] sm:$0x1] %vm434_vm0, %v2122_v0  ;;  %442 = vst.msk [vmem:[#allocation2 + $0xe7] sm:$0x1] %vm434_vm0, %v2122_v0  ;;  %s396_s17 = sadd.s32 %s2292_s10, %s1846_s16  ;;  %p2302_p2 = scmp.lt.s32.totalorder %s1943_s20, 15 }
  0x1f   : > { %443 = vst.msk [vmem:[#allocation2 + $0x107] sm:$0x1] %vm434_vm0, %v2122_v0  ;;  %444 = vst.msk [vmem:[#allocation2 + $0x127] sm:$0x1] %vm434_vm0, %v2122_v0  ;;  %s1848_s18 = sshll.u32 %s396_s17, 3  ;;  %p1866_p4 = scmp.le.s32.totalorder %s2104_s27, 0 }
  0x20   : > { %445 = vst.msk [vmem:[#allocation2 + $0x18] sm:$0x1] %vm434_vm0, %v2122_v0  ;;  %446 = vst.msk [vmem:[#allocation2 + $0x38] sm:$0x1] %vm434_vm0, %v2122_v0  ;;  %s403_s9 = scalar_select %p402_p0, %s1850_s13, 0 }
  0x21   : > { %447 = vst.msk [vmem:[#allocation2 + $0x58] sm:$0x1] %vm434_vm0, %v2122_v0  ;;  %448 = vst.msk [vmem:[#allocation2 + $0x78] sm:$0x1] %vm434_vm0, %v2122_v0  ;;  %s2965_s20 = smov (!%p2302_p2, %s1943_s20), 15 }
  0x22   : > { %449 = vst.msk [vmem:[#allocation2 + $0x98] sm:$0x1] %vm434_vm0, %v2122_v0  ;;  %450 = vst.msk [vmem:[#allocation2 + $0xb8] sm:$0x1] %vm434_vm0, %v2122_v0  ;;  %s2967_s9 = smov (!%p1851_p1, %s403_s9), 15  ;;  %s2969_s20 = smov (!%p2302_p2, %s2965_s20), 15 }
  0x23   : > { %451 = vst.msk [vmem:[#allocation2 + $0xd8] sm:$0x1] %vm434_vm0, %v2122_v0  ;;  %452 = vst.msk [vmem:[#allocation2 + $0xf8] sm:$0x1] %vm434_vm0, %v2122_v0  ;;  %s2300_s30 = scalar_lea.vmem %s2948_s0, %s1848_s18  ;;  %s1856_s11 = sshll.u32 %s2967_s9, 1 }
  0x24   : > { %453 = vst.msk [vmem:[#allocation2 + $0x118] sm:$0x1] %vm434_vm0, %v2122_v0  ;;  %454 = vst.msk [vmem:[#allocation2 + $0x138] sm:$0x1] %vm434_vm0, %v2122_v0  ;;  %v455_v1 = vld [vmem:[%s2300_s30] sm:$0xff]  ;;  %v456_v2 = vld [vmem:[%s2300_s30 + $0x8] sm:$0xff]  ;;  %s410_s12 = sadd.s32 %s1856_s11, %s2292_s10 }
  0x25   : > { %v457_v3 = vld [vmem:[%s2300_s30 + $0x10] sm:$0xff]  ;;  %473 = vst.msk [vmem:[#allocation2 + $0x28] sm:$0xff] %vm472_vm1, %v455_v1  ;;  %474 = vst.msk [vmem:[#allocation2 + $0x30] sm:$0xff] %vm472_vm1, %v456_v2  ;;  %v458_v4 = vld [vmem:[%s2300_s30 + $0x18] sm:$0xff]  ;;  %s1863_s21 = sshll.u32 %s2969_s20, 1  ;;  %s1858_s13 = sshll.u32 %s410_s12, 3 }
  0x26   : > { %475 = vst.msk [vmem:[#allocation2 + $0x48] sm:$0xff] %vm472_vm1, %v457_v3  ;;  %v459_v5 = vld [vmem:[%s2300_s30 + $0x20] sm:$0xff]  ;;  %v460_v6 = vld [vmem:[%s2300_s30 + $0x28] sm:$0xff]  ;;  %476 = vst.msk [vmem:[#allocation2 + $0x50] sm:$0xff] %vm472_vm1, %v458_v4  ;;  %s427_s16 = sadd.s32 %s1863_s21, %s2292_s10  ;;  %s412_s23 = scalar_lea.vmem %s2929_s1, %s1858_s13 }
  0x27   : > { %477 = vst.msk [vmem:[#allocation2 + $0x68] sm:$0xff] %vm472_vm1, %v459_v5  ;;  %478 = vst.msk [vmem:[#allocation2 + $0x70] sm:$0xff] %vm472_vm1, %v460_v6  ;;  %v461_v7 = vld [vmem:[%s2300_s30 + $0x30] sm:$0xff]  ;;  %v462_v8 = vld [vmem:[%s2300_s30 + $0x38] sm:$0xff]  ;;  %s1865_s9 = sshll.u32 %s427_s16, 3  ;;  %s388_s11 = scalar_lea.vmem [#allocation3], %s2246_s22 }
  0x28   : > { %v463_v9 = vld [vmem:[%s2300_s30 + $0x40] sm:$0xff]  ;;  %479 = vst.msk [vmem:[#allocation2 + $0x88] sm:$0xff] %vm472_vm1, %v461_v7  ;;  %480 = vst.msk [vmem:[#allocation2 + $0x90] sm:$0xff] %vm472_vm1, %v462_v8  ;;  %v464_v10 = vld [vmem:[%s2300_s30 + $0x48] sm:$0xff]  ;;  %s429_s20 = scalar_lea.vmem %s2930_s2, %s1865_s9  ;;  %492 = sbr.rel (%p1866_p4) target bundleno = 47 (0x2f), region = 52 }
  0x29   : > { %481 = vst.msk [vmem:[#allocation2 + $0xa8] sm:$0xff] %vm472_vm1, %v463_v9  ;;  %v465_v11 = vld [vmem:[%s2300_s30 + $0x50] sm:$0xff]  ;;  %v466_v12 = vld [vmem:[%s2300_s30 + $0x58] sm:$0xff]  ;;  %482 = vst.msk [vmem:[#allocation2 + $0xb0] sm:$0xff] %vm472_vm1, %v464_v10 }
  0x2a   : > { %483 = vst.msk [vmem:[#allocation2 + $0xc8] sm:$0xff] %vm472_vm1, %v465_v11  ;;  %484 = vst.msk [vmem:[#allocation2 + $0xd0] sm:$0xff] %vm472_vm1, %v466_v12  ;;  %v467_v13 = vld [vmem:[%s2300_s30 + $0x60] sm:$0xff]  ;;  %v468_v14 = vld [vmem:[%s2300_s30 + $0x68] sm:$0xff] }
  0x2b   : > { %v469_v15 = vld [vmem:[%s2300_s30 + $0x70] sm:$0xff]  ;;  %485 = vst.msk [vmem:[#allocation2 + $0xe8] sm:$0xff] %vm472_vm1, %v467_v13  ;;  %486 = vst.msk [vmem:[#allocation2 + $0xf0] sm:$0xff] %vm472_vm1, %v468_v14  ;;  %v470_v16 = vld [vmem:[%s2300_s30 + $0x78] sm:$0xff] }
  0x2c   : > { %487 = vst.msk [vmem:[#allocation2 + $0x108] sm:$0xff] %vm472_vm1, %v469_v15  ;;  %488 = vst.msk [vmem:[#allocation2 + $0x110] sm:$0xff] %vm472_vm1, %v470_v16 }
  0x2d   : > { %v493_v17 = vld [vmem:[%s412_s23] sm:$0xff]  ;;  %v494_v18 = vld [vmem:[%s412_s23 + $0x8] sm:$0xff] }
  0x2e   : > { %495 = vst.msk [vmem:[#allocation2 + $0x8] sm:$0xff] %vm472_vm1, %v493_v17  ;;  %496 = vst.msk [vmem:[#allocation2 + $0x10] sm:$0xff] %vm472_vm1, %v494_v18 }
  0x2f PF: > { %p1867_p5 = scmp.ne.s32.totalorder %s2104_s27, 0 }
  0x31   : > { %500 = sbr.rel (%p1867_p5) target bundleno = 56 (0x38), region = 56 }
  0x36   : > { %v2123_v19 = vmov 0.0  }
  0x37   : > { %501 = vst.msk [vmem:[#allocation2 + $0x8] sm:$0xff] %vm472_vm1, %v2123_v19  ;;  %502 = vst.msk [vmem:[#allocation2 + $0x10] sm:$0xff] %vm472_vm1, %v2123_v19 }
  0x38 PF: > { %p1868_p6 = scmp.ge.s32.totalorder %s2104_s27, 1 }
  0x3a   : > { %506 = sbr.rel (%p1868_p6) target bundleno = 65 (0x41), region = 60 }
  0x3f   : > { %v507_v20 = vld [vmem:[%s429_s20] sm:$0xff]  ;;  %v508_v21 = vld [vmem:[%s429_s20 + $0x8] sm:$0xff] }
  0x40   : > { %510 = vst.msk [vmem:[#allocation2 + $0x128] sm:$0xff] %vm472_vm1, %v507_v20  ;;  %511 = vst.msk [vmem:[#allocation2 + $0x130] sm:$0xff] %vm472_vm1, %v508_v21 }
  0x41 PF: > { %p1869_p7 = scmp.ne.s32.totalorder %s2104_s27, 1 }
  0x43   : > { %515 = sbr.rel (%p1869_p7) target bundleno = 74 (0x4a), region = 64 }
  0x48   : > { %v2124_v22 = vmov 0.0  }
  0x49   : > { %517 = vst.msk [vmem:[#allocation2 + $0x128] sm:$0xff] %vm472_vm1, %v2124_v22  ;;  %518 = vst.msk [vmem:[#allocation2 + $0x130] sm:$0xff] %vm472_vm1, %v2124_v22 }
  0x4a PF: > { %v549_v23 = vld [vmem:[#allocation2 + $0xa8] sm:$0xff]  ;;  %906 = vmatprep.mubr.f32.mxu0 %v2122_v0  ;;  %954 = vmatprep.mubr.f32.mxu1 %v2122_v0  ;;  %s2125_s0 = smov 8   ;;  %s2126_s29 = smov 16   ;;  %v550_v27 = vld [vmem:[#allocation2 + $0xb0] sm:$0xff]  ;;  %v1875_v31 = vld [vmem:[%s2931_s3 + $0x58] sm:$0xff]  ;;  %vm759_vm2 = vcmask 130048  }
  0x4b   : > { %v541_v24 = vld [vmem:[#allocation2 + $0x28] sm:$0xff]  ;;  %619 = vrot.lane.b32.xlu0 %v549_v23, %s2125_s0  ;;  %v570_v28 = vld [vmem:[#allocation2 + $0xb1] sm:$0xff]  ;;  %868 = vmatprep.subr.mxu0 %v1875_v31  ;;  %v1872_v36 = vld [vmem:[%s2931_s3 + $0x40] sm:$0xff]  ;;  %vm793_vm3 = vcmask 195584   ;;  %vm1637_vm4 = vcmask 7168   ;;  %s1932_s16 = sshll.u32 %s2108_s28, 1 }
  0x4c   : > { %603 = vrot.lane.b32.xlu1 %v541_v24, %s2125_s0  ;;  %v569_v25 = vld [vmem:[#allocation2 + $0xa9] sm:$0xff]  ;;  %v562_v30 = vld [vmem:[#allocation2 + $0x31] sm:$0xff]  ;;  %1944 = vmatprep.subr.mxu1 %v1875_v31  ;;  %v784_v18 = vld [vmem:[%s2931_s3 + $0x20] sm:$0xff]  ;;  %s1706_s17 = sadd.s32 %s2104_s27, %s1932_s16  ;;  %s1710_s23 = sshll.u32 %s388_s11, 4  ;;  %s1711_s23 = int_to_ptr.vmem [resolvable:$true] %s1710_s23 }
  0x4d   : > { %v561_v26 = vld [vmem:[#allocation2 + $0x29] sm:$0xff]  ;;  %v1871_v37 = vld [vmem:[%s2931_s3 + $0x38] sm:$0xff]  ;;  %v1912_v19 = vld [vmem:[%s2931_s3 + $0x80] sm:$0xff]  ;;  %s1933_s18 = sshll.u32 %s1706_s17, 5  ;;  %s2950_s10 = sand.u32 1, %s2096_s25  }
  0x4e   : > { %v542_v29 = vld [vmem:[#allocation2 + $0x30] sm:$0xff]  ;;  %v1873_v33 = vld [vmem:[%s2931_s3 + $0x48] sm:$0xff]  ;;  %v783_v21 = vld [vmem:[%s2931_s3 + $0x18] sm:$0xff]  ;;  %s1708_s30 = scalar_lea.hbm %s2935_s7, %s1933_s18  ;;  %s1695_s12 = scalar_lea.sflag [#allocation4], %s2950_s10 }
  0x4f   : > { %699 = vrot.lane.b32.xlu0 %v569_v25, %s2126_s29  ;;  %v1874_v32 = vld [vmem:[%s2931_s3 + $0x50] sm:$0xff]  ;;  %v551_v34 = vld [vmem:[#allocation2 + $0xc8] sm:$0xff]  ;;  %v1911_v22 = vld [vmem:[%s2931_s3 + $0x78] sm:$0xff]  ;;  %s2028_s21 = scalar_lea.vmem %s1711_s23, 32  ;;  %s2128_s27 = smov [#allocation3]  }
  0x50   : > { %683 = vrot.lane.b32.xlu1 %v561_v26, %s2126_s29  ;;  %v571_v35 = vld [vmem:[#allocation2 + $0xc9] sm:$0xff]  ;;  %869 = vmatpush1.msra.mxu0 %v1874_v32  ;;  %v572_v43 = vld [vmem:[#allocation2 + $0xd1] sm:$0xff]  ;;  %p2029_p9 = scmp.ne.s32.totalorder %s1711_s23, %s2028_s21  ;;  %s2032_s28 = sshll.u32 %s2128_s27, 4  ;;  %s2033_s28 = int_to_ptr.vmem [resolvable:$false] %s2032_s28 }
  0x51   : > { %1947 = vmatpush1.msra.mxu1 %v1874_v32  ;;  %870 = vmatprep.subr.mxu0 %v1873_v33  ;;  %v1870_v38 = vld [vmem:[%s2931_s3 + $0x30] sm:$0xff]  ;;  %v543_v39 = vld [vmem:[#allocation2 + $0x48] sm:$0xff]  ;;  %s2034_s13 = scalar_lea.vmem %s2033_s28, 64  ;;  %p2035_p12 = scmp.lt.s32.totalorder %s1711_s23, %s2033_s28 }
  0x52   : > { %1945 = vmatprep.subr.mxu1 %v1873_v33  ;;  %v563_v40 = vld [vmem:[#allocation2 + $0x49] sm:$0xff]  ;;  %871 = vmatpush1.msra.mxu0 %v1872_v36  ;;  %v564_v46 = vld [vmem:[#allocation2 + $0x51] sm:$0xff]  ;;  %v1908_v33 = vld [vmem:[%s2931_s3 + $0x60] sm:$0xff]  ;;  %p2030_p10 = pnand %p2029_p9, %p2220_p3  ;;  %p2036_p13 = scmp.lt.s32.totalorder %s2034_s13, %s2028_s21 }
  0x53   : > { %621 = vrot.lane.b32.xlu0 %v550_v27, %s2125_s0  ;;  %1948 = vmatpush1.msra.mxu1 %v1872_v36  ;;  %v785_v41 = vld [vmem:[%s2931_s3 + $0x28] sm:$0xff]  ;;  %v552_v42 = vld [vmem:[#allocation2 + $0xd0] sm:$0xff] }
  0x54   : > { %701 = vrot.lane.b32.xlu1 %v570_v28, %s2126_s29  ;;  %872 = vmatprep.subr.mxu0 %v1871_v37  ;;  %v1913_v44 = vld [vmem:[%s2931_s3 + $0x88] sm:$0xff]  ;;  %v544_v45 = vld [vmem:[#allocation2 + $0x50] sm:$0xff]  ;;  %p2031_p11 = pneg %p2030_p10  ;;  %p2037_p0 = por %p2036_p13, %p2035_p12 }
  0x55   : > { %1946 = vmatprep.subr.mxu1 %v1871_v37  ;;  %873 = vmatpush1.msra.mxu0 %v1870_v38  ;;  %v553_v47 = vld [vmem:[#allocation2 + $0xe8] sm:$0xff]  ;;  %v554_v51 = vld [vmem:[#allocation2 + $0xf0] sm:$0xff] }
  0x56   : > { %1949 = vmatpush1.msra.mxu1 %v1870_v38  ;;  %1209 = vmatprep.subr.mxu0 %v1913_v44  ;;  %v573_v48 = vld [vmem:[#allocation2 + $0xe9] sm:$0xff]  ;;  %v574_v52 = vld [vmem:[#allocation2 + $0xf1] sm:$0xff]  ;;  %p2038_p1 = pnand %p2037_p0, %p2031_p11 }
  0x57   : > { %605 = vrot.lane.b32.xlu0 %v542_v29, %s2125_s0  ;;  %1035 = vmatprep.subr.mxu1 %v785_v41  ;;  %v545_v49 = vld [vmem:[#allocation2 + $0x68] sm:$0xff]  ;;  %v546_v53 = vld [vmem:[#allocation2 + $0x70] sm:$0xff]  ;;  %v780_v29 = vld [vmem:[%s2931_s3] sm:$0xff] }
  0x58   : > { %685 = vrot.lane.b32.xlu1 %v562_v30, %s2126_s29  ;;  %v565_v50 = vld [vmem:[#allocation2 + $0x69] sm:$0xff]  ;;  %v566_v54 = vld [vmem:[#allocation2 + $0x71] sm:$0xff] }
  0x59   : > { %v555_v55 = vld [vmem:[#allocation2 + $0x108] sm:$0xff]  ;;  %v556_v59 = vld [vmem:[#allocation2 + $0x110] sm:$0xff] }
  0x5a   : > { %v575_v56 = vld [vmem:[#allocation2 + $0x109] sm:$0xff]  ;;  %v576_v60 = vld [vmem:[#allocation2 + $0x111] sm:$0xff] }
  0x5b   : > { %623 = vrot.lane.b32.xlu0 %v551_v34, %s2125_s0  ;;  %v547_v57 = vld [vmem:[#allocation2 + $0x88] sm:$0xff]  ;;  %v548_v61 = vld [vmem:[#allocation2 + $0x90] sm:$0xff] }
  0x5c   : > { %703 = vrot.lane.b32.xlu1 %v571_v35, %s2126_s29  ;;  %v567_v58 = vld [vmem:[#allocation2 + $0x89] sm:$0xff]  ;;  %v568_v62 = vld [vmem:[#allocation2 + $0x91] sm:$0xff] }
  0x5d   : > { %v539_v63 = vld [vmem:[#allocation2 + $0x8] sm:$0xff]  ;;  %v540_v2 = vld [vmem:[#allocation2 + $0x10] sm:$0xff] }
  0x5e   : > { %v559_v1 = vld [vmem:[#allocation2 + $0x9] sm:$0xff]  ;;  %v560_v3 = vld [vmem:[#allocation2 + $0x11] sm:$0xff] }
  0x5f   : > { %607 = vrot.lane.b32.xlu0 %v543_v39, %s2125_s0  ;;  %v557_v4 = vld [vmem:[#allocation2 + $0x128] sm:$0xff]  ;;  %v558_v6 = vld [vmem:[#allocation2 + $0x130] sm:$0xff] }
  0x60   : > { %687 = vrot.lane.b32.xlu1 %v563_v40, %s2126_s29  ;;  %v577_v5 = vld [vmem:[#allocation2 + $0x129] sm:$0xff]  ;;  %v578_v7 = vld [vmem:[#allocation2 + $0x131] sm:$0xff] }
  0x61   : > { %v529_v10 = vld [vmem:[#allocation2 + $0xa7] sm:$0xff]  ;;  %v530_v20 = vld [vmem:[#allocation2 + $0xaf] sm:$0xff] }
  0x62   : > { %v521_v11 = vld [vmem:[#allocation2 + $0x27] sm:$0xff]  ;;  %v782_v23 = vld [vmem:[%s2931_s3 + $0x10] sm:$0xff] }
  0x63   : > { %625 = vrot.lane.b32.xlu0 %v552_v42, %s2125_s0  ;;  %v1910_v24 = vld [vmem:[%s2931_s3 + $0x70] sm:$0xff]  ;;  %v781_v27 = vld [vmem:[%s2931_s3 + $0x8] sm:$0xff] }
  0x64   : > { %705 = vrot.lane.b32.xlu1 %v572_v43, %s2126_s29  ;;  %v522_v31 = vld [vmem:[#allocation2 + $0x2f] sm:$0xff]  ;;  %v531_v38 = vld [vmem:[#allocation2 + $0xc7] sm:$0xff] }
  0x65   : > { %v1909_v32 = vld [vmem:[%s2931_s3 + $0x68] sm:$0xff] }
  0x66   : > { %v523_v43 = vld [vmem:[#allocation2 + $0x47] sm:$0xff] }
  0x67   : > { %609 = vrot.lane.b32.xlu0 %v544_v45, %s2125_s0 }
  0x68   : > { %689 = vrot.lane.b32.xlu1 %v564_v46, %s2126_s29 }
  0x6b   : > { %627 = vrot.lane.b32.xlu0 %v553_v47, %s2125_s0 }
  0x6c   : > { %707 = vrot.lane.b32.xlu1 %v573_v48, %s2126_s29  ;;  %v532_v48 = vld [vmem:[#allocation2 + $0xcf] sm:$0xff] }
  0x6f   : > { %611 = vrot.lane.b32.xlu0 %v545_v49, %s2125_s0 }
  0x70   : > { %691 = vrot.lane.b32.xlu1 %v565_v50, %s2126_s29 }
  0x73   : > { %629 = vrot.lane.b32.xlu0 %v554_v51, %s2125_s0 }
  0x74   : > { %709 = vrot.lane.b32.xlu1 %v574_v52, %s2126_s29 }
  0x77   : > { %613 = vrot.lane.b32.xlu0 %v546_v53, %s2125_s0  ;;  %v524_v53 = vld [vmem:[#allocation2 + $0x4f] sm:$0xff] }
  0x78   : > { %693 = vrot.lane.b32.xlu1 %v566_v54, %s2126_s29 }
  0x7b   : > { %631 = vrot.lane.b32.xlu0 %v555_v55, %s2125_s0 }
  0x7c   : > { %711 = vrot.lane.b32.xlu1 %v575_v56, %s2126_s29 }
  0x7f   : > { %615 = vrot.lane.b32.xlu0 %v547_v57, %s2125_s0 }
  0x80   : > { %695 = vrot.lane.b32.xlu1 %v567_v58, %s2126_s29  ;;  %v533_v58 = vld [vmem:[#allocation2 + $0xe7] sm:$0xff] }
  0x83   : > { %633 = vrot.lane.b32.xlu0 %v556_v59, %s2125_s0 }
  0x84   : > { %713 = vrot.lane.b32.xlu1 %v576_v60, %s2126_s29 }
  0x87   : > { %617 = vrot.lane.b32.xlu0 %v548_v61, %s2125_s0 }
  0x88   : > { %697 = vrot.lane.b32.xlu1 %v568_v62, %s2126_s29 }
  0x8b   : > { %599 = vrot.lane.b32.xlu0 %v539_v63, %s2125_s0  ;;  %v525_v63 = vld [vmem:[#allocation2 + $0x67] sm:$0xff] }
  0x8c   : > { %679 = vrot.lane.b32.xlu1 %v559_v1, %s2126_s29 }
  0x8f   : > { %601 = vrot.lane.b32.xlu0 %v540_v2, %s2125_s0 }
  0x90   : > { %681 = vrot.lane.b32.xlu1 %v560_v3, %s2126_s29 }
  0x93   : > { %635 = vrot.lane.b32.xlu0 %v557_v4, %s2125_s0 }
  0x94   : > { %715 = vrot.lane.b32.xlu1 %v577_v5, %s2126_s29  ;;  %v534_v5 = vld [vmem:[#allocation2 + $0xef] sm:$0xff] }
  0x97   : > { %637 = vrot.lane.b32.xlu0 %v558_v6, %s2125_s0 }
  0x98   : > { %717 = vrot.lane.b32.xlu1 %v578_v7, %s2126_s29 }
  0xbd   : > { %v620_v8 = vpop.permute.xlu0 %619 }
  0xbe   : > { %v604_v9 = vpop.permute.xlu1 %603  ;;  %v749_v12 = vsel %vm472_vm1, %v529_v10, %v620_v8  ;;  %v526_v10 = vld [vmem:[#allocation2 + $0x6f] sm:$0xff] }
  0xbf   : > { %v741_v13 = vsel %vm472_vm1, %v521_v11, %v604_v9 }
  0xc1   : > { %v700_v14 = vpop.permute.xlu0 %699 }
  0xc2   : > { %v684_v15 = vpop.permute.xlu1 %683  ;;  %v2436_v16 = vsel %vm759_vm2, %v749_v12, %v700_v14 }
  0xc3   : > { %v2439_v17 = vsel %vm759_vm2, %v741_v13, %v684_v15  ;;  %1884 = vmatmul.mubr.msk.f32.vlgmr.msra.gmra.mxu1 %vm793_vm3, %v2436_v16  ;;  %v535_v15 = vld [vmem:[#allocation2 + $0x107] sm:$0xff] }
  0xc4   : > { %1876 = vmatmul.mubr.msk.f32.vlgmr.msra.gmra.mxu0 %vm793_vm3, %v2439_v17  ;;  %960 = vmatprep.mubr.f32.mxu1 %v2122_v0 }
  0xc5   : > { %912 = vmatprep.mubr.f32.mxu0 %v2122_v0  ;;  %v622_v25 = vpop.permute.xlu0 %621  ;;  %1036 = vmatpush1.msra.mxu1 %v784_v18 }
  0xc6   : > { %v702_v26 = vpop.permute.xlu1 %701  ;;  %1210 = vmatpush1.msra.mxu0 %v1912_v19  ;;  %v750_v28 = vsel %vm472_vm1, %v530_v20, %v622_v25  ;;  %1037 = vmatprep.subr.mxu1 %v783_v21 }
  0xc7   : > { %1211 = vmatprep.subr.mxu0 %v1911_v22  ;;  %v2473_v30 = vsel %vm759_vm2, %v750_v28, %v702_v26  ;;  %1038 = vmatpush1.msra.mxu1 %v782_v23  ;;  %v527_v22 = vld [vmem:[#allocation2 + $0x87] sm:$0xff] }
  0xc8   : > { %1212 = vmatpush1.msra.mxu0 %v1910_v24  ;;  %1885 = vmatmul.mubr.msk.f32.gmra.mxu1 %vm793_vm3, %v2473_v30 }
  0xc9   : > { %1039 = vmatprep.subr.mxu1 %v781_v27  ;;  %v606_v34 = vpop.permute.xlu0 %605  ;;  %966 = vmatprep.mubr.f32.mxu1 %v2122_v0  ;;  %v536_v27 = vld [vmem:[#allocation2 + $0x10f] sm:$0xff] }
  0xca   : > { %v686_v35 = vpop.permute.xlu1 %685  ;;  %1040 = vmatpush1.msra.mxu1 %v780_v29  ;;  %v742_v36 = vsel %vm472_vm1, %v522_v31, %v606_v34  ;;  %1213 = vmatprep.subr.mxu0 %v1909_v32 }
  0xcb   : > { %v2486_v37 = vsel %vm759_vm2, %v742_v36, %v686_v35  ;;  %1214 = vmatpush1.msra.mxu0 %v1908_v33  ;;  %v528_v33 = vld [vmem:[#allocation2 + $0x8f] sm:$0xff] }
  0xcc   : > { %1877 = vmatmul.mubr.msk.f32.gmra.mxu0 %vm793_vm3, %v2486_v37 }
  0xcd   : > { %v624_v39 = vpop.permute.xlu0 %623  ;;  %918 = vmatprep.mubr.f32.mxu0 %v2122_v0 }
  0xce   : > { %v704_v40 = vpop.permute.xlu1 %703  ;;  %v751_v41 = vsel %vm472_vm1, %v531_v38, %v624_v39  ;;  %v519_v39 = vld [vmem:[#allocation2 + $0x7] sm:$0xff] }
  0xcf   : > { %v2493_v42 = vsel %vm759_vm2, %v751_v41, %v704_v40 }
  0xd0   : > { %1886 = vmatmul.mubr.msk.f32.gmra.mxu1 %vm793_vm3, %v2493_v42 }
  0xd1   : > { %v608_v44 = vpop.permute.xlu0 %607  ;;  %972 = vmatprep.mubr.f32.mxu1 %v2122_v0 }
  0xd2   : > { %v688_v45 = vpop.permute.xlu1 %687  ;;  %v743_v46 = vsel %vm472_vm1, %v523_v43, %v608_v44 }
  0xd3   : > { %v2500_v47 = vsel %vm759_vm2, %v743_v46, %v688_v45  ;;  %v520_v45 = vld [vmem:[#allocation2 + $0xf] sm:$0xff] }
  0xd4   : > { %1878 = vmatmul.mubr.msk.f32.gmra.mxu0 %vm793_vm3, %v2500_v47 }
  0xd5   : > { %v626_v49 = vpop.permute.xlu0 %625  ;;  %924 = vmatprep.mubr.f32.mxu0 %v2122_v0 }
  0xd6   : > { %v706_v50 = vpop.permute.xlu1 %705  ;;  %v752_v51 = vsel %vm472_vm1, %v532_v48, %v626_v49 }
  0xd7   : > { %v2507_v52 = vsel %vm759_vm2, %v752_v51, %v706_v50  ;;  %v538_v51 = vld [vmem:[#allocation2 + $0x12f] sm:$0xff] }
  0xd8   : > { %1887 = vmatmul.mubr.msk.f32.gmra.mxu1 %vm793_vm3, %v2507_v52 }
  0xd9   : > { %v610_v54 = vpop.permute.xlu0 %609  ;;  %978 = vmatprep.mubr.f32.mxu1 %v2122_v0 }
  0xda   : > { %v690_v55 = vpop.permute.xlu1 %689  ;;  %v744_v56 = vsel %vm472_vm1, %v524_v53, %v610_v54 }
  0xdb   : > { %v2514_v57 = vsel %vm759_vm2, %v744_v56, %v690_v55 }
  0xdc   : > { %1879 = vmatmul.mubr.msk.f32.gmra.mxu0 %vm793_vm3, %v2514_v57 }
  0xdd   : > { %v628_v59 = vpop.permute.xlu0 %627  ;;  %930 = vmatprep.mubr.f32.mxu0 %v2122_v0 }
  0xde   : > { %v708_v60 = vpop.permute.xlu1 %707  ;;  %v753_v61 = vsel %vm472_vm1, %v533_v58, %v628_v59 }
  0xdf   : > { %v2521_v62 = vsel %vm759_vm2, %v753_v61, %v708_v60 }
  0xe0   : > { %1888 = vmatmul.mubr.msk.f32.gmra.mxu1 %vm793_vm3, %v2521_v62 }
  0xe1   : > { %v612_v1 = vpop.permute.xlu0 %611  ;;  %984 = vmatprep.mubr.f32.mxu1 %v2122_v0 }
  0xe2   : > { %v692_v2 = vpop.permute.xlu1 %691  ;;  %v745_v3 = vsel %vm472_vm1, %v525_v63, %v612_v1 }
  0xe3   : > { %v2528_v4 = vsel %vm759_vm2, %v745_v3, %v692_v2 }
  0xe4   : > { %1880 = vmatmul.mubr.msk.f32.gmra.mxu0 %vm793_vm3, %v2528_v4 }
  0xe5   : > { %v630_v6 = vpop.permute.xlu0 %629  ;;  %936 = vmatprep.mubr.f32.mxu0 %v2122_v0 }
  0xe6   : > { %v710_v7 = vpop.permute.xlu1 %709  ;;  %v754_v8 = vsel %vm472_vm1, %v534_v5, %v630_v6 }
  0xe7   : > { %v2535_v9 = vsel %vm759_vm2, %v754_v8, %v710_v7 }
  0xe8   : > { %1889 = vmatmul.mubr.msk.f32.gmra.mxu1 %vm793_vm3, %v2535_v9 }
  0xe9   : > { %v614_v11 = vpop.permute.xlu0 %613  ;;  %990 = vmatprep.mubr.f32.mxu1 %v2122_v0 }
  0xea   : > { %v694_v12 = vpop.permute.xlu1 %693  ;;  %v746_v13 = vsel %vm472_vm1, %v526_v10, %v614_v11 }
  0xeb   : > { %v2542_v14 = vsel %vm759_vm2, %v746_v13, %v694_v12 }
  0xec   : > { %1881 = vmatmul.mubr.msk.f32.gmra.mxu0 %vm793_vm3, %v2542_v14 }
  0xed   : > { %v632_v18 = vpop.permute.xlu0 %631  ;;  %942 = vmatprep.mubr.f32.mxu0 %v2122_v0 }
  0xee   : > { %v712_v19 = vpop.permute.xlu1 %711  ;;  %v755_v20 = vsel %vm472_vm1, %v535_v15, %v632_v18  ;;  %v1378_v18 = vlaneseq }
  0xef   : > { %v2549_v21 = vsel %vm759_vm2, %v755_v20, %v712_v19 }
  0xf0   : > { %1890 = vmatmul.mubr.msk.f32.gmra.mxu1 %vm793_vm3, %v2549_v21 }
  0xf1   : > { %v616_v23 = vpop.permute.xlu0 %615  ;;  %996 = vmatprep.mubr.f32.mxu1 %v2122_v0 }
  0xf2   : > { %v696_v24 = vpop.permute.xlu1 %695  ;;  %v747_v25 = vsel %vm472_vm1, %v527_v22, %v616_v23 }
  0xf3   : > { %v768_v26 = vsel %vm759_vm2, %v747_v25, %v696_v24 }
  0xf4   : > { %1882 = vmatmul.mubr.msk.f32.gmra.mxu0 %vm793_vm3, %v768_v26 }
  0xf5   : > { %v634_v28 = vpop.permute.xlu0 %633  ;;  %948 = vmatprep.mubr.f32.mxu0 %v2122_v0 }
  0xf6   : > { %v714_v29 = vpop.permute.xlu1 %713  ;;  %v756_v31 = vsel %vm472_vm1, %v536_v27, %v634_v28  ;;  %v1376_v28 = vld [vmem:[%s2932_s4] sm:$0x3] }
  0xf7   : > { %v2560_v32 = vsel %vm759_vm2, %v756_v31, %v714_v29 }
  0xf8   : > { %1891 = vmatmul.mubr.msk.f32.gmra.mxu1 %vm793_vm3, %v2560_v32 }
  0xf9   : > { %v618_v34 = vpop.permute.xlu0 %617  ;;  %1073 = vmatprep.mubr.f32.mxu1 %v2122_v0 }
  0xfa   : > { %v698_v35 = vpop.permute.xlu1 %697  ;;  %v748_v36 = vsel %vm472_vm1, %v528_v33, %v618_v34 }
  0xfb   : > { %v769_v38 = vsel %vm759_vm2, %v748_v36, %v698_v35 }
  0xfc   : > { %1883 = vmatmul.mubr.msk.f32.gmra.mxu0 %vm793_vm3, %v769_v38 }
  0xfd   : > { %v600_v40 = vpop.permute.xlu0 %599  ;;  %1247 = vmatprep.mubr.f32.mxu0 %v2122_v0 }
  0xfe   : > { %v680_v41 = vpop.permute.xlu1 %679  ;;  %v739_v43 = vsel %vm472_vm1, %v519_v39, %v600_v40 }
  0xff   : > { %v760_v44 = vsel %vm759_vm2, %v739_v43, %v680_v41  ;;  %v1930_v41 = vld [vmem:[%s2933_s5 + $0x1] ss:$2 sm:$0x3] }
 0x100   : > { %1892 = vmatmul.mubr.msk.f32.vlgmr.msra.gmra.mxu1 %vm793_vm3, %v760_v44  ;;  %1914 = vmatmul.mubr.msk.f32.vlgmr.msra.gmra.mxu0 %vm793_vm3, %v2500_v47 }
 0x101   : > { %v602_v46 = vpop.permute.xlu0 %601  ;;  %1079 = vmatprep.mubr.f32.mxu1 %v2122_v0  ;;  %1253 = vmatprep.mubr.f32.mxu0 %v2122_v0 }
 0x102   : > { %v682_v48 = vpop.permute.xlu1 %681  ;;  %v740_v49 = vsel %vm472_vm1, %v520_v45, %v602_v46 }
 0x103   : > { %v761_v50 = vsel %vm759_vm2, %v740_v49, %v682_v48  ;;  %v1452_v49 = vld [vmem:[%s2933_s5] ss:$2 sm:$0x3] }
 0x104   : > { %1893 = vmatmul.mubr.msk.f32.gmra.mxu1 %vm793_vm3, %v761_v50  ;;  %1915 = vmatmul.mubr.msk.f32.gmra.mxu0 %vm793_vm3, %v2514_v57 }
 0x105   : > { %1085 = vmatprep.mubr.f32.mxu1 %v2122_v0  ;;  %1259 = vmatprep.mubr.f32.mxu0 %v2122_v0 }
 0x108   : > { %1894 = vmatmul.mubr.msk.f32.gmra.mxu1 %vm793_vm3, %v2439_v17  ;;  %1916 = vmatmul.mubr.msk.f32.gmra.mxu0 %vm793_vm3, %v2528_v4  ;;  %v636_v17 = vpop.permute.xlu0 %635 }
 0x109   : > { %1091 = vmatprep.mubr.f32.mxu1 %v2122_v0  ;;  %1265 = vmatprep.mubr.f32.mxu0 %v2122_v0 }
 0x10c   : > { %1895 = vmatmul.mubr.msk.f32.gmra.mxu1 %vm793_vm3, %v2486_v37  ;;  %1917 = vmatmul.mubr.msk.f32.gmra.mxu0 %vm793_vm3, %v2542_v14  ;;  %v537_v37 = vld [vmem:[#allocation2 + $0x127] sm:$0xff] }
 0x10d   : > { %1097 = vmatprep.mubr.f32.mxu1 %v2122_v0  ;;  %1271 = vmatprep.mubr.f32.mxu0 %v2122_v0 }
 0x110   : > { %1896 = vmatmul.mubr.msk.f32.gmra.mxu1 %vm793_vm3, %v2500_v47  ;;  %1918 = vmatmul.mubr.msk.f32.gmra.mxu0 %vm793_vm3, %v768_v26  ;;  %v638_v47 = vpop.permute.xlu0 %637 }
 0x111   : > { %1103 = vmatprep.mubr.f32.mxu1 %v2122_v0  ;;  %1277 = vmatprep.mubr.f32.mxu0 %v2122_v0  ;;  %v758_v53 = vsel %vm472_vm1, %v538_v51, %v638_v47 }
 0x114   : > { %1897 = vmatmul.mubr.msk.f32.gmra.mxu1 %vm793_vm3, %v2514_v57  ;;  %1919 = vmatmul.mubr.msk.f32.gmra.mxu0 %vm793_vm3, %v769_v38 }
 0x115   : > { %1109 = vmatprep.mubr.f32.mxu1 %v2122_v0  ;;  %1283 = vmatprep.mubr.f32.mxu0 %v2122_v0 }
 0x118   : > { %1898 = vmatmul.mubr.msk.f32.gmra.mxu1 %vm793_vm3, %v2528_v4  ;;  %1920 = vmatmul.mubr.msk.f32.gmra.mxu0 %vm793_vm3, %v2436_v16 }
 0x119   : > { %1115 = vmatprep.mubr.f32.mxu1 %v2122_v0  ;;  %1289 = vmatprep.mubr.f32.mxu0 %v2122_v0 }
 0x11c   : > { %1899 = vmatmul.mubr.msk.f32.gmra.mxu1 %vm793_vm3, %v2542_v14  ;;  %1921 = vmatmul.mubr.msk.f32.gmra.mxu0 %vm793_vm3, %v2473_v30 }
 0x11d   : > { %1121 = vmatprep.mubr.f32.mxu1 %v2122_v0  ;;  %1295 = vmatprep.mubr.f32.mxu0 %v2122_v0 }
 0x120   : > { %1900 = vmatmul.mubr.msk.f32.gmra.mxu1 %vm793_vm3, %v768_v26  ;;  %1922 = vmatmul.mubr.msk.f32.gmra.mxu0 %vm793_vm3, %v2493_v42 }
 0x121   : > { %1127 = vmatprep.mubr.f32.mxu1 %v2122_v0  ;;  %1301 = vmatprep.mubr.f32.mxu0 %v2122_v0 }
 0x124   : > { %1901 = vmatmul.mubr.msk.f32.gmra.mxu1 %vm793_vm3, %v769_v38  ;;  %1923 = vmatmul.mubr.msk.f32.gmra.mxu0 %vm793_vm3, %v2507_v52 }
 0x125   : > { %1133 = vmatprep.mubr.f32.mxu1 %v2122_v0  ;;  %1307 = vmatprep.mubr.f32.mxu0 %v2122_v0 }
 0x128   : > { %1902 = vmatmul.mubr.msk.f32.gmra.mxu1 %vm793_vm3, %v2436_v16  ;;  %1924 = vmatmul.mubr.msk.f32.gmra.mxu0 %vm793_vm3, %v2521_v62  ;;  %v716_v16 = vpop.permute.xlu1 %715 }
 0x129   : > { %1139 = vmatprep.mubr.f32.mxu1 %v2122_v0  ;;  %1313 = vmatprep.mubr.f32.mxu0 %v2122_v0 }
 0x12c   : > { %1903 = vmatmul.mubr.msk.f32.gmra.mxu1 %vm793_vm3, %v2473_v30  ;;  %1925 = vmatmul.mubr.msk.f32.gmra.mxu0 %vm793_vm3, %v2535_v9  ;;  %v757_v30 = vsel %vm472_vm1, %v537_v37, %v636_v17  ;;  %v718_v54 = vpop.permute.xlu1 %717 }
 0x12d   : > { %1145 = vmatprep.mubr.f32.mxu1 %v2122_v0  ;;  %1319 = vmatprep.mubr.f32.mxu0 %v2122_v0 }
 0x130   : > { %1904 = vmatmul.mubr.msk.f32.gmra.mxu1 %vm793_vm3, %v2493_v42  ;;  %1926 = vmatmul.mubr.msk.f32.gmra.mxu0 %vm793_vm3, %v2549_v21  ;;  %v778_v42 = vsel %vm759_vm2, %v757_v30, %v716_v16  ;;  %v1379_v21 = vshrl.u32 %v1378_v18, 7 }
 0x131   : > { %1151 = vmatprep.mubr.f32.mxu1 %v2122_v0  ;;  %1325 = vmatprep.mubr.f32.mxu0 %v2122_v0 }
 0x132   : > { %v1380_v25 = vsub.s32 0, %v1379_v21  ;;  %v1384_v29 = vsub.s32 1, %v1379_v21 }
 0x134   : > { %1905 = vmatmul.mubr.msk.f32.gmra.mxu1 %vm793_vm3, %v2507_v52  ;;  %1927 = vmatmul.mubr.msk.f32.gmra.mxu0 %vm793_vm3, %v2560_v32  ;;  %v779_v52 = vsel %vm759_vm2, %v758_v53, %v718_v54  ;;  %v2718_v34 = vrot.slane %v1376_v28, %v1380_v25  ;;  %v2720_v40 = vrot.slane %v1376_v28, %v1384_v29 }
 0x135   : > { %1157 = vmatprep.mubr.f32.mxu1 %v2122_v0  ;;  %1331 = vmatprep.mubr.f32.mxu0 %v2122_v0  ;;  %v2729_v37 = vrot.slane %v1930_v41, %v1380_v25  ;;  %v2732_v54 = vrot.slane %v1930_v41, %v1384_v29 }
 0x138   : > { %1906 = vmatmul.mubr.msk.f32.gmra.mxu1 %vm793_vm3, %v2521_v62  ;;  %1928 = vmatmul.mubr.msk.f32.gmra.mxu0 %vm793_vm3, %v778_v42 }
 0x139   : > { %1163 = vmatprep.mubr.f32.mxu1 %v2122_v0  ;;  %1337 = vmatprep.mubr.f32.mxu0 %v2122_v0 }
 0x13c   : > { %1907 = vmatmul.mubr.msk.f32.gmra.mxu1 %vm793_vm3, %v2535_v9  ;;  %1929 = vmatmul.mubr.msk.f32.gmra.mxu0 %vm793_vm3, %v779_v52  ;;  %v2734_v52 = vrot.slane %v1452_v49, %v1380_v25 }
 0x183   : > { %v2663_v55 = vpop.f32.mrf.mxu1 }
 0x184   : > { %v908_v56 = vpop.f32.mrf.mxu0 }
 0x185   : > { %v2665_v57 = vpop.f32.mrf.mxu1 }
 0x186   : > { %v910_v58 = vpop.f32.mrf.mxu0 }
 0x188   : > { %v2667_v59 = vpop.f32.mrf.mxu1 }
 0x18a   : > { %v2669_v61 = vpop.f32.mrf.mxu1 }
 0x18c   : > { %v914_v60 = vpop.f32.mrf.mxu0 }
 0x18e   : > { %v916_v62 = vpop.f32.mrf.mxu0 }
 0x190   : > { %v2671_v63 = vpop.f32.mrf.mxu1 }
 0x192   : > { %v2673_v1 = vpop.f32.mrf.mxu1 }
 0x194   : > { %v920_v0 = vpop.f32.mrf.mxu0 }
 0x196   : > { %v922_v2 = vpop.f32.mrf.mxu0 }
 0x198   : > { %v2675_v3 = vpop.f32.mrf.mxu1 }
 0x19a   : > { %v2679_v5 = vpop.f32.mrf.mxu1 }
 0x19c   : > { %v2677_v4 = vpop.f32.mrf.mxu0 }
 0x19e   : > { %v2681_v6 = vpop.f32.mrf.mxu0 }
 0x1a0   : > { %v2683_v7 = vpop.f32.mrf.mxu1 }
 0x1a2   : > { %v2687_v9 = vpop.f32.mrf.mxu1 }
 0x1a4   : > { %v2685_v8 = vpop.f32.mrf.mxu0 }
 0x1a6   : > { %v2689_v10 = vpop.f32.mrf.mxu0 }
 0x1a8   : > { %v2691_v11 = vpop.f32.mrf.mxu1 }
 0x1aa   : > { %v2695_v13 = vpop.f32.mrf.mxu1 }
 0x1ac   : > { %v2693_v12 = vpop.f32.mrf.mxu0 }
 0x1ae   : > { %v2697_v14 = vpop.f32.mrf.mxu0 }
 0x1b0   : > { %v2699_v15 = vpop.f32.mrf.mxu1 }
 0x1b2   : > { %v2703_v20 = vpop.f32.mrf.mxu1 }
 0x1b4   : > { %v2701_v19 = vpop.f32.mrf.mxu0 }
 0x1b6   : > { %v2705_v22 = vpop.f32.mrf.mxu0 }
 0x1b8   : > { %v2707_v23 = vpop.f32.mrf.mxu1 }
 0x1ba   : > { %v2711_v26 = vpop.f32.mrf.mxu1 }
 0x1bc   : > { %v2709_v24 = vpop.f32.mrf.mxu0 }
 0x1be   : > { %v2713_v27 = vpop.f32.mrf.mxu0 }
 0x1c0   : > { %v1075_v31 = vpop.f32.mrf.mxu1  ;;  %v1249_v32 = vpop.f32.mrf.mxu0 }
 0x1c1   : > { %v1076_v33 = vadd.f32 %v1075_v31, %v908_v56  ;;  %v2736_v56 = vrot.slane %v1452_v49, %v1384_v29 }
 0x1c2   : > { %v1077_v35 = vpop.f32.mrf.mxu1  ;;  %v1251_v36 = vpop.f32.mrf.mxu0 }
 0x1c3   : > { %v1344_v38 = vadd.f32 %v1249_v32, %v1076_v33  ;;  %v1078_v39 = vadd.f32 %v1077_v35, %v910_v58 }
 0x1c4   : > { %v1081_v43 = vpop.f32.mrf.mxu1  ;;  %v1255_v44 = vpop.f32.mrf.mxu0 }
 0x1c5   : > { %v1388_v45 = vadd.f32 %v2718_v34, %v1344_v38  ;;  %v1345_v46 = vadd.f32 %v1251_v36, %v1078_v39  ;;  %v1082_v48 = vadd.f32 %v1081_v43, %v914_v60 }
 0x1c6   : > { %v1083_v50 = vpop.f32.mrf.mxu1  ;;  %v1257_v17 = vpop.f32.mrf.mxu0 }
 0x1c7   : > { %v1420_v16 = vmax.f32 %v1388_v45, 0.0  ;;  %v1389_v30 = vadd.f32 %v2720_v40, %v1345_v46  ;;  %v1346_v47 = vadd.f32 %v1255_v44, %v1082_v48  ;;  %v1084_v51 = vadd.f32 %v1083_v50, %v916_v62 }
 0x1c8   : > { %v1087_v42 = vpop.f32.mrf.mxu1  ;;  %v1261_v53 = vpop.f32.mrf.mxu0 }
 0x1c9   : > { %v1421_v58 = vmax.f32 %v1389_v30, 0.0  ;;  %v1390_v60 = vadd.f32 %v2718_v34, %v1346_v47  ;;  %v1347_v18 = vadd.f32 %v1257_v17, %v1084_v51  ;;  %v1088_v21 = vadd.f32 %v1087_v42, %v920_v0 }
 0x1ca   : > { %v1089_v28 = vpop.f32.mrf.mxu1  ;;  %v1263_v31 = vpop.f32.mrf.mxu0  ;;  %v1557_v62 = vmul.f32 %v2729_v37, %v1420_v16  ;;  %v1464_v29 = vmul.f32 %v2734_v52, %v1420_v16 }
 0x1cb   : > { %v1391_v32 = vadd.f32 %v2720_v40, %v1347_v18  ;;  %v1348_v33 = vadd.f32 %v1261_v53, %v1088_v21  ;;  %v1090_v35 = vadd.f32 %v1089_v28, %v922_v2  ;;  %v1422_v36 = vmax.f32 %v1390_v60, 0.0 }
 0x1cc   : > { %v1093_v38 = vpop.f32.mrf.mxu1  ;;  %v1267_v39 = vpop.f32.mrf.mxu0  ;;  %v1558_v25 = vmul.f32 %v2732_v54, %v1421_v58  ;;  %v1465_v41 = vmul.f32 %v2736_v56, %v1421_v58 }
 0x1cd   : > { %v1423_v43 = vmax.f32 %v1391_v32, 0.0  ;;  %v1392_v0 = vadd.f32 %v2718_v34, %v1348_v33  ;;  %v1349_v44 = vadd.f32 %v1263_v31, %v1090_v35  ;;  %v1094_v45 = vadd.f32 %v1093_v38, %v2677_v4 }
 0x1ce   : > { %v1095_v46 = vpop.f32.mrf.mxu1  ;;  %v1269_v48 = vpop.f32.mrf.mxu0  ;;  %v1589_v2 = vadd.f32 %v1558_v25, %v1557_v62  ;;  %v1496_v49 = vadd.f32 %v1465_v41, %v1464_v29  ;;  %v1466_v42 = vmul.f32 %v2734_v52, %v1422_v36 }
 0x1cf   : > { %v1393_v50 = vadd.f32 %v2720_v40, %v1349_v44  ;;  %v1350_v17 = vadd.f32 %v1267_v39, %v1094_v45  ;;  %v1096_v30 = vadd.f32 %v1095_v46, %v2681_v6  ;;  %v1424_v47 = vmax.f32 %v1392_v0, 0.0 }
 0x1d0   : > { %1590 = vadd.xlane.f32.xlu1 %v1589_v2  ;;  %1497 = vadd.xlane.f32.xlu0 %v1496_v49  ;;  %v1099_v16 = vpop.f32.mrf.mxu1  ;;  %v1273_v51 = vpop.f32.mrf.mxu0  ;;  %v1467_v53 = vmul.f32 %v2736_v56, %v1423_v43  ;;  %v1560_v6 = vmul.f32 %v2732_v54, %v1423_v43 }
 0x1d1   : > { %v1425_v58 = vmax.f32 %v1393_v50, 0.0  ;;  %v1394_v4 = vadd.f32 %v2718_v34, %v1350_v17  ;;  %v1351_v60 = vadd.f32 %v1269_v48, %v1096_v30  ;;  %v1100_v18 = vadd.f32 %v1099_v16, %v2685_v8 }
 0x1d2   : > { %v1101_v21 = vpop.f32.mrf.mxu1  ;;  %v1275_v28 = vpop.f32.mrf.mxu0  ;;  %v1499_v31 = vadd.f32 %v1467_v53, %v1466_v42  ;;  %v1468_v25 = vmul.f32 %v2734_v52, %v1424_v47  ;;  %v1559_v8 = vmul.f32 %v2729_v37, %v1422_v36  ;;  %v1561_v42 = vmul.f32 %v2729_v37, %v1424_v47 }
 0x1d3   : > { %v1395_v32 = vadd.f32 %v2720_v40, %v1351_v60  ;;  %v1352_v33 = vadd.f32 %v1273_v51, %v1100_v18  ;;  %v1102_v35 = vadd.f32 %v1101_v21, %v2689_v10  ;;  %v1426_v62 = vmax.f32 %v1394_v4, 0.0 }
 0x1d4   : > { %1500 = vadd.xlane.f32.xlu0 %v1499_v31  ;;  %v1105_v38 = vpop.f32.mrf.mxu1  ;;  %v1279_v39 = vpop.f32.mrf.mxu0  ;;  %v1469_v29 = vmul.f32 %v2736_v56, %v1425_v58  ;;  %v1592_v10 = vadd.f32 %v1560_v6, %v1559_v8  ;;  %v1562_v2 = vmul.f32 %v2732_v54, %v1425_v58 }
 0x1d5   : > { %v1427_v41 = vmax.f32 %v1395_v32, 0.0  ;;  %v1396_v0 = vadd.f32 %v2718_v34, %v1352_v33  ;;  %v1353_v44 = vadd.f32 %v1275_v28, %v1102_v35  ;;  %v1106_v43 = vadd.f32 %v1105_v38, %v2693_v12 }
 0x1d6   : > { %v1107_v45 = vpop.f32.mrf.mxu1  ;;  %v1281_v46 = vpop.f32.mrf.mxu0  ;;  %v1502_v48 = vadd.f32 %v1469_v29, %v1468_v25  ;;  %v1470_v51 = vmul.f32 %v2734_v52, %v1426_v62  ;;  %v1595_v28 = vadd.f32 %v1562_v2, %v1561_v42  ;;  %v1563_v25 = vmul.f32 %v2729_v37, %v1426_v62 }
 0x1d7   : > { %v1397_v49 = vadd.f32 %v2720_v40, %v1353_v44  ;;  %v1354_v50 = vadd.f32 %v1279_v39, %v1106_v43  ;;  %v1108_v17 = vadd.f32 %v1107_v45, %v2697_v14  ;;  %v1428_v30 = vmax.f32 %v1396_v0, 0.0 }
 0x1d8   : > { %1503 = vadd.xlane.f32.xlu1 %v1502_v48  ;;  %1593 = vadd.xlane.f32.xlu0 %v1592_v10  ;;  %v1111_v36 = vpop.f32.mrf.mxu1  ;;  %v1285_v16 = vpop.f32.mrf.mxu0  ;;  %v1471_v12 = vmul.f32 %v2736_v56, %v1427_v41  ;;  %v1564_v31 = vmul.f32 %v2732_v54, %v1427_v41 }
 0x1d9   : > { %v1429_v53 = vmax.f32 %v1397_v49, 0.0  ;;  %v1398_v4 = vadd.f32 %v2718_v34, %v1354_v50  ;;  %v1355_v58 = vadd.f32 %v1281_v46, %v1108_v17  ;;  %v1112_v60 = vadd.f32 %v1111_v36, %v2701_v19 }
 0x1da   : > { %v1113_v18 = vpop.f32.mrf.mxu1  ;;  %v1287_v21 = vpop.f32.mrf.mxu0  ;;  %v1505_v14 = vadd.f32 %v1471_v12, %v1470_v51  ;;  %v1472_v39 = vmul.f32 %v2734_v52, %v1428_v30  ;;  %v1598_v45 = vadd.f32 %v1564_v31, %v1563_v25  ;;  %v1565_v49 = vmul.f32 %v2729_v37, %v1428_v30 }
 0x1db   : > { %v1399_v6 = vadd.f32 %v2720_v40, %v1355_v58  ;;  %v1356_v32 = vadd.f32 %v1285_v16, %v1112_v60  ;;  %v1114_v33 = vadd.f32 %v1113_v18, %v2705_v22  ;;  %v1430_v35 = vmax.f32 %v1398_v4, 0.0 }
 0x1dc   : > { %1506 = vadd.xlane.f32.xlu1 %v1505_v14  ;;  %1596 = vadd.xlane.f32.xlu0 %v1595_v28  ;;  %v1117_v47 = vpop.f32.mrf.mxu1  ;;  %v1291_v38 = vpop.f32.mrf.mxu0  ;;  %v1473_v19 = vmul.f32 %v2736_v56, %v1429_v53  ;;  %v1566_v46 = vmul.f32 %v2732_v54, %v1429_v53  ;;  %v2127_v53 = vmov 0  }
 0x1dd   : > { %v1431_v29 = vmax.f32 %v1399_v6, 0.0  ;;  %v1400_v8 = vadd.f32 %v2718_v34, %v1356_v32  ;;  %v1357_v41 = vadd.f32 %v1287_v21, %v1114_v33  ;;  %v1118_v0 = vadd.f32 %v1117_v47, %v2709_v24  ;;  %2027 = vset.pattern.permute.xlu0 %v2127_v53 }
 0x1de   : > { %v1119_v44 = vpop.f32.mrf.mxu1  ;;  %v1293_v43 = vpop.f32.mrf.mxu0  ;;  %v1508_v22 = vadd.f32 %v1473_v19, %v1472_v39  ;;  %v1474_v24 = vmul.f32 %v2734_v52, %v1430_v35  ;;  %v1601_v58 = vadd.f32 %v1566_v46, %v1565_v49  ;;  %v1567_v33 = vmul.f32 %v2729_v37, %v1430_v35 }
 0x1df   : > { %v1401_v48 = vadd.f32 %v2720_v40, %v1357_v41  ;;  %v1358_v10 = vadd.f32 %v1291_v38, %v1118_v0  ;;  %v1120_v2 = vadd.f32 %v1119_v44, %v2713_v27  ;;  %v1432_v62 = vmax.f32 %v1400_v8, 0.0 }
 0x1e0   : > { %1509 = vadd.xlane.f32.xlu1 %v1508_v22  ;;  %1599 = vadd.xlane.f32.xlu0 %v1598_v45  ;;  %v1123_v50 = vpop.f32.mrf.mxu1  ;;  %v1297_v17 = vpop.f32.mrf.mxu0  ;;  %v1475_v36 = vmul.f32 %v2736_v56, %v1431_v29  ;;  %v1568_v60 = vmul.f32 %v2732_v54, %v1431_v29 }
 0x1e1   : > { %v1433_v16 = vmax.f32 %v1401_v48, 0.0  ;;  %v1402_v51 = vadd.f32 %v2718_v34, %v1358_v10  ;;  %v1359_v12 = vadd.f32 %v1293_v43, %v1120_v2  ;;  %v1124_v42 = vadd.f32 %v1123_v50, %v2663_v55 }
 0x1e2   : > { %v1125_v27 = vpop.f32.mrf.mxu1  ;;  %v1299_v4 = vpop.f32.mrf.mxu0  ;;  %v1511_v30 = vadd.f32 %v1475_v36, %v1474_v24  ;;  %v1476_v55 = vmul.f32 %v2734_v52, %v1432_v62  ;;  %v1604_v8 = vadd.f32 %v1568_v60, %v1567_v33  ;;  %v1569_v48 = vmul.f32 %v2729_v37, %v1432_v62 }
 0x1e3   : > { %v1403_v18 = vadd.f32 %v2720_v40, %v1359_v12  ;;  %v1360_v21 = vadd.f32 %v1297_v17, %v1124_v42  ;;  %v1126_v14 = vadd.f32 %v1125_v27, %v2665_v57  ;;  %v1434_v28 = vmax.f32 %v1402_v51, 0.0 }
 0x1e4   : > { %1512 = vadd.xlane.f32.xlu1 %v1511_v30  ;;  %1602 = vadd.xlane.f32.xlu0 %v1601_v58  ;;  %v1129_v31 = vpop.f32.mrf.mxu1  ;;  %v1303_v6 = vpop.f32.mrf.mxu0  ;;  %v1477_v32 = vmul.f32 %v2736_v56, %v1433_v16  ;;  %v1570_v41 = vmul.f32 %v2732_v54, %v1433_v16 }
 0x1e5   : > { %v1435_v47 = vmax.f32 %v1403_v18, 0.0  ;;  %v1404_v38 = vadd.f32 %v2718_v34, %v1360_v21  ;;  %v1361_v39 = vadd.f32 %v1299_v4, %v1126_v14  ;;  %v1130_v19 = vadd.f32 %v1129_v31, %v2667_v59 }
 0x1e6   : > { %v1131_v25 = vpop.f32.mrf.mxu1  ;;  %v1305_v29 = vpop.f32.mrf.mxu0  ;;  %v1514_v57 = vadd.f32 %v1477_v32, %v1476_v55  ;;  %v1478_v46 = vmul.f32 %v2734_v52, %v1434_v28  ;;  %v1607_v36 = vadd.f32 %v1570_v41, %v1569_v48  ;;  %v1571_v30 = vmul.f32 %v2729_v37, %v1434_v28 }
 0x1e7   : > { %v1405_v0 = vadd.f32 %v2720_v40, %v1361_v39  ;;  %v1362_v44 = vadd.f32 %v1303_v6, %v1130_v19  ;;  %v1132_v43 = vadd.f32 %v1131_v25, %v2669_v61  ;;  %v1436_v22 = vmax.f32 %v1404_v38, 0.0 }
 0x1e8   : > { %1515 = vadd.xlane.f32.xlu1 %v1514_v57  ;;  %1605 = vadd.xlane.f32.xlu0 %v1604_v8  ;;  %v1135_v35 = vpop.f32.mrf.mxu1  ;;  %v1309_v45 = vpop.f32.mrf.mxu0  ;;  %v1479_v59 = vmul.f32 %v2736_v56, %v1435_v47  ;;  %v1572_v16 = vmul.f32 %v2732_v54, %v1435_v47 }
 0x1e9   : > { %v1437_v10 = vmax.f32 %v1405_v0, 0.0  ;;  %v1406_v2 = vadd.f32 %v2718_v34, %v1362_v44  ;;  %v1363_v49 = vadd.f32 %v1305_v29, %v1132_v43  ;;  %v1136_v50 = vadd.f32 %v1135_v35, %v2671_v63 }
 0x1ea   : > { %v1137_v17 = vpop.f32.mrf.mxu1  ;;  %v1311_v24 = vpop.f32.mrf.mxu0  ;;  %v1517_v61 = vadd.f32 %v1479_v59, %v1478_v46  ;;  %v1480_v4 = vmul.f32 %v2734_v52, %v1436_v22  ;;  %v1610_v6 = vadd.f32 %v1572_v16, %v1571_v30  ;;  %v1573_v25 = vmul.f32 %v2729_v37, %v1436_v22 }
 0x1eb   : > { %v1407_v51 = vadd.f32 %v2720_v40, %v1363_v49  ;;  %v1364_v12 = vadd.f32 %v1309_v45, %v1136_v50  ;;  %v1138_v42 = vadd.f32 %v1137_v17, %v2673_v1  ;;  %v1438_v53 = vmax.f32 %v1406_v2, 0.0 }
 0x1ec   : > { %1518 = vadd.xlane.f32.xlu1 %v1517_v61  ;;  %1608 = vadd.xlane.f32.xlu0 %v1607_v36  ;;  %v1141_v62 = vpop.f32.mrf.mxu1  ;;  %v1315_v27 = vpop.f32.mrf.mxu0  ;;  %v1481_v63 = vmul.f32 %v2736_v56, %v1437_v10  ;;  %v1574_v55 = vmul.f32 %v2732_v54, %v1437_v10 }
 0x1ed   : > { %v1439_v58 = vmax.f32 %v1407_v51, 0.0  ;;  %v1408_v60 = vadd.f32 %v2718_v34, %v1364_v12  ;;  %v1365_v18 = vadd.f32 %v1311_v24, %v1138_v42  ;;  %v1142_v21 = vadd.f32 %v1141_v62, %v2675_v3 }
 0x1ee   : > { %v1143_v14 = vpop.f32.mrf.mxu1  ;;  %v1317_v31 = vpop.f32.mrf.mxu0  ;;  %v1520_v1 = vadd.f32 %v1481_v63, %v1480_v4  ;;  %v1482_v19 = vmul.f32 %v2734_v52, %v1438_v53  ;;  %v1613_v43 = vadd.f32 %v1574_v55, %v1573_v25  ;;  %v1575_v49 = vmul.f32 %v2729_v37, %v1438_v53 }
 0x1ef   : > { %v1409_v32 = vadd.f32 %v2720_v40, %v1365_v18  ;;  %v1366_v33 = vadd.f32 %v1315_v27, %v1142_v21  ;;  %v1144_v47 = vadd.f32 %v1143_v14, %v2679_v5  ;;  %v1440_v38 = vmax.f32 %v1408_v60, 0.0 }
 0x1f0   : > { %1521 = vadd.xlane.f32.xlu1 %v1520_v1  ;;  %1611 = vadd.xlane.f32.xlu0 %v1610_v6  ;;  %v1147_v28 = vpop.f32.mrf.mxu1  ;;  %v1321_v39 = vpop.f32.mrf.mxu0  ;;  %v1483_v3 = vmul.f32 %v2736_v56, %v1439_v58  ;;  %v1576_v35 = vmul.f32 %v2732_v54, %v1439_v58 }
 0x1f1   : > { %v1441_v29 = vmax.f32 %v1409_v32, 0.0  ;;  %v1410_v57 = vadd.f32 %v2718_v34, %v1366_v33  ;;  %v1367_v8 = vadd.f32 %v1317_v31, %v1144_v47  ;;  %v1148_v41 = vadd.f32 %v1147_v28, %v2683_v7 }
 0x1f2   : > { %v1149_v0 = vpop.f32.mrf.mxu1  ;;  %v1323_v44 = vpop.f32.mrf.mxu0  ;;  %v1523_v5 = vadd.f32 %v1483_v3, %v1482_v19  ;;  %v1484_v2 = vmul.f32 %v2734_v52, %v1440_v38  ;;  %v1616_v51 = vadd.f32 %v1576_v35, %v1575_v49  ;;  %v1577_v58 = vmul.f32 %v2729_v37, %v1440_v38 }
 0x1f3   : > { %v1411_v45 = vadd.f32 %v2720_v40, %v1367_v8  ;;  %v1368_v46 = vadd.f32 %v1321_v39, %v1148_v41  ;;  %v1150_v59 = vadd.f32 %v1149_v0, %v2687_v9  ;;  %v1442_v48 = vmax.f32 %v1410_v57, 0.0 }
 0x1f4   : > { %1524 = vadd.xlane.f32.xlu1 %v1523_v5  ;;  %1614 = vadd.xlane.f32.xlu0 %v1613_v43  ;;  %v1153_v22 = vpop.f32.mrf.mxu1  ;;  %v1327_v10 = vpop.f32.mrf.mxu0  ;;  %v1485_v7 = vmul.f32 %v2736_v56, %v1441_v29  ;;  %v1578_v12 = vmul.f32 %v2732_v54, %v1441_v29 }
 0x1f5   : > { %v1443_v50 = vmax.f32 %v1411_v45, 0.0  ;;  %v1412_v17 = vadd.f32 %v2718_v34, %v1368_v46  ;;  %v1369_v24 = vadd.f32 %v1323_v44, %v1150_v59  ;;  %v1154_v61 = vadd.f32 %v1153_v22, %v2691_v11 }
 0x1f6   : > { %v1155_v36 = vpop.f32.mrf.mxu1  ;;  %v1329_v16 = vpop.f32.mrf.mxu0  ;;  %v1526_v9 = vadd.f32 %v1485_v7, %v1484_v2  ;;  %v1486_v30 = vmul.f32 %v2734_v52, %v1442_v48  ;;  %v1579_v3 = vmul.f32 %v2729_v37, %v1442_v48 }
 0x1f7   : > { %v1413_v42 = vadd.f32 %v2720_v40, %v1369_v24  ;;  %v1370_v62 = vadd.f32 %v1327_v10, %v1154_v61  ;;  %v1156_v27 = vadd.f32 %v1155_v36, %v2695_v13  ;;  %v1444_v4 = vmax.f32 %v1412_v17, 0.0 }
 0x1f8   : > { %1527 = vadd.xlane.f32.xlu1 %v1526_v9  ;;  %1617 = vadd.xlane.f32.xlu0 %v1616_v51  ;;  %v1159_v53 = vpop.f32.mrf.mxu1  ;;  %v1333_v63 = vpop.f32.mrf.mxu0  ;;  %v1487_v11 = vmul.f32 %v2736_v56, %v1443_v50  ;;  %v1619_v13 = vadd.f32 %v1578_v12, %v1577_v58  ;;  %v1580_v55 = vmul.f32 %v2732_v54, %v1443_v50 }
 0x1f9   : > { %v1445_v60 = vmax.f32 %v1413_v42, 0.0  ;;  %v1414_v18 = vadd.f32 %v2718_v34, %v1370_v62  ;;  %v1371_v21 = vadd.f32 %v1329_v16, %v1156_v27  ;;  %v1160_v14 = vadd.f32 %v1159_v53, %v2699_v15 }
 0x1fa   : > { %v1161_v31 = vpop.f32.mrf.mxu1  ;;  %v1529_v1 = vadd.f32 %v1487_v11, %v1486_v30  ;;  %v1335_v6 = vpop.f32.mrf.mxu0  ;;  %v1488_v19 = vmul.f32 %v2734_v52, %v1444_v4  ;;  %v1622_v0 = vadd.f32 %v1580_v55, %v1579_v3 }
 0x1fb   : > { %v1415_v32 = vadd.f32 %v2720_v40, %v1371_v21  ;;  %v1162_v33 = vadd.f32 %v1161_v31, %v2703_v20  ;;  %v1372_v47 = vadd.f32 %v1333_v63, %v1160_v14  ;;  %v1446_v28 = vmax.f32 %v1414_v18, 0.0 }
 0x1fc   : > { %1530 = vadd.xlane.f32.xlu1 %v1529_v1  ;;  %1620 = vadd.xlane.f32.xlu0 %v1619_v13  ;;  %v1165_v38 = vpop.f32.mrf.mxu1  ;;  %v1339_v39 = vpop.f32.mrf.mxu0  ;;  %v1489_v15 = vmul.f32 %v2736_v56, %v1445_v60  ;;  %v1582_v5 = vmul.f32 %v2732_v54, %v1445_v60 }
 0x1fd   : > { %v1447_v25 = vmax.f32 %v1415_v32, 0.0  ;;  %v1416_v29 = vadd.f32 %v2718_v34, %v1372_v47  ;;  %v1166_v57 = vadd.f32 %v1165_v38, %v2707_v23  ;;  %v1373_v8 = vadd.f32 %v1335_v6, %v1162_v33 }
 0x1fe   : > { %v1167_v41 = vpop.f32.mrf.mxu1  ;;  %v1532_v20 = vadd.f32 %v1489_v15, %v1488_v19  ;;  %v1341_v44 = vpop.f32.mrf.mxu0  ;;  %v1490_v59 = vmul.f32 %v2734_v52, %v1446_v28  ;;  %v1581_v23 = vmul.f32 %v2729_v37, %v1444_v4  ;;  %v1583_v36 = vmul.f32 %v2729_v37, %v1446_v28 }
 0x1ff   : > { %v1448_v43 = vmax.f32 %v1416_v29, 0.0  ;;  %v1417_v35 = vadd.f32 %v2720_v40, %v1373_v8  ;;  %v1168_v45 = vadd.f32 %v1167_v41, %v2711_v26  ;;  %v1374_v46 = vadd.f32 %v1339_v39, %v1166_v57 }
 0x200   : > { %1533 = vadd.xlane.f32.xlu1 %v1532_v20  ;;  %1623 = vadd.xlane.f32.xlu0 %v1622_v0  ;;  %v1491_v48 = vmul.f32 %v2736_v56, %v1447_v25  ;;  %v1625_v49 = vadd.f32 %v1582_v5, %v1581_v23  ;;  %v1584_v50 = vmul.f32 %v2732_v54, %v1447_v25 }
 0x201   : > { %v1449_v22 = vmax.f32 %v1417_v35, 0.0  ;;  %v1418_v10 = vadd.f32 %v2718_v34, %v1374_v46  ;;  %v1375_v2 = vadd.f32 %v1341_v44, %v1168_v45  ;;  %v1492_v24 = vmul.f32 %v2734_v52, %v1448_v43 }
 0x202   : > { %v1535_v7 = vadd.f32 %v1491_v48, %v1490_v59  ;;  %v1628_v51 = vadd.f32 %v1584_v50, %v1583_v36  ;;  %v1585_v27 = vmul.f32 %v2729_v37, %v1448_v43 }
 0x203   : > { %v1450_v17 = vmax.f32 %v1418_v10, 0.0  ;;  %v1419_v26 = vadd.f32 %v2720_v40, %v1375_v2  ;;  %v1493_v61 = vmul.f32 %v2736_v56, %v1449_v22  ;;  %v1586_v34 = vmul.f32 %v2732_v54, %v1449_v22 }
 0x204   : > { %1536 = vadd.xlane.f32.xlu1 %v1535_v7  ;;  %1626 = vadd.xlane.f32.xlu0 %v1625_v49 }
 0x205   : > { %v1451_v16 = vmax.f32 %v1419_v26, 0.0  ;;  %v1538_v9 = vadd.f32 %v1493_v61, %v1492_v24  ;;  %v1494_v12 = vmul.f32 %v2734_v52, %v1450_v17  ;;  %v1587_v62 = vmul.f32 %v2729_v37, %v1450_v17  ;;  %v1686_v52 = vld [vmem:[%s2934_s6] sm:$0x3] }
 0x206   : > { %v1631_v63 = vadd.f32 %v1586_v34, %v1585_v27 }
 0x207   : > { %v1495_v42 = vmul.f32 %v2736_v56, %v1451_v16  ;;  %v1588_v40 = vmul.f32 %v2732_v54, %v1451_v16 }
 0x208   : > { %1539 = vadd.xlane.f32.xlu1 %v1538_v9  ;;  %1629 = vadd.xlane.f32.xlu0 %v1628_v51 }
 0x209   : > { %v1541_v4 = vadd.f32 %v1495_v42, %v1494_v12  ;;  %v1634_v53 = vadd.f32 %v1588_v40, %v1587_v62 }
 0x20c   : > { %1542 = vadd.xlane.f32.xlu1 %v1541_v4  ;;  %1632 = vadd.xlane.f32.xlu0 %v1631_v63 }
 0x210   : > { %1635 = vadd.xlane.f32.xlu0 %v1634_v53 }
 0x226   : > { %1689 = vperm.xlu0 %2027, %v1686_v52  }
 0x259   : > { %v1591_v56 = vpop.xlane.xlu1 %1590  ;;  %v1498_v30 = vpop.xlane.xlu0 %1497 }
 0x25a   : > { %v1638_v54 = vsel %vm1637_vm4, %v1498_v30, %v1591_v56 }
 0x25b   : > { %1654 = vxpose.xlu1.b32.start [1/16] (narrow) %v1638_v54, 8 }
 0x25d   : > { %v1501_v11 = vpop.xlane.xlu0 %1500 }
 0x261   : > { %v1504_v58 = vpop.xlane.xlu1 %1503  ;;  %v1594_v37 = vpop.xlane.xlu0 %1593 }
 0x262   : > { %v1639_v60 = vsel %vm1637_vm4, %v1501_v11, %v1594_v37 }
 0x263   : > { %1655 = vxpose.xlu1.b32.cont [2/16] (narrow) %v1639_v60, 8 }
 0x265   : > { %v1507_v18 = vpop.xlane.xlu1 %1506  ;;  %v1597_v21 = vpop.xlane.xlu0 %1596 }
 0x266   : > { %v1640_v14 = vsel %vm1637_vm4, %v1504_v58, %v1597_v21 }
 0x267   : > { %1656 = vxpose.xlu1.b32.cont [3/16] (narrow) %v1640_v14, 8 }
 0x269   : > { %v1510_v31 = vpop.xlane.xlu1 %1509  ;;  %v1600_v1 = vpop.xlane.xlu0 %1599 }
 0x26a   : > { %v1641_v13 = vsel %vm1637_vm4, %v1507_v18, %v1600_v1 }
 0x26b   : > { %1657 = vxpose.xlu1.b32.cont [4/16] (narrow) %v1641_v13, 8 }
 0x26d   : > { %v1513_v6 = vpop.xlane.xlu1 %1512  ;;  %v1603_v55 = vpop.xlane.xlu0 %1602 }
 0x26e   : > { %v1642_v32 = vsel %vm1637_vm4, %v1510_v31, %v1603_v55 }
 0x26f   : > { %1658 = vxpose.xlu1.b32.cont [5/16] (narrow) %v1642_v32, 8 }
 0x271   : > { %v1516_v33 = vpop.xlane.xlu1 %1515  ;;  %v1606_v47 = vpop.xlane.xlu0 %1605 }
 0x272   : > { %v1643_v28 = vsel %vm1637_vm4, %v1513_v6, %v1606_v47 }
 0x273   : > { %1659 = vxpose.xlu1.b32.cont [6/16] (narrow) %v1643_v28, 8 }
 0x275   : > { %v1519_v38 = vpop.xlane.xlu1 %1518  ;;  %v1609_v39 = vpop.xlane.xlu0 %1608 }
 0x276   : > { %v1644_v19 = vsel %vm1637_vm4, %v1516_v33, %v1609_v39 }
 0x277   : > { %1660 = vxpose.xlu1.b32.cont [7/16] (narrow) %v1644_v19, 8 }
 0x279   : > { %v1522_v15 = vpop.xlane.xlu1 %1521  ;;  %v1612_v3 = vpop.xlane.xlu0 %1611 }
 0x27a   : > { %v1645_v25 = vsel %vm1637_vm4, %v1519_v38, %v1612_v3 }
 0x27b   : > { %1661 = vxpose.xlu1.b32.cont [8/16] (narrow) %v1645_v25, 8 }
 0x27d   : > { %v1525_v29 = vpop.xlane.xlu1 %1524  ;;  %v1615_v57 = vpop.xlane.xlu0 %1614 }
 0x27e   : > { %v1646_v8 = vsel %vm1637_vm4, %v1522_v15, %v1615_v57 }
 0x27f   : > { %1662 = vxpose.xlu1.b32.cont [9/16] (narrow) %v1646_v8, 8 }
 0x281   : > { %v1528_v41 = vpop.xlane.xlu1 %1527  ;;  %v1618_v20 = vpop.xlane.xlu0 %1617 }
 0x282   : > { %v1647_v0 = vsel %vm1637_vm4, %v1525_v29, %v1618_v20 }
 0x283   : > { %1663 = vxpose.xlu1.b32.cont [10/16] (narrow) %v1647_v0, 8 }
 0x285   : > { %v1531_v44 = vpop.xlane.xlu1 %1530  ;;  %v1621_v5 = vpop.xlane.xlu0 %1620 }
 0x286   : > { %v1648_v43 = vsel %vm1637_vm4, %v1528_v41, %v1621_v5 }
 0x287   : > { %1664 = vxpose.xlu1.b32.cont [11/16] (narrow) %v1648_v43, 8 }
 0x289   : > { %v1534_v35 = vpop.xlane.xlu1 %1533  ;;  %v1624_v45 = vpop.xlane.xlu0 %1623 }
 0x28a   : > { %v1649_v46 = vsel %vm1637_vm4, %v1531_v44, %v1624_v45 }
 0x28b   : > { %1665 = vxpose.xlu1.b32.cont [12/16] (narrow) %v1649_v46, 8 }
 0x28d   : > { %v1537_v59 = vpop.xlane.xlu1 %1536  ;;  %v1627_v48 = vpop.xlane.xlu0 %1626 }
 0x28e   : > { %v1650_v23 = vsel %vm1637_vm4, %v1534_v35, %v1627_v48 }
 0x28f   : > { %1666 = vxpose.xlu1.b32.cont [13/16] (narrow) %v1650_v23, 8 }
 0x291   : > { %v1630_v22 = vpop.xlane.xlu0 %1629  ;;  %v1540_v2 = vpop.xlane.xlu1 %1539 }
 0x292   : > { %v1651_v10 = vsel %vm1637_vm4, %v1537_v59, %v1630_v22 }
 0x293   : > { %1667 = vxpose.xlu1.b32.cont [14/16] (narrow) %v1651_v10, 8 }
 0x295   : > { %v1633_v7 = vpop.xlane.xlu0 %1632  ;;  %v1543_v50 = vpop.xlane.xlu1 %1542 }
 0x296   : > { %v1652_v49 = vsel %vm1637_vm4, %v1540_v2, %v1633_v7 }
 0x297   : > { %1668 = vxpose.xlu1.b32.cont [15/16] (narrow) %v1652_v49, 8 }
 0x299   : > { %v1636_v17 = vpop.xlane.xlu0 %1635 }
 0x29a   : > { %v1653_v26 = vsel %vm1637_vm4, %v1543_v50, %v1636_v17 }
 0x29b   : > { %1669 = vxpose.xlu1.b32.end [16/16] (narrow) %v1653_v26, 8 }
 0x2a1   : > { %v1690_v24 = vpop.permute.xlu0 %1689 }
 0x2db   : > { %v1670_v61 = vpop.trf.xlu1 }
 0x2dc   : > { %v1692_v36 = vadd.f32 %v1690_v24, %v1670_v61 }
 0x2de   : > { %1693 = vst [vmem:[%s388_s11] sm:$0x3] %v1692_v36 }
 0x2df   : > { %2041 = shalt.err (!%p2038_p1)
}
 0x2e0   : > { %s2042_s0 = scalar_lea.hbm %s1708_s30, 32  ;;  %s2046_s29 = scalar_lea.hbm %s2935_s7, 128 }
 0x2e1   : > { %p2043_p2 = scmp.ne.s32.totalorder %s1708_s30, %s2042_s0  ;;  %p2047_p6 = scmp.lt.s32.totalorder %s1708_s30, %s2935_s7 }
 0x2e2   : > { %p2048_p7 = scmp.lt.s32.totalorder %s2046_s29, %s2042_s0 }
 0x2e3   : > { %p2044_p4 = pnand %p2043_p2, %p2220_p3 }
 0x2e4   : > { %p2049_p9 = por %p2048_p7, %p2047_p6 }
 0x2e5   : > { %p2045_p5 = pneg %p2044_p4 }
 0x2e7   : > { %p2050_p10 = pnand %p2049_p9, %p2045_p5 }
 0x2e9   : > { %2053 = shalt.err (!%p2050_p10)
}
 0x2ea   : > { %1950 = dma.vmem_to_hbm [thread:$0]  (%p2220_p3), %s1711_s23, 32, %s1708_s30, %s1695_s12  }
 0x2eb PF: > { %p1956_p11 = scmp.ge.s32.totalorder %s2120_s8, 2  ;;  %s1722_s18 = sand.u32 1, %s2092_s24  }
 0x2ec   : > { %s1723_s9 = scalar_lea.sflag [#allocation4], %s1722_s18 }
 0x2ed   : > { %p1953_p12 = pnand %p1956_p11, %p2229_p8 }
 0x2ef   : > { %p1954_p13 = pneg %p1953_p12 }
 0x2f1   : > { %2087 = dma.done.wait (%p1954_p13), %s1723_s9, 32  }
 0x2f2   : > { %2089 = vsyncadd (%p1954_p13), %s1723_s9, 4294967264  ;;  %s20_s8 = sadd.s32 1, %s2120_s8   ;;  %s2951_s27 = sld [smem:[#allocation6_spill]] }
 0x2f3   : > { %p17_p0 = scmp.ge.s32.totalorder %s20_s8, 6   ;;  %s2952_s28 = sld [smem:[#allocation7_spill]] }
 0x2f4   : > { %s2953_s29 = sld [smem:[#allocation8_spill]]  ;;  %s2955_s24 = smov %s2096_s25 }
 0x2f5   : > { %s2954_s30 = sld [smem:[#allocation9_spill]]  ;;  %s2956_s25 = smov %s2100_s26 }
 0x2f6   : > { %s2957_s26 = smov %s2238_s19  ;;  %19 = sbr.rel (!%p17_p0) target bundleno = 7 (0x7), region = 111 }
 0x2fb   :  { %1728 = vsyncpa [#allocation4], 1 }
 0x2fc   :  { %1730 = vsyncpa [#allocation4 + $0x1], 1 }

// kernel: tpu_custom_call.1
= control target key start
LH: loop header
LB: loop body
LE: loop exit
PB: predicated region body
PF: predicated region fallthrough
CT: control target
= control target key end

     0   :  { %s2928_s0 = inlined_call_operand.vmem [shape: f32[2,16,16,8], index: 0, kind: input, shape index: {}]   ;;  %s2929_s1 = inlined_call_operand.vmem [shape: f32[2,16,16,8], index: 1, kind: input, shape index: {}]   ;;  %s2930_s2 = inlined_call_operand.vmem [shape: f32[2,16,16,8], index: 2, kind: input, shape index: {}]   ;;  %s2931_s3 = inlined_call_operand.vmem [shape: f32[3,24,256], index: 3, kind: input, shape index: {}]   ;;  %s2932_s4 = inlined_call_operand.vmem [shape: f32[1,256], index: 4, kind: input, shape index: {}]   ;;  %s2933_s5 = inlined_call_operand.vmem [shape: f32[2,256], index: 5, kind: input, shape index: {}]   ;;  %s2934_s6 = inlined_call_operand.vmem [shape: f32[1,2,1], index: 6, kind: input, shape index: {}]   ;;  %s2935_s7 = inlined_call_operand.hbm [shape: f32[2,2,256], index: 7, kind: output, shape index: {}]  }
   0x1   :  { %2941 = sst [smem:[#allocation10_spill]] %s2928_s0 }
   0x2   :  { %12 = vsyncpa [#allocation4], 0 }
   0x3   :  { %14 = vsyncpa [#allocation4 + $0x1], 0  ;;  %s2169_s24 = smov 0   ;;  %s2171_s25 = smov 0  }
   0x4   :  { %s2173_s26 = smov 0   ;;  %s2175_s27 = smov 0  }
   0x5   :  { %s2177_s28 = smov 0   ;;  %s2179_s29 = smov 0  }
   0x6   :  { %s2181_s30 = smov 0   ;;  %s2183_s8 = smov 0  }
   0x7 LB: > { %2942 = sst [smem:[#allocation6_spill]] %s2112_s29  ;;  %s1833_s9 = sadd.s32 4294967295, %s2120_s8   ;;  %s2120_s8 = sphi %s2183_s8, %s20_s8   ;;  %s2116_s30 = sphi %s2181_s30, %s2954_s30   ;;  %s2112_s29 = sphi %s2179_s29, %s2953_s29   ;;  %s2108_s28 = sphi %s2177_s28, %s2952_s28   ;;  %s2104_s27 = sphi %s2175_s27, %s2951_s27   ;;  %s2100_s26 = sphi %s2173_s26, %s2957_s26   ;;  %s2096_s25 = sphi %s2171_s25, %s2956_s25   ;;  %s2092_s24 = sphi %s2169_s24, %s2955_s24  }
   0x8   : > { %2943 = sst [smem:[#allocation7_spill]] %s2116_s30  ;;  %s1834_s10 = sadd.s32 4294967294, %s2120_s8  }
   0x9   : > { %s29_s11 = sadd.s32 1, %s2112_s29  ;;  %s32_s12 = sadd.s32 1, %s2116_s30 }
   0xa   : > { %p30_p0 = scmp.ge.s32.totalorder %s29_s11, 2  ;;  %p235_p1 = scmp.ne.s32.totalorder %s2100_s26, %s2096_s25 }
   0xb   : > { %p236_p2 = scmp.eq.s32.totalorder %s1833_s9, 3  ;;  %p241_p5 = scmp.ne.s32.totalorder %s2096_s25, %s2092_s24 }
   0xc   : > { %s2959_s11 = smov (%p30_p0, %s29_s11), 0  ;;  %s2961_s12 = smov (!%p30_p0, %s32_s12), %s2116_s30 }
   0xd   : > { %2944 = sst [smem:[#allocation8_spill]] %s2959_s11  ;;  %s221_s13 = ssub.s32 %s2112_s29, %s2959_s11 }
   0xe   : > { %p2220_p3 = por %p236_p2, %p235_p1  ;;  %p34_p4 = scmp.ge.s32.totalorder %s2961_s12, 2 }
   0xf   : > { %p242_p6 = scmp.eq.s32.totalorder %s1834_s10, 3  ;;  %p1843_p7 = scmp.ge.s32.totalorder %s2120_s8, 1 }
  0x10   : > { %s2963_s12 = smov (%p34_p4, %s2961_s12), 0  ;;  %p326_p9 = scmp.lt.s32.totalorder %s2120_s8, 5 }
  0x11   : > { %2946 = sst [smem:[#allocation9_spill]] %s2963_s12  ;;  %p2229_p8 = por %p242_p6, %p241_p5 }
  0x12   : > { %s220_s16 = ssub.s32 %s2116_s30, %s2963_s12  ;;  %s225_s17 = sadd.s32 1, %s2100_s26 }
  0x13   : > { %s222_s18 = sor.u32 %s221_s13, %s220_s16  ;;  %p327_p10 = pnand %p1843_p7, %p326_p9 }
  0x14   : > { %p223_p11 = scmp.eq.s32.totalorder %s222_s18, 0  ;;  %s2936_s20 = sand.u32 (!%p327_p10), 1, %s2096_s25  }
  0x15   : > { %330 = sbr.rel (%p327_p10) target bundleno = 747 (0x2eb), region = 48  ;;  %s2242_s21 = sshll.u32 (!%p327_p10), %s2104_s27, 3 }
  0x16   : > { %s2238_s19 = scalar_select %p223_p11, %s2100_s26, %s225_s17  }
  0x17   : > { %s2246_s22 = sshll.u32 (!%p327_p10), %s2936_s20, 1  ;;  %p390_p12 = scmp.lt.s32.totalorder (!%p327_p10), %s2108_s28, 1 }
  0x18   : > { %p392_p13 = scmp.lt.s32.totalorder (!%p327_p10), %s2242_s21, 15  ;;  %s1850_s13 = sadd.s32 (!%p327_p10), 4294967295, %s2242_s21 }
  0x19   : > { %p402_p0 = scmp.gt.s32.totalorder (!%p327_p10), %s1850_s13, 0  ;;  %p1851_p1 = scmp.lt.s32.totalorder (!%p327_p10), %s1850_s13, 15 }
  0x1a   : > { %vm434_vm0 = vcmask 57344   ;;  %v2122_v0 = vmov 0.0   ;;  %s391_s23 = scalar_select %p390_p12, %s2108_s28, 1  ;;  %vm472_vm1 = vcmask 64512  }
  0x1b   : > { %435 = vst.msk [vmem:[#allocation2 + $0x7] sm:$0x1] %vm434_vm0, %v2122_v0  ;;  %436 = vst.msk [vmem:[#allocation2 + $0x27] sm:$0x1] %vm434_vm0, %v2122_v0  ;;  %s393_s9 = scalar_select %p392_p13, %s2242_s21, 15 }
  0x1c   : > { %437 = vst.msk [vmem:[#allocation2 + $0x47] sm:$0x1] %vm434_vm0, %v2122_v0  ;;  %438 = vst.msk [vmem:[#allocation2 + $0x67] sm:$0x1] %vm434_vm0, %v2122_v0  ;;  %s2292_s10 = sshll.u32 %s391_s23, 5  ;;  %s1943_s20 = sadd.s32 8, %s2242_s21 }
  0x1d   : > { %439 = vst.msk [vmem:[#allocation2 + $0x87] sm:$0x1] %vm434_vm0, %v2122_v0  ;;  %440 = vst.msk [vmem:[#allocation2 + $0xa7] sm:$0x1] %vm434_vm0, %v2122_v0  ;;  %s1846_s16 = sshll.u32 %s393_s9, 1  ;;  %s2948_s0 = sld [smem:[#allocation10_spill]] }
  0x1e   : > { %441 = vst.msk [vmem:[#allocation2 + $0xc7] sm:$0x1] %vm434_vm0, %v2122_v0  ;;  %442 = vst.msk [vmem:[#allocation2 + $0xe7] sm:$0x1] %vm434_vm0, %v2122_v0  ;;  %s396_s17 = sadd.s32 %s2292_s10, %s1846_s16  ;;  %p2302_p2 = scmp.lt.s32.totalorder %s1943_s20, 15 }
  0x1f   : > { %443 = vst.msk [vmem:[#allocation2 + $0x107] sm:$0x1] %vm434_vm0, %v2122_v0  ;;  %444 = vst.msk [vmem:[#allocation2 + $0x127] sm:$0x1] %vm434_vm0, %v2122_v0  ;;  %s1848_s18 = sshll.u32 %s396_s17, 3  ;;  %p1866_p4 = scmp.le.s32.totalorder %s2104_s27, 0 }
  0x20   : > { %445 = vst.msk [vmem:[#allocation2 + $0x18] sm:$0x1] %vm434_vm0, %v2122_v0  ;;  %446 = vst.msk [vmem:[#allocation2 + $0x38] sm:$0x1] %vm434_vm0, %v2122_v0  ;;  %s403_s9 = scalar_select %p402_p0, %s1850_s13, 0 }
  0x21   : > { %447 = vst.msk [vmem:[#allocation2 + $0x58] sm:$0x1] %vm434_vm0, %v2122_v0  ;;  %448 = vst.msk [vmem:[#allocation2 + $0x78] sm:$0x1] %vm434_vm0, %v2122_v0  ;;  %s2965_s20 = smov (!%p2302_p2, %s1943_s20), 15 }
  0x22   : > { %449 = vst.msk [vmem:[#allocation2 + $0x98] sm:$0x1] %vm434_vm0, %v2122_v0  ;;  %450 = vst.msk [vmem:[#allocation2 + $0xb8] sm:$0x1] %vm434_vm0, %v2122_v0  ;;  %s2967_s9 = smov (!%p1851_p1, %s403_s9), 15  ;;  %s2969_s20 = smov (!%p2302_p2, %s2965_s20), 15 }
  0x23   : > { %451 = vst.msk [vmem:[#allocation2 + $0xd8] sm:$0x1] %vm434_vm0, %v2122_v0  ;;  %452 = vst.msk [vmem:[#allocation2 + $0xf8] sm:$0x1] %vm434_vm0, %v2122_v0  ;;  %s2300_s30 = scalar_lea.vmem %s2948_s0, %s1848_s18  ;;  %s1856_s11 = sshll.u32 %s2967_s9, 1 }
  0x24   : > { %453 = vst.msk [vmem:[#allocation2 + $0x118] sm:$0x1] %vm434_vm0, %v2122_v0  ;;  %454 = vst.msk [vmem:[#allocation2 + $0x138] sm:$0x1] %vm434_vm0, %v2122_v0  ;;  %v455_v1 = vld [vmem:[%s2300_s30] sm:$0xff]  ;;  %v456_v2 = vld [vmem:[%s2300_s30 + $0x8] sm:$0xff]  ;;  %s410_s12 = sadd.s32 %s1856_s11, %s2292_s10 }
  0x25   : > { %v457_v3 = vld [vmem:[%s2300_s30 + $0x10] sm:$0xff]  ;;  %473 = vst.msk [vmem:[#allocation2 + $0x28] sm:$0xff] %vm472_vm1, %v455_v1  ;;  %474 = vst.msk [vmem:[#allocation2 + $0x30] sm:$0xff] %vm472_vm1, %v456_v2  ;;  %v458_v4 = vld [vmem:[%s2300_s30 + $0x18] sm:$0xff]  ;;  %s1863_s21 = sshll.u32 %s2969_s20, 1  ;;  %s1858_s13 = sshll.u32 %s410_s12, 3 }
  0x26   : > { %475 = vst.msk [vmem:[#allocation2 + $0x48] sm:$0xff] %vm472_vm1, %v457_v3  ;;  %v459_v5 = vld [vmem:[%s2300_s30 + $0x20] sm:$0xff]  ;;  %v460_v6 = vld [vmem:[%s2300_s30 + $0x28] sm:$0xff]  ;;  %476 = vst.msk [vmem:[#allocation2 + $0x50] sm:$0xff] %vm472_vm1, %v458_v4  ;;  %s427_s16 = sadd.s32 %s1863_s21, %s2292_s10  ;;  %s412_s23 = scalar_lea.vmem %s2929_s1, %s1858_s13 }
  0x27   : > { %477 = vst.msk [vmem:[#allocation2 + $0x68] sm:$0xff] %vm472_vm1, %v459_v5  ;;  %478 = vst.msk [vmem:[#allocation2 + $0x70] sm:$0xff] %vm472_vm1, %v460_v6  ;;  %v461_v7 = vld [vmem:[%s2300_s30 + $0x30] sm:$0xff]  ;;  %v462_v8 = vld [vmem:[%s2300_s30 + $0x38] sm:$0xff]  ;;  %s1865_s9 = sshll.u32 %s427_s16, 3  ;;  %s388_s11 = scalar_lea.vmem [#allocation3], %s2246_s22 }
  0x28   : > { %v463_v9 = vld [vmem:[%s2300_s30 + $0x40] sm:$0xff]  ;;  %479 = vst.msk [vmem:[#allocation2 + $0x88] sm:$0xff] %vm472_vm1, %v461_v7  ;;  %480 = vst.msk [vmem:[#allocation2 + $0x90] sm:$0xff] %vm472_vm1, %v462_v8  ;;  %v464_v10 = vld [vmem:[%s2300_s30 + $0x48] sm:$0xff]  ;;  %s429_s20 = scalar_lea.vmem %s2930_s2, %s1865_s9  ;;  %492 = sbr.rel (%p1866_p4) target bundleno = 47 (0x2f), region = 52 }
  0x29   : > { %481 = vst.msk [vmem:[#allocation2 + $0xa8] sm:$0xff] %vm472_vm1, %v463_v9  ;;  %v465_v11 = vld [vmem:[%s2300_s30 + $0x50] sm:$0xff]  ;;  %v466_v12 = vld [vmem:[%s2300_s30 + $0x58] sm:$0xff]  ;;  %482 = vst.msk [vmem:[#allocation2 + $0xb0] sm:$0xff] %vm472_vm1, %v464_v10 }
  0x2a   : > { %483 = vst.msk [vmem:[#allocation2 + $0xc8] sm:$0xff] %vm472_vm1, %v465_v11  ;;  %484 = vst.msk [vmem:[#allocation2 + $0xd0] sm:$0xff] %vm472_vm1, %v466_v12  ;;  %v467_v13 = vld [vmem:[%s2300_s30 + $0x60] sm:$0xff]  ;;  %v468_v14 = vld [vmem:[%s2300_s30 + $0x68] sm:$0xff] }
  0x2b   : > { %v469_v15 = vld [vmem:[%s2300_s30 + $0x70] sm:$0xff]  ;;  %485 = vst.msk [vmem:[#allocation2 + $0xe8] sm:$0xff] %vm472_vm1, %v467_v13  ;;  %486 = vst.msk [vmem:[#allocation2 + $0xf0] sm:$0xff] %vm472_vm1, %v468_v14  ;;  %v470_v16 = vld [vmem:[%s2300_s30 + $0x78] sm:$0xff] }
  0x2c   : > { %487 = vst.msk [vmem:[#allocation2 + $0x108] sm:$0xff] %vm472_vm1, %v469_v15  ;;  %488 = vst.msk [vmem:[#allocation2 + $0x110] sm:$0xff] %vm472_vm1, %v470_v16 }
  0x2d   : > { %v493_v17 = vld [vmem:[%s412_s23] sm:$0xff]  ;;  %v494_v18 = vld [vmem:[%s412_s23 + $0x8] sm:$0xff] }
  0x2e   : > { %495 = vst.msk [vmem:[#allocation2 + $0x8] sm:$0xff] %vm472_vm1, %v493_v17  ;;  %496 = vst.msk [vmem:[#allocation2 + $0x10] sm:$0xff] %vm472_vm1, %v494_v18 }
  0x2f PF: > { %p1867_p5 = scmp.ne.s32.totalorder %s2104_s27, 0 }
  0x31   : > { %500 = sbr.rel (%p1867_p5) target bundleno = 56 (0x38), region = 56 }
  0x36   : > { %v2123_v19 = vmov 0.0  }
  0x37   : > { %501 = vst.msk [vmem:[#allocation2 + $0x8] sm:$0xff] %vm472_vm1, %v2123_v19  ;;  %502 = vst.msk [vmem:[#allocation2 + $0x10] sm:$0xff] %vm472_vm1, %v2123_v19 }
  0x38 PF: > { %p1868_p6 = scmp.ge.s32.totalorder %s2104_s27, 1 }
  0x3a   : > { %506 = sbr.rel (%p1868_p6) target bundleno = 65 (0x41), region = 60 }
  0x3f   : > { %v507_v20 = vld [vmem:[%s429_s20] sm:$0xff]  ;;  %v508_v21 = vld [vmem:[%s429_s20 + $0x8] sm:$0xff] }
  0x40   : > { %510 = vst.msk [vmem:[#allocation2 + $0x128] sm:$0xff] %vm472_vm1, %v507_v20  ;;  %511 = vst.msk [vmem:[#allocation2 + $0x130] sm:$0xff] %vm472_vm1, %v508_v21 }
  0x41 PF: > { %p1869_p7 = scmp.ne.s32.totalorder %s2104_s27, 1 }
  0x43   : > { %515 = sbr.rel (%p1869_p7) target bundleno = 74 (0x4a), region = 64 }
  0x48   : > { %v2124_v22 = vmov 0.0  }
  0x49   : > { %517 = vst.msk [vmem:[#allocation2 + $0x128] sm:$0xff] %vm472_vm1, %v2124_v22  ;;  %518 = vst.msk [vmem:[#allocation2 + $0x130] sm:$0xff] %vm472_vm1, %v2124_v22 }
  0x4a PF: > { %v549_v23 = vld [vmem:[#allocation2 + $0xa8] sm:$0xff]  ;;  %906 = vmatprep.mubr.f32.mxu0 %v2122_v0  ;;  %954 = vmatprep.mubr.f32.mxu1 %v2122_v0  ;;  %s2125_s0 = smov 8   ;;  %s2126_s29 = smov 16   ;;  %v550_v27 = vld [vmem:[#allocation2 + $0xb0] sm:$0xff]  ;;  %v1875_v31 = vld [vmem:[%s2931_s3 + $0x58] sm:$0xff]  ;;  %vm759_vm2 = vcmask 130048  }
  0x4b   : > { %v541_v24 = vld [vmem:[#allocation2 + $0x28] sm:$0xff]  ;;  %619 = vrot.lane.b32.xlu0 %v549_v23, %s2125_s0  ;;  %v570_v28 = vld [vmem:[#allocation2 + $0xb1] sm:$0xff]  ;;  %868 = vmatprep.subr.mxu0 %v1875_v31  ;;  %v1872_v36 = vld [vmem:[%s2931_s3 + $0x40] sm:$0xff]  ;;  %vm793_vm3 = vcmask 195584   ;;  %vm1637_vm4 = vcmask 7168   ;;  %s1932_s16 = sshll.u32 %s2108_s28, 1 }
  0x4c   : > { %603 = vrot.lane.b32.xlu1 %v541_v24, %s2125_s0  ;;  %v569_v25 = vld [vmem:[#allocation2 + $0xa9] sm:$0xff]  ;;  %v562_v30 = vld [vmem:[#allocation2 + $0x31] sm:$0xff]  ;;  %1944 = vmatprep.subr.mxu1 %v1875_v31  ;;  %v784_v18 = vld [vmem:[%s2931_s3 + $0x20] sm:$0xff]  ;;  %s1706_s17 = sadd.s32 %s2104_s27, %s1932_s16  ;;  %s1710_s23 = sshll.u32 %s388_s11, 4  ;;  %s1711_s23 = int_to_ptr.vmem [resolvable:$true] %s1710_s23 }
  0x4d   : > { %v561_v26 = vld [vmem:[#allocation2 + $0x29] sm:$0xff]  ;;  %v1871_v37 = vld [vmem:[%s2931_s3 + $0x38] sm:$0xff]  ;;  %v1912_v19 = vld [vmem:[%s2931_s3 + $0x80] sm:$0xff]  ;;  %s1933_s18 = sshll.u32 %s1706_s17, 5  ;;  %s2950_s10 = sand.u32 1, %s2096_s25  }
  0x4e   : > { %v542_v29 = vld [vmem:[#allocation2 + $0x30] sm:$0xff]  ;;  %v1873_v33 = vld [vmem:[%s2931_s3 + $0x48] sm:$0xff]  ;;  %v783_v21 = vld [vmem:[%s2931_s3 + $0x18] sm:$0xff]  ;;  %s1708_s30 = scalar_lea.hbm %s2935_s7, %s1933_s18  ;;  %s1695_s12 = scalar_lea.sflag [#allocation4], %s2950_s10 }
  0x4f   : > { %699 = vrot.lane.b32.xlu0 %v569_v25, %s2126_s29  ;;  %v1874_v32 = vld [vmem:[%s2931_s3 + $0x50] sm:$0xff]  ;;  %v551_v34 = vld [vmem:[#allocation2 + $0xc8] sm:$0xff]  ;;  %v1911_v22 = vld [vmem:[%s2931_s3 + $0x78] sm:$0xff]  ;;  %s2028_s21 = scalar_lea.vmem %s1711_s23, 32  ;;  %s2128_s27 = smov [#allocation3]  }
  0x50   : > { %683 = vrot.lane.b32.xlu1 %v561_v26, %s2126_s29  ;;  %v571_v35 = vld [vmem:[#allocation2 + $0xc9] sm:$0xff]  ;;  %869 = vmatpush1.msra.mxu0 %v1874_v32  ;;  %v572_v43 = vld [vmem:[#allocation2 + $0xd1] sm:$0xff]  ;;  %p2029_p9 = scmp.ne.s32.totalorder %s1711_s23, %s2028_s21  ;;  %s2032_s28 = sshll.u32 %s2128_s27, 4  ;;  %s2033_s28 = int_to_ptr.vmem [resolvable:$false] %s2032_s28 }
  0x51   : > { %1947 = vmatpush1.msra.mxu1 %v1874_v32  ;;  %870 = vmatprep.subr.mxu0 %v1873_v33  ;;  %v1870_v38 = vld [vmem:[%s2931_s3 + $0x30] sm:$0xff]  ;;  %v543_v39 = vld [vmem:[#allocation2 + $0x48] sm:$0xff]  ;;  %s2034_s13 = scalar_lea.vmem %s2033_s28, 64  ;;  %p2035_p12 = scmp.lt.s32.totalorder %s1711_s23, %s2033_s28 }
  0x52   : > { %1945 = vmatprep.subr.mxu1 %v1873_v33  ;;  %v563_v40 = vld [vmem:[#allocation2 + $0x49] sm:$0xff]  ;;  %871 = vmatpush1.msra.mxu0 %v1872_v36  ;;  %v564_v46 = vld [vmem:[#allocation2 + $0x51] sm:$0xff]  ;;  %v1908_v33 = vld [vmem:[%s2931_s3 + $0x60] sm:$0xff]  ;;  %p2030_p10 = pnand %p2029_p9, %p2220_p3  ;;  %p2036_p13 = scmp.lt.s32.totalorder %s2034_s13, %s2028_s21 }
  0x53   : > { %621 = vrot.lane.b32.xlu0 %v550_v27, %s2125_s0  ;;  %1948 = vmatpush1.msra.mxu1 %v1872_v36  ;;  %v785_v41 = vld [vmem:[%s2931_s3 + $0x28] sm:$0xff]  ;;  %v552_v42 = vld [vmem:[#allocation2 + $0xd0] sm:$0xff] }
  0x54   : > { %701 = vrot.lane.b32.xlu1 %v570_v28, %s2126_s29  ;;  %872 = vmatprep.subr.mxu0 %v1871_v37  ;;  %v1913_v44 = vld [vmem:[%s2931_s3 + $0x88] sm:$0xff]  ;;  %v544_v45 = vld [vmem:[#allocation2 + $0x50] sm:$0xff]  ;;  %p2031_p11 = pneg %p2030_p10  ;;  %p2037_p0 = por %p2036_p13, %p2035_p12 }
  0x55   : > { %1946 = vmatprep.subr.mxu1 %v1871_v37  ;;  %873 = vmatpush1.msra.mxu0 %v1870_v38  ;;  %v553_v47 = vld [vmem:[#allocation2 + $0xe8] sm:$0xff]  ;;  %v554_v51 = vld [vmem:[#allocation2 + $0xf0] sm:$0xff] }
  0x56   : > { %1949 = vmatpush1.msra.mxu1 %v1870_v38  ;;  %1209 = vmatprep.subr.mxu0 %v1913_v44  ;;  %v573_v48 = vld [vmem:[#allocation2 + $0xe9] sm:$0xff]  ;;  %v574_v52 = vld [vmem:[#allocation2 + $0xf1] sm:$0xff]  ;;  %p2038_p1 = pnand %p2037_p0, %p2031_p11 }
  0x57   : > { %605 = vrot.lane.b32.xlu0 %v542_v29, %s2125_s0  ;;  %1035 = vmatprep.subr.mxu1 %v785_v41  ;;  %v545_v49 = vld [vmem:[#allocation2 + $0x68] sm:$0xff]  ;;  %v546_v53 = vld [vmem:[#allocation2 + $0x70] sm:$0xff]  ;;  %v780_v29 = vld [vmem:[%s2931_s3] sm:$0xff] }
  0x58   : > { %685 = vrot.lane.b32.xlu1 %v562_v30, %s2126_s29  ;;  %v565_v50 = vld [vmem:[#allocation2 + $0x69] sm:$0xff]  ;;  %v566_v54 = vld [vmem:[#allocation2 + $0x71] sm:$0xff] }
  0x59   : > { %v555_v55 = vld [vmem:[#allocation2 + $0x108] sm:$0xff]  ;;  %v556_v59 = vld [vmem:[#allocation2 + $0x110] sm:$0xff] }
  0x5a   : > { %v575_v56 = vld [vmem:[#allocation2 + $0x109] sm:$0xff]  ;;  %v576_v60 = vld [vmem:[#allocation2 + $0x111] sm:$0xff] }
  0x5b   : > { %623 = vrot.lane.b32.xlu0 %v551_v34, %s2125_s0  ;;  %v547_v57 = vld [vmem:[#allocation2 + $0x88] sm:$0xff]  ;;  %v548_v61 = vld [vmem:[#allocation2 + $0x90] sm:$0xff] }
  0x5c   : > { %703 = vrot.lane.b32.xlu1 %v571_v35, %s2126_s29  ;;  %v567_v58 = vld [vmem:[#allocation2 + $0x89] sm:$0xff]  ;;  %v568_v62 = vld [vmem:[#allocation2 + $0x91] sm:$0xff] }
  0x5d   : > { %v539_v63 = vld [vmem:[#allocation2 + $0x8] sm:$0xff]  ;;  %v540_v2 = vld [vmem:[#allocation2 + $0x10] sm:$0xff] }
  0x5e   : > { %v559_v1 = vld [vmem:[#allocation2 + $0x9] sm:$0xff]  ;;  %v560_v3 = vld [vmem:[#allocation2 + $0x11] sm:$0xff] }
  0x5f   : > { %607 = vrot.lane.b32.xlu0 %v543_v39, %s2125_s0  ;;  %v557_v4 = vld [vmem:[#allocation2 + $0x128] sm:$0xff]  ;;  %v558_v6 = vld [vmem:[#allocation2 + $0x130] sm:$0xff] }
  0x60   : > { %687 = vrot.lane.b32.xlu1 %v563_v40, %s2126_s29  ;;  %v577_v5 = vld [vmem:[#allocation2 + $0x129] sm:$0xff]  ;;  %v578_v7 = vld [vmem:[#allocation2 + $0x131] sm:$0xff] }
  0x61   : > { %v529_v10 = vld [vmem:[#allocation2 + $0xa7] sm:$0xff]  ;;  %v530_v20 = vld [vmem:[#allocation2 + $0xaf] sm:$0xff] }
  0x62   : > { %v521_v11 = vld [vmem:[#allocation2 + $0x27] sm:$0xff]  ;;  %v782_v23 = vld [vmem:[%s2931_s3 + $0x10] sm:$0xff] }
  0x63   : > { %625 = vrot.lane.b32.xlu0 %v552_v42, %s2125_s0  ;;  %v1910_v24 = vld [vmem:[%s2931_s3 + $0x70] sm:$0xff]  ;;  %v781_v27 = vld [vmem:[%s2931_s3 + $0x8] sm:$0xff] }
  0x64   : > { %705 = vrot.lane.b32.xlu1 %v572_v43, %s2126_s29  ;;  %v522_v31 = vld [vmem:[#allocation2 + $0x2f] sm:$0xff]  ;;  %v531_v38 = vld [vmem:[#allocation2 + $0xc7] sm:$0xff] }
  0x65   : > { %v1909_v32 = vld [vmem:[%s2931_s3 + $0x68] sm:$0xff] }
  0x66   : > { %v523_v43 = vld [vmem:[#allocation2 + $0x47] sm:$0xff] }
  0x67   : > { %609 = vrot.lane.b32.xlu0 %v544_v45, %s2125_s0 }
  0x68   : > { %689 = vrot.lane.b32.xlu1 %v564_v46, %s2126_s29 }
  0x6b   : > { %627 = vrot.lane.b32.xlu0 %v553_v47, %s2125_s0 }
  0x6c   : > { %707 = vrot.lane.b32.xlu1 %v573_v48, %s2126_s29  ;;  %v532_v48 = vld [vmem:[#allocation2 + $0xcf] sm:$0xff] }
  0x6f   : > { %611 = vrot.lane.b32.xlu0 %v545_v49, %s2125_s0 }
  0x70   : > { %691 = vrot.lane.b32.xlu1 %v565_v50, %s2126_s29 }
  0x73   : > { %629 = vrot.lane.b32.xlu0 %v554_v51, %s2125_s0 }
  0x74   : > { %709 = vrot.lane.b32.xlu1 %v574_v52, %s2126_s29 }
  0x77   : > { %613 = vrot.lane.b32.xlu0 %v546_v53, %s2125_s0  ;;  %v524_v53 = vld [vmem:[#allocation2 + $0x4f] sm:$0xff] }
  0x78   : > { %693 = vrot.lane.b32.xlu1 %v566_v54, %s2126_s29 }
  0x7b   : > { %631 = vrot.lane.b32.xlu0 %v555_v55, %s2125_s0 }
  0x7c   : > { %711 = vrot.lane.b32.xlu1 %v575_v56, %s2126_s29 }
  0x7f   : > { %615 = vrot.lane.b32.xlu0 %v547_v57, %s2125_s0 }
  0x80   : > { %695 = vrot.lane.b32.xlu1 %v567_v58, %s2126_s29  ;;  %v533_v58 = vld [vmem:[#allocation2 + $0xe7] sm:$0xff] }
  0x83   : > { %633 = vrot.lane.b32.xlu0 %v556_v59, %s2125_s0 }
  0x84   : > { %713 = vrot.lane.b32.xlu1 %v576_v60, %s2126_s29 }
  0x87   : > { %617 = vrot.lane.b32.xlu0 %v548_v61, %s2125_s0 }
  0x88   : > { %697 = vrot.lane.b32.xlu1 %v568_v62, %s2126_s29 }
  0x8b   : > { %599 = vrot.lane.b32.xlu0 %v539_v63, %s2125_s0  ;;  %v525_v63 = vld [vmem:[#allocation2 + $0x67] sm:$0xff] }
  0x8c   : > { %679 = vrot.lane.b32.xlu1 %v559_v1, %s2126_s29 }
  0x8f   : > { %601 = vrot.lane.b32.xlu0 %v540_v2, %s2125_s0 }
  0x90   : > { %681 = vrot.lane.b32.xlu1 %v560_v3, %s2126_s29 }
  0x93   : > { %635 = vrot.lane.b32.xlu0 %v557_v4, %s2125_s0 }
  0x94   : > { %715 = vrot.lane.b32.xlu1 %v577_v5, %s2126_s29  ;;  %v534_v5 = vld [vmem:[#allocation2 + $0xef] sm:$0xff] }
  0x97   : > { %637 = vrot.lane.b32.xlu0 %v558_v6, %s2125_s0 }
  0x98   : > { %717 = vrot.lane.b32.xlu1 %v578_v7, %s2126_s29 }
  0xbd   : > { %v620_v8 = vpop.permute.xlu0 %619 }
  0xbe   : > { %v604_v9 = vpop.permute.xlu1 %603  ;;  %v749_v12 = vsel %vm472_vm1, %v529_v10, %v620_v8  ;;  %v526_v10 = vld [vmem:[#allocation2 + $0x6f] sm:$0xff] }
  0xbf   : > { %v741_v13 = vsel %vm472_vm1, %v521_v11, %v604_v9 }
  0xc1   : > { %v700_v14 = vpop.permute.xlu0 %699 }
  0xc2   : > { %v684_v15 = vpop.permute.xlu1 %683  ;;  %v2436_v16 = vsel %vm759_vm2, %v749_v12, %v700_v14 }
  0xc3   : > { %v2439_v17 = vsel %vm759_vm2, %v741_v13, %v684_v15  ;;  %1884 = vmatmul.mubr.msk.f32.vlgmr.msra.gmra.mxu1 %vm793_vm3, %v2436_v16  ;;  %v535_v15 = vld [vmem:[#allocation2 + $0x107] sm:$0xff] }
  0xc4   : > { %1876 = vmatmul.mubr.msk.f32.vlgmr.msra.gmra.mxu0 %vm793_vm3, %v2439_v17  ;;  %960 = vmatprep.mubr.f32.mxu1 %v2122_v0 }
  0xc5   : > { %912 = vmatprep.mubr.f32.mxu0 %v2122_v0  ;;  %v622_v25 = vpop.permute.xlu0 %621  ;;  %1036 = vmatpush1.msra.mxu1 %v784_v18 }
  0xc6   : > { %v702_v26 = vpop.permute.xlu1 %701  ;;  %1210 = vmatpush1.msra.mxu0 %v1912_v19  ;;  %v750_v28 = vsel %vm472_vm1, %v530_v20, %v622_v25  ;;  %1037 = vmatprep.subr.mxu1 %v783_v21 }
  0xc7   : > { %1211 = vmatprep.subr.mxu0 %v1911_v22  ;;  %v2473_v30 = vsel %vm759_vm2, %v750_v28, %v702_v26  ;;  %1038 = vmatpush1.msra.mxu1 %v782_v23  ;;  %v527_v22 = vld [vmem:[#allocation2 + $0x87] sm:$0xff] }
  0xc8   : > { %1212 = vmatpush1.msra.mxu0 %v1910_v24  ;;  %1885 = vmatmul.mubr.msk.f32.gmra.mxu1 %vm793_vm3, %v2473_v30 }
  0xc9   : > { %1039 = vmatprep.subr.mxu1 %v781_v27  ;;  %v606_v34 = vpop.permute.xlu0 %605  ;;  %966 = vmatprep.mubr.f32.mxu1 %v2122_v0  ;;  %v536_v27 = vld [vmem:[#allocation2 + $0x10f] sm:$0xff] }
  0xca   : > { %v686_v35 = vpop.permute.xlu1 %685  ;;  %1040 = vmatpush1.msra.mxu1 %v780_v29  ;;  %v742_v36 = vsel %vm472_vm1, %v522_v31, %v606_v34  ;;  %1213 = vmatprep.subr.mxu0 %v1909_v32 }
  0xcb   : > { %v2486_v37 = vsel %vm759_vm2, %v742_v36, %v686_v35  ;;  %1214 = vmatpush1.msra.mxu0 %v1908_v33  ;;  %v528_v33 = vld [vmem:[#allocation2 + $0x8f] sm:$0xff] }
  0xcc   : > { %1877 = vmatmul.mubr.msk.f32.gmra.mxu0 %vm793_vm3, %v2486_v37 }
  0xcd   : > { %v624_v39 = vpop.permute.xlu0 %623  ;;  %918 = vmatprep.mubr.f32.mxu0 %v2122_v0 }
  0xce   : > { %v704_v40 = vpop.permute.xlu1 %703  ;;  %v751_v41 = vsel %vm472_vm1, %v531_v38, %v624_v39  ;;  %v519_v39 = vld [vmem:[#allocation2 + $0x7] sm:$0xff] }
  0xcf   : > { %v2493_v42 = vsel %vm759_vm2, %v751_v41, %v704_v40 }
  0xd0   : > { %1886 = vmatmul.mubr.msk.f32.gmra.mxu1 %vm793_vm3, %v2493_v42 }
  0xd1   : > { %v608_v44 = vpop.permute.xlu0 %607  ;;  %972 = vmatprep.mubr.f32.mxu1 %v2122_v0 }
  0xd2   : > { %v688_v45 = vpop.permute.xlu1 %687  ;;  %v743_v46 = vsel %vm472_vm1, %v523_v43, %v608_v44 }
  0xd3   : > { %v2500_v47 = vsel %vm759_vm2, %v743_v46, %v688_v45  ;;  %v520_v45 = vld [vmem:[#allocation2 + $0xf] sm:$0xff] }
  0xd4   : > { %1878 = vmatmul.mubr.msk.f32.gmra.mxu0 %vm793_vm3, %v2500_v47 }
  0xd5   : > { %v626_v49 = vpop.permute.xlu0 %625  ;;  %924 = vmatprep.mubr.f32.mxu0 %v2122_v0 }
  0xd6   : > { %v706_v50 = vpop.permute.xlu1 %705  ;;  %v752_v51 = vsel %vm472_vm1, %v532_v48, %v626_v49 }
  0xd7   : > { %v2507_v52 = vsel %vm759_vm2, %v752_v51, %v706_v50  ;;  %v538_v51 = vld [vmem:[#allocation2 + $0x12f] sm:$0xff] }
  0xd8   : > { %1887 = vmatmul.mubr.msk.f32.gmra.mxu1 %vm793_vm3, %v2507_v52 }
  0xd9   : > { %v610_v54 = vpop.permute.xlu0 %609  ;;  %978 = vmatprep.mubr.f32.mxu1 %v2122_v0 }
  0xda   : > { %v690_v55 = vpop.permute.xlu1 %689  ;;  %v744_v56 = vsel %vm472_vm1, %v524_v53, %v610_v54 }
  0xdb   : > { %v2514_v57 = vsel %vm759_vm2, %v744_v56, %v690_v55 }
  0xdc   : > { %1879 = vmatmul.mubr.msk.f32.gmra.mxu0 %vm793_vm3, %v2514_v57 }
  0xdd   : > { %v628_v59 = vpop.permute.xlu0 %627  ;;  %930 = vmatprep.mubr.f32.mxu0 %v2122_v0 }
  0xde   : > { %v708_v60 = vpop.permute.xlu1 %707  ;;  %v753_v61 = vsel %vm472_vm1, %v533_v58, %v628_v59 }
  0xdf   : > { %v2521_v62 = vsel %vm759_vm2, %v753_v61, %v708_v60 }
  0xe0   : > { %1888 = vmatmul.mubr.msk.f32.gmra.mxu1 %vm793_vm3, %v2521_v62 }
  0xe1   : > { %v612_v1 = vpop.permute.xlu0 %611  ;;  %984 = vmatprep.mubr.f32.mxu1 %v2122_v0 }
  0xe2   : > { %v692_v2 = vpop.permute.xlu1 %691  ;;  %v745_v3 = vsel %vm472_vm1, %v525_v63, %v612_v1 }
  0xe3   : > { %v2528_v4 = vsel %vm759_vm2, %v745_v3, %v692_v2 }
  0xe4   : > { %1880 = vmatmul.mubr.msk.f32.gmra.mxu0 %vm793_vm3, %v2528_v4 }
  0xe5   : > { %v630_v6 = vpop.permute.xlu0 %629  ;;  %936 = vmatprep.mubr.f32.mxu0 %v2122_v0 }
  0xe6   : > { %v710_v7 = vpop.permute.xlu1 %709  ;;  %v754_v8 = vsel %vm472_vm1, %v534_v5, %v630_v6 }
  0xe7   : > { %v2535_v9 = vsel %vm759_vm2, %v754_v8, %v710_v7 }
  0xe8   : > { %1889 = vmatmul.mubr.msk.f32.gmra.mxu1 %vm793_vm3, %v2535_v9 }
  0xe9   : > { %v614_v11 = vpop.permute.xlu0 %613  ;;  %990 = vmatprep.mubr.f32.mxu1 %v2122_v0 }
  0xea   : > { %v694_v12 = vpop.permute.xlu1 %693  ;;  %v746_v13 = vsel %vm472_vm1, %v526_v10, %v614_v11 }
  0xeb   : > { %v2542_v14 = vsel %vm759_vm2, %v746_v13, %v694_v12 }
  0xec   : > { %1881 = vmatmul.mubr.msk.f32.gmra.mxu0 %vm793_vm3, %v2542_v14 }
  0xed   : > { %v632_v18 = vpop.permute.xlu0 %631  ;;  %942 = vmatprep.mubr.f32.mxu0 %v2122_v0 }
  0xee   : > { %v712_v19 = vpop.permute.xlu1 %711  ;;  %v755_v20 = vsel %vm472_vm1, %v535_v15, %v632_v18  ;;  %v1378_v18 = vlaneseq }
  0xef   : > { %v2549_v21 = vsel %vm759_vm2, %v755_v20, %v712_v19 }
  0xf0   : > { %1890 = vmatmul.mubr.msk.f32.gmra.mxu1 %vm793_vm3, %v2549_v21 }
  0xf1   : > { %v616_v23 = vpop.permute.xlu0 %615  ;;  %996 = vmatprep.mubr.f32.mxu1 %v2122_v0 }
  0xf2   : > { %v696_v24 = vpop.permute.xlu1 %695  ;;  %v747_v25 = vsel %vm472_vm1, %v527_v22, %v616_v23 }
  0xf3   : > { %v768_v26 = vsel %vm759_vm2, %v747_v25, %v696_v24 }
  0xf4   : > { %1882 = vmatmul.mubr.msk.f32.gmra.mxu0 %vm793_vm3, %v768_v26 }
  0xf5   : > { %v634_v28 = vpop.permute.xlu0 %633  ;;  %948 = vmatprep.mubr.f32.mxu0 %v2122_v0 }
  0xf6   : > { %v714_v29 = vpop.permute.xlu1 %713  ;;  %v756_v31 = vsel %vm472_vm1, %v536_v27, %v634_v28  ;;  %v1376_v28 = vld [vmem:[%s2932_s4] sm:$0x3] }
  0xf7   : > { %v2560_v32 = vsel %vm759_vm2, %v756_v31, %v714_v29 }
  0xf8   : > { %1891 = vmatmul.mubr.msk.f32.gmra.mxu1 %vm793_vm3, %v2560_v32 }
  0xf9   : > { %v618_v34 = vpop.permute.xlu0 %617  ;;  %1073 = vmatprep.mubr.f32.mxu1 %v2122_v0 }
  0xfa   : > { %v698_v35 = vpop.permute.xlu1 %697  ;;  %v748_v36 = vsel %vm472_vm1, %v528_v33, %v618_v34 }
  0xfb   : > { %v769_v38 = vsel %vm759_vm2, %v748_v36, %v698_v35 }
  0xfc   : > { %1883 = vmatmul.mubr.msk.f32.gmra.mxu0 %vm793_vm3, %v769_v38 }
  0xfd   : > { %v600_v40 = vpop.permute.xlu0 %599  ;;  %1247 = vmatprep.mubr.f32.mxu0 %v2122_v0 }
  0xfe   : > { %v680_v41 = vpop.permute.xlu1 %679  ;;  %v739_v43 = vsel %vm472_vm1, %v519_v39, %v600_v40 }
  0xff   : > { %v760_v44 = vsel %vm759_vm2, %v739_v43, %v680_v41  ;;  %v1930_v41 = vld [vmem:[%s2933_s5 + $0x1] ss:$2 sm:$0x3] }
 0x100   : > { %1892 = vmatmul.mubr.msk.f32.vlgmr.msra.gmra.mxu1 %vm793_vm3, %v760_v44  ;;  %1914 = vmatmul.mubr.msk.f32.vlgmr.msra.gmra.mxu0 %vm793_vm3, %v2500_v47 }
 0x101   : > { %v602_v46 = vpop.permute.xlu0 %601  ;;  %1079 = vmatprep.mubr.f32.mxu1 %v2122_v0  ;;  %1253 = vmatprep.mubr.f32.mxu0 %v2122_v0 }
 0x102   : > { %v682_v48 = vpop.permute.xlu1 %681  ;;  %v740_v49 = vsel %vm472_vm1, %v520_v45, %v602_v46 }
 0x103   : > { %v761_v50 = vsel %vm759_vm2, %v740_v49, %v682_v48  ;;  %v1452_v49 = vld [vmem:[%s2933_s5] ss:$2 sm:$0x3] }
 0x104   : > { %1893 = vmatmul.mubr.msk.f32.gmra.mxu1 %vm793_vm3, %v761_v50  ;;  %1915 = vmatmul.mubr.msk.f32.gmra.mxu0 %vm793_vm3, %v2514_v57 }
 0x105   : > { %1085 = vmatprep.mubr.f32.mxu1 %v2122_v0  ;;  %1259 = vmatprep.mubr.f32.mxu0 %v2122_v0 }
 0x108   : > { %1894 = vmatmul.mubr.msk.f32.gmra.mxu1 %vm793_vm3, %v2439_v17  ;;  %1916 = vmatmul.mubr.msk.f32.gmra.mxu0 %vm793_vm3, %v2528_v4  ;;  %v636_v17 = vpop.permute.xlu0 %635 }
 0x109   : > { %1091 = vmatprep.mubr.f32.mxu1 %v2122_v0  ;;  %1265 = vmatprep.mubr.f32.mxu0 %v2122_v0 }
 0x10c   : > { %1895 = vmatmul.mubr.msk.f32.gmra.mxu1 %vm793_vm3, %v2486_v37  ;;  %1917 = vmatmul.mubr.msk.f32.gmra.mxu0 %vm793_vm3, %v2542_v14  ;;  %v537_v37 = vld [vmem:[#allocation2 + $0x127] sm:$0xff] }
 0x10d   : > { %1097 = vmatprep.mubr.f32.mxu1 %v2122_v0  ;;  %1271 = vmatprep.mubr.f32.mxu0 %v2122_v0 }
 0x110   : > { %1896 = vmatmul.mubr.msk.f32.gmra.mxu1 %vm793_vm3, %v2500_v47  ;;  %1918 = vmatmul.mubr.msk.f32.gmra.mxu0 %vm793_vm3, %v768_v26  ;;  %v638_v47 = vpop.permute.xlu0 %637 }
 0x111   : > { %1103 = vmatprep.mubr.f32.mxu1 %v2122_v0  ;;  %1277 = vmatprep.mubr.f32.mxu0 %v2122_v0  ;;  %v758_v53 = vsel %vm472_vm1, %v538_v51, %v638_v47 }
 0x114   : > { %1897 = vmatmul.mubr.msk.f32.gmra.mxu1 %vm793_vm3, %v2514_v57  ;;  %1919 = vmatmul.mubr.msk.f32.gmra.mxu0 %vm793_vm3, %v769_v38 }
 0x115   : > { %1109 = vmatprep.mubr.f32.mxu1 %v2122_v0  ;;  %1283 = vmatprep.mubr.f32.mxu0 %v2122_v0 }
 0x118   : > { %1898 = vmatmul.mubr.msk.f32.gmra.mxu1 %vm793_vm3, %v2528_v4  ;;  %1920 = vmatmul.mubr.msk.f32.gmra.mxu0 %vm793_vm3, %v2436_v16 }
 0x119   : > { %1115 = vmatprep.mubr.f32.mxu1 %v2122_v0  ;;  %1289 = vmatprep.mubr.f32.mxu0 %v2122_v0 }
 0x11c   : > { %1899 = vmatmul.mubr.msk.f32.gmra.mxu1 %vm793_vm3, %v2542_v14  ;;  %1921 = vmatmul.mubr.msk.f32.gmra.mxu0 %vm793_vm3, %v2473_v30 }
 0x11d   : > { %1121 = vmatprep.mubr.f32.mxu1 %v2122_v0  ;;  %1295 = vmatprep.mubr.f32.mxu0 %v2122_v0 }
 0x120   : > { %1900 = vmatmul.mubr.msk.f32.gmra.mxu1 %vm793_vm3, %v768_v26  ;;  %1922 = vmatmul.mubr.msk.f32.gmra.mxu0 %vm793_vm3, %v2493_v42 }
 0x121   : > { %1127 = vmatprep.mubr.f32.mxu1 %v2122_v0  ;;  %1301 = vmatprep.mubr.f32.mxu0 %v2122_v0 }
 0x124   : > { %1901 = vmatmul.mubr.msk.f32.gmra.mxu1 %vm793_vm3, %v769_v38  ;;  %1923 = vmatmul.mubr.msk.f32.gmra.mxu0 %vm793_vm3, %v2507_v52 }
 0x125   : > { %1133 = vmatprep.mubr.f32.mxu1 %v2122_v0  ;;  %1307 = vmatprep.mubr.f32.mxu0 %v2122_v0 }
 0x128   : > { %1902 = vmatmul.mubr.msk.f32.gmra.mxu1 %vm793_vm3, %v2436_v16  ;;  %1924 = vmatmul.mubr.msk.f32.gmra.mxu0 %vm793_vm3, %v2521_v62  ;;  %v716_v16 = vpop.permute.xlu1 %715 }
 0x129   : > { %1139 = vmatprep.mubr.f32.mxu1 %v2122_v0  ;;  %1313 = vmatprep.mubr.f32.mxu0 %v2122_v0 }
 0x12c   : > { %1903 = vmatmul.mubr.msk.f32.gmra.mxu1 %vm793_vm3, %v2473_v30  ;;  %1925 = vmatmul.mubr.msk.f32.gmra.mxu0 %vm793_vm3, %v2535_v9  ;;  %v757_v30 = vsel %vm472_vm1, %v537_v37, %v636_v17  ;;  %v718_v54 = vpop.permute.xlu1 %717 }
 0x12d   : > { %1145 = vmatprep.mubr.f32.mxu1 %v2122_v0  ;;  %1319 = vmatprep.mubr.f32.mxu0 %v2122_v0 }
 0x130   : > { %1904 = vmatmul.mubr.msk.f32.gmra.mxu1 %vm793_vm3, %v2493_v42  ;;  %1926 = vmatmul.mubr.msk.f32.gmra.mxu0 %vm793_vm3, %v2549_v21  ;;  %v778_v42 = vsel %vm759_vm2, %v757_v30, %v716_v16  ;;  %v1379_v21 = vshrl.u32 %v1378_v18, 7 }
 0x131   : > { %1151 = vmatprep.mubr.f32.mxu1 %v2122_v0  ;;  %1325 = vmatprep.mubr.f32.mxu0 %v2122_v0 }
 0x132   : > { %v1380_v25 = vsub.s32 0, %v1379_v21  ;;  %v1384_v29 = vsub.s32 1, %v1379_v21 }
 0x134   : > { %1905 = vmatmul.mubr.msk.f32.gmra.mxu1 %vm793_vm3, %v2507_v52  ;;  %1927 = vmatmul.mubr.msk.f32.gmra.mxu0 %vm793_vm3, %v2560_v32  ;;  %v779_v52 = vsel %vm759_vm2, %v758_v53, %v718_v54  ;;  %v2718_v34 = vrot.slane %v1376_v28, %v1380_v25  ;;  %v2720_v40 = vrot.slane %v1376_v28, %v1384_v29 }
 0x135   : > { %1157 = vmatprep.mubr.f32.mxu1 %v2122_v0  ;;  %1331 = vmatprep.mubr.f32.mxu0 %v2122_v0  ;;  %v2729_v37 = vrot.slane %v1930_v41, %v1380_v25  ;;  %v2732_v54 = vrot.slane %v1930_v41, %v1384_v29 }
 0x138   : > { %1906 = vmatmul.mubr.msk.f32.gmra.mxu1 %vm793_vm3, %v2521_v62  ;;  %1928 = vmatmul.mubr.msk.f32.gmra.mxu0 %vm793_vm3, %v778_v42 }
 0x139   : > { %1163 = vmatprep.mubr.f32.mxu1 %v2122_v0  ;;  %1337 = vmatprep.mubr.f32.mxu0 %v2122_v0 }
 0x13c   : > { %1907 = vmatmul.mubr.msk.f32.gmra.mxu1 %vm793_vm3, %v2535_v9  ;;  %1929 = vmatmul.mubr.msk.f32.gmra.mxu0 %vm793_vm3, %v779_v52  ;;  %v2734_v52 = vrot.slane %v1452_v49, %v1380_v25 }
 0x183   : > { %v2663_v55 = vpop.f32.mrf.mxu1 }
 0x184   : > { %v908_v56 = vpop.f32.mrf.mxu0 }
 0x185   : > { %v2665_v57 = vpop.f32.mrf.mxu1 }
 0x186   : > { %v910_v58 = vpop.f32.mrf.mxu0 }
 0x188   : > { %v2667_v59 = vpop.f32.mrf.mxu1 }
 0x18a   : > { %v2669_v61 = vpop.f32.mrf.mxu1 }
 0x18c   : > { %v914_v60 = vpop.f32.mrf.mxu0 }
 0x18e   : > { %v916_v62 = vpop.f32.mrf.mxu0 }
 0x190   : > { %v2671_v63 = vpop.f32.mrf.mxu1 }
 0x192   : > { %v2673_v1 = vpop.f32.mrf.mxu1 }
 0x194   : > { %v920_v0 = vpop.f32.mrf.mxu0 }
 0x196   : > { %v922_v2 = vpop.f32.mrf.mxu0 }
 0x198   : > { %v2675_v3 = vpop.f32.mrf.mxu1 }
 0x19a   : > { %v2679_v5 = vpop.f32.mrf.mxu1 }
 0x19c   : > { %v2677_v4 = vpop.f32.mrf.mxu0 }
 0x19e   : > { %v2681_v6 = vpop.f32.mrf.mxu0 }
 0x1a0   : > { %v2683_v7 = vpop.f32.mrf.mxu1 }
 0x1a2   : > { %v2687_v9 = vpop.f32.mrf.mxu1 }
 0x1a4   : > { %v2685_v8 = vpop.f32.mrf.mxu0 }
 0x1a6   : > { %v2689_v10 = vpop.f32.mrf.mxu0 }
 0x1a8   : > { %v2691_v11 = vpop.f32.mrf.mxu1 }
 0x1aa   : > { %v2695_v13 = vpop.f32.mrf.mxu1 }
 0x1ac   : > { %v2693_v12 = vpop.f32.mrf.mxu0 }
 0x1ae   : > { %v2697_v14 = vpop.f32.mrf.mxu0 }
 0x1b0   : > { %v2699_v15 = vpop.f32.mrf.mxu1 }
 0x1b2   : > { %v2703_v20 = vpop.f32.mrf.mxu1 }
 0x1b4   : > { %v2701_v19 = vpop.f32.mrf.mxu0 }
 0x1b6   : > { %v2705_v22 = vpop.f32.mrf.mxu0 }
 0x1b8   : > { %v2707_v23 = vpop.f32.mrf.mxu1 }
 0x1ba   : > { %v2711_v26 = vpop.f32.mrf.mxu1 }
 0x1bc   : > { %v2709_v24 = vpop.f32.mrf.mxu0 }
 0x1be   : > { %v2713_v27 = vpop.f32.mrf.mxu0 }
 0x1c0   : > { %v1075_v31 = vpop.f32.mrf.mxu1  ;;  %v1249_v32 = vpop.f32.mrf.mxu0 }
 0x1c1   : > { %v1076_v33 = vadd.f32 %v1075_v31, %v908_v56  ;;  %v2736_v56 = vrot.slane %v1452_v49, %v1384_v29 }
 0x1c2   : > { %v1077_v35 = vpop.f32.mrf.mxu1  ;;  %v1251_v36 = vpop.f32.mrf.mxu0 }
 0x1c3   : > { %v1344_v38 = vadd.f32 %v1249_v32, %v1076_v33  ;;  %v1078_v39 = vadd.f32 %v1077_v35, %v910_v58 }
 0x1c4   : > { %v1081_v43 = vpop.f32.mrf.mxu1  ;;  %v1255_v44 = vpop.f32.mrf.mxu0 }
 0x1c5   : > { %v1388_v45 = vadd.f32 %v2718_v34, %v1344_v38  ;;  %v1345_v46 = vadd.f32 %v1251_v36, %v1078_v39  ;;  %v1082_v48 = vadd.f32 %v1081_v43, %v914_v60 }
 0x1c6   : > { %v1083_v50 = vpop.f32.mrf.mxu1  ;;  %v1257_v17 = vpop.f32.mrf.mxu0 }
 0x1c7   : > { %v1420_v16 = vmax.f32 %v1388_v45, 0.0  ;;  %v1389_v30 = vadd.f32 %v2720_v40, %v1345_v46  ;;  %v1346_v47 = vadd.f32 %v1255_v44, %v1082_v48  ;;  %v1084_v51 = vadd.f32 %v1083_v50, %v916_v62 }
 0x1c8   : > { %v1087_v42 = vpop.f32.mrf.mxu1  ;;  %v1261_v53 = vpop.f32.mrf.mxu0 }
 0x1c9   : > { %v1421_v58 = vmax.f32 %v1389_v30, 0.0  ;;  %v1390_v60 = vadd.f32 %v2718_v34, %v1346_v47  ;;  %v1347_v18 = vadd.f32 %v1257_v17, %v1084_v51  ;;  %v1088_v21 = vadd.f32 %v1087_v42, %v920_v0 }
 0x1ca   : > { %v1089_v28 = vpop.f32.mrf.mxu1  ;;  %v1263_v31 = vpop.f32.mrf.mxu0  ;;  %v1557_v62 = vmul.f32 %v2729_v37, %v1420_v16  ;;  %v1464_v29 = vmul.f32 %v2734_v52, %v1420_v16 }
 0x1cb   : > { %v1391_v32 = vadd.f32 %v2720_v40, %v1347_v18  ;;  %v1348_v33 = vadd.f32 %v1261_v53, %v1088_v21  ;;  %v1090_v35 = vadd.f32 %v1089_v28, %v922_v2  ;;  %v1422_v36 = vmax.f32 %v1390_v60, 0.0 }
 0x1cc   : > { %v1093_v38 = vpop.f32.mrf.mxu1  ;;  %v1267_v39 = vpop.f32.mrf.mxu0  ;;  %v1558_v25 = vmul.f32 %v2732_v54, %v1421_v58  ;;  %v1465_v41 = vmul.f32 %v2736_v56, %v1421_v58 }
 0x1cd   : > { %v1423_v43 = vmax.f32 %v1391_v32, 0.0  ;;  %v1392_v0 = vadd.f32 %v2718_v34, %v1348_v33  ;;  %v1349_v44 = vadd.f32 %v1263_v31, %v1090_v35  ;;  %v1094_v45 = vadd.f32 %v1093_v38, %v2677_v4 }
 0x1ce   : > { %v1095_v46 = vpop.f32.mrf.mxu1  ;;  %v1269_v48 = vpop.f32.mrf.mxu0  ;;  %v1589_v2 = vadd.f32 %v1558_v25, %v1557_v62  ;;  %v1496_v49 = vadd.f32 %v1465_v41, %v1464_v29  ;;  %v1466_v42 = vmul.f32 %v2734_v52, %v1422_v36 }
 0x1cf   : > { %v1393_v50 = vadd.f32 %v2720_v40, %v1349_v44  ;;  %v1350_v17 = vadd.f32 %v1267_v39, %v1094_v45  ;;  %v1096_v30 = vadd.f32 %v1095_v46, %v2681_v6  ;;  %v1424_v47 = vmax.f32 %v1392_v0, 0.0 }
 0x1d0   : > { %1590 = vadd.xlane.f32.xlu1 %v1589_v2  ;;  %1497 = vadd.xlane.f32.xlu0 %v1496_v49  ;;  %v1099_v16 = vpop.f32.mrf.mxu1  ;;  %v1273_v51 = vpop.f32.mrf.mxu0  ;;  %v1467_v53 = vmul.f32 %v2736_v56, %v1423_v43  ;;  %v1560_v6 = vmul.f32 %v2732_v54, %v1423_v43 }
 0x1d1   : > { %v1425_v58 = vmax.f32 %v1393_v50, 0.0  ;;  %v1394_v4 = vadd.f32 %v2718_v34, %v1350_v17  ;;  %v1351_v60 = vadd.f32 %v1269_v48, %v1096_v30  ;;  %v1100_v18 = vadd.f32 %v1099_v16, %v2685_v8 }
 0x1d2   : > { %v1101_v21 = vpop.f32.mrf.mxu1  ;;  %v1275_v28 = vpop.f32.mrf.mxu0  ;;  %v1499_v31 = vadd.f32 %v1467_v53, %v1466_v42  ;;  %v1468_v25 = vmul.f32 %v2734_v52, %v1424_v47  ;;  %v1559_v8 = vmul.f32 %v2729_v37, %v1422_v36  ;;  %v1561_v42 = vmul.f32 %v2729_v37, %v1424_v47 }
 0x1d3   : > { %v1395_v32 = vadd.f32 %v2720_v40, %v1351_v60  ;;  %v1352_v33 = vadd.f32 %v1273_v51, %v1100_v18  ;;  %v1102_v35 = vadd.f32 %v1101_v21, %v2689_v10  ;;  %v1426_v62 = vmax.f32 %v1394_v4, 0.0 }
 0x1d4   : > { %1500 = vadd.xlane.f32.xlu0 %v1499_v31  ;;  %v1105_v38 = vpop.f32.mrf.mxu1  ;;  %v1279_v39 = vpop.f32.mrf.mxu0  ;;  %v1469_v29 = vmul.f32 %v2736_v56, %v1425_v58  ;;  %v1592_v10 = vadd.f32 %v1560_v6, %v1559_v8  ;;  %v1562_v2 = vmul.f32 %v2732_v54, %v1425_v58 }
 0x1d5   : > { %v1427_v41 = vmax.f32 %v1395_v32, 0.0  ;;  %v1396_v0 = vadd.f32 %v2718_v34, %v1352_v33  ;;  %v1353_v44 = vadd.f32 %v1275_v28, %v1102_v35  ;;  %v1106_v43 = vadd.f32 %v1105_v38, %v2693_v12 }
 0x1d6   : > { %v1107_v45 = vpop.f32.mrf.mxu1  ;;  %v1281_v46 = vpop.f32.mrf.mxu0  ;;  %v1502_v48 = vadd.f32 %v1469_v29, %v1468_v25  ;;  %v1470_v51 = vmul.f32 %v2734_v52, %v1426_v62  ;;  %v1595_v28 = vadd.f32 %v1562_v2, %v1561_v42  ;;  %v1563_v25 = vmul.f32 %v2729_v37, %v1426_v62 }
 0x1d7   : > { %v1397_v49 = vadd.f32 %v2720_v40, %v1353_v44  ;;  %v1354_v50 = vadd.f32 %v1279_v39, %v1106_v43  ;;  %v1108_v17 = vadd.f32 %v1107_v45, %v2697_v14  ;;  %v1428_v30 = vmax.f32 %v1396_v0, 0.0 }
 0x1d8   : > { %1503 = vadd.xlane.f32.xlu1 %v1502_v48  ;;  %1593 = vadd.xlane.f32.xlu0 %v1592_v10  ;;  %v1111_v36 = vpop.f32.mrf.mxu1  ;;  %v1285_v16 = vpop.f32.mrf.mxu0  ;;  %v1471_v12 = vmul.f32 %v2736_v56, %v1427_v41  ;;  %v1564_v31 = vmul.f32 %v2732_v54, %v1427_v41 }
 0x1d9   : > { %v1429_v53 = vmax.f32 %v1397_v49, 0.0  ;;  %v1398_v4 = vadd.f32 %v2718_v34, %v1354_v50  ;;  %v1355_v58 = vadd.f32 %v1281_v46, %v1108_v17  ;;  %v1112_v60 = vadd.f32 %v1111_v36, %v2701_v19 }
 0x1da   : > { %v1113_v18 = vpop.f32.mrf.mxu1  ;;  %v1287_v21 = vpop.f32.mrf.mxu0  ;;  %v1505_v14 = vadd.f32 %v1471_v12, %v1470_v51  ;;  %v1472_v39 = vmul.f32 %v2734_v52, %v1428_v30  ;;  %v1598_v45 = vadd.f32 %v1564_v31, %v1563_v25  ;;  %v1565_v49 = vmul.f32 %v2729_v37, %v1428_v30 }
 0x1db   : > { %v1399_v6 = vadd.f32 %v2720_v40, %v1355_v58  ;;  %v1356_v32 = vadd.f32 %v1285_v16, %v1112_v60  ;;  %v1114_v33 = vadd.f32 %v1113_v18, %v2705_v22  ;;  %v1430_v35 = vmax.f32 %v1398_v4, 0.0 }
 0x1dc   : > { %1506 = vadd.xlane.f32.xlu1 %v1505_v14  ;;  %1596 = vadd.xlane.f32.xlu0 %v1595_v28  ;;  %v1117_v47 = vpop.f32.mrf.mxu1  ;;  %v1291_v38 = vpop.f32.mrf.mxu0  ;;  %v1473_v19 = vmul.f32 %v2736_v56, %v1429_v53  ;;  %v1566_v46 = vmul.f32 %v2732_v54, %v1429_v53  ;;  %v2127_v53 = vmov 0  }
 0x1dd   : > { %v1431_v29 = vmax.f32 %v1399_v6, 0.0  ;;  %v1400_v8 = vadd.f32 %v2718_v34, %v1356_v32  ;;  %v1357_v41 = vadd.f32 %v1287_v21, %v1114_v33  ;;  %v1118_v0 = vadd.f32 %v1117_v47, %v2709_v24  ;;  %2027 = vset.pattern.permute.xlu0 %v2127_v53 }
 0x1de   : > { %v1119_v44 = vpop.f32.mrf.mxu1  ;;  %v1293_v43 = vpop.f32.mrf.mxu0  ;;  %v1508_v22 = vadd.f32 %v1473_v19, %v1472_v39  ;;  %v1474_v24 = vmul.f32 %v2734_v52, %v1430_v35  ;;  %v1601_v58 = vadd.f32 %v1566_v46, %v1565_v49  ;;  %v1567_v33 = vmul.f32 %v2729_v37, %v1430_v35 }
 0x1df   : > { %v1401_v48 = vadd.f32 %v2720_v40, %v1357_v41  ;;  %v1358_v10 = vadd.f32 %v1291_v38, %v1118_v0  ;;  %v1120_v2 = vadd.f32 %v1119_v44, %v2713_v27  ;;  %v1432_v62 = vmax.f32 %v1400_v8, 0.0 }
 0x1e0   : > { %1509 = vadd.xlane.f32.xlu1 %v1508_v22  ;;  %1599 = vadd.xlane.f32.xlu0 %v1598_v45  ;;  %v1123_v50 = vpop.f32.mrf.mxu1  ;;  %v1297_v17 = vpop.f32.mrf.mxu0  ;;  %v1475_v36 = vmul.f32 %v2736_v56, %v1431_v29  ;;  %v1568_v60 = vmul.f32 %v2732_v54, %v1431_v29 }
 0x1e1   : > { %v1433_v16 = vmax.f32 %v1401_v48, 0.0  ;;  %v1402_v51 = vadd.f32 %v2718_v34, %v1358_v10  ;;  %v1359_v12 = vadd.f32 %v1293_v43, %v1120_v2  ;;  %v1124_v42 = vadd.f32 %v1123_v50, %v2663_v55 }
 0x1e2   : > { %v1125_v27 = vpop.f32.mrf.mxu1  ;;  %v1299_v4 = vpop.f32.mrf.mxu0  ;;  %v1511_v30 = vadd.f32 %v1475_v36, %v1474_v24  ;;  %v1476_v55 = vmul.f32 %v2734_v52, %v1432_v62  ;;  %v1604_v8 = vadd.f32 %v1568_v60, %v1567_v33  ;;  %v1569_v48 = vmul.f32 %v2729_v37, %v1432_v62 }
 0x1e3   : > { %v1403_v18 = vadd.f32 %v2720_v40, %v1359_v12  ;;  %v1360_v21 = vadd.f32 %v1297_v17, %v1124_v42  ;;  %v1126_v14 = vadd.f32 %v1125_v27, %v2665_v57  ;;  %v1434_v28 = vmax.f32 %v1402_v51, 0.0 }
 0x1e4   : > { %1512 = vadd.xlane.f32.xlu1 %v1511_v30  ;;  %1602 = vadd.xlane.f32.xlu0 %v1601_v58  ;;  %v1129_v31 = vpop.f32.mrf.mxu1  ;;  %v1303_v6 = vpop.f32.mrf.mxu0  ;;  %v1477_v32 = vmul.f32 %v2736_v56, %v1433_v16  ;;  %v1570_v41 = vmul.f32 %v2732_v54, %v1433_v16 }
 0x1e5   : > { %v1435_v47 = vmax.f32 %v1403_v18, 0.0  ;;  %v1404_v38 = vadd.f32 %v2718_v34, %v1360_v21  ;;  %v1361_v39 = vadd.f32 %v1299_v4, %v1126_v14  ;;  %v1130_v19 = vadd.f32 %v1129_v31, %v2667_v59 }
 0x1e6   : > { %v1131_v25 = vpop.f32.mrf.mxu1  ;;  %v1305_v29 = vpop.f32.mrf.mxu0  ;;  %v1514_v57 = vadd.f32 %v1477_v32, %v1476_v55  ;;  %v1478_v46 = vmul.f32 %v2734_v52, %v1434_v28  ;;  %v1607_v36 = vadd.f32 %v1570_v41, %v1569_v48  ;;  %v1571_v30 = vmul.f32 %v2729_v37, %v1434_v28 }
 0x1e7   : > { %v1405_v0 = vadd.f32 %v2720_v40, %v1361_v39  ;;  %v1362_v44 = vadd.f32 %v1303_v6, %v1130_v19  ;;  %v1132_v43 = vadd.f32 %v1131_v25, %v2669_v61  ;;  %v1436_v22 = vmax.f32 %v1404_v38, 0.0 }
 0x1e8   : > { %1515 = vadd.xlane.f32.xlu1 %v1514_v57  ;;  %1605 = vadd.xlane.f32.xlu0 %v1604_v8  ;;  %v1135_v35 = vpop.f32.mrf.mxu1  ;;  %v1309_v45 = vpop.f32.mrf.mxu0  ;;  %v1479_v59 = vmul.f32 %v2736_v56, %v1435_v47  ;;  %v1572_v16 = vmul.f32 %v2732_v54, %v1435_v47 }
 0x1e9   : > { %v1437_v10 = vmax.f32 %v1405_v0, 0.0  ;;  %v1406_v2 = vadd.f32 %v2718_v34, %v1362_v44  ;;  %v1363_v49 = vadd.f32 %v1305_v29, %v1132_v43  ;;  %v1136_v50 = vadd.f32 %v1135_v35, %v2671_v63 }
 0x1ea   : > { %v1137_v17 = vpop.f32.mrf.mxu1  ;;  %v1311_v24 = vpop.f32.mrf.mxu0  ;;  %v1517_v61 = vadd.f32 %v1479_v59, %v1478_v46  ;;  %v1480_v4 = vmul.f32 %v2734_v52, %v1436_v22  ;;  %v1610_v6 = vadd.f32 %v1572_v16, %v1571_v30  ;;  %v1573_v25 = vmul.f32 %v2729_v37, %v1436_v22 }
 0x1eb   : > { %v1407_v51 = vadd.f32 %v2720_v40, %v1363_v49  ;;  %v1364_v12 = vadd.f32 %v1309_v45, %v1136_v50  ;;  %v1138_v42 = vadd.f32 %v1137_v17, %v2673_v1  ;;  %v1438_v53 = vmax.f32 %v1406_v2, 0.0 }
 0x1ec   : > { %1518 = vadd.xlane.f32.xlu1 %v1517_v61  ;;  %1608 = vadd.xlane.f32.xlu0 %v1607_v36  ;;  %v1141_v62 = vpop.f32.mrf.mxu1  ;;  %v1315_v27 = vpop.f32.mrf.mxu0  ;;  %v1481_v63 = vmul.f32 %v2736_v56, %v1437_v10  ;;  %v1574_v55 = vmul.f32 %v2732_v54, %v1437_v10 }
 0x1ed   : > { %v1439_v58 = vmax.f32 %v1407_v51, 0.0  ;;  %v1408_v60 = vadd.f32 %v2718_v34, %v1364_v12  ;;  %v1365_v18 = vadd.f32 %v1311_v24, %v1138_v42  ;;  %v1142_v21 = vadd.f32 %v1141_v62, %v2675_v3 }
 0x1ee   : > { %v1143_v14 = vpop.f32.mrf.mxu1  ;;  %v1317_v31 = vpop.f32.mrf.mxu0  ;;  %v1520_v1 = vadd.f32 %v1481_v63, %v1480_v4  ;;  %v1482_v19 = vmul.f32 %v2734_v52, %v1438_v53  ;;  %v1613_v43 = vadd.f32 %v1574_v55, %v1573_v25  ;;  %v1575_v49 = vmul.f32 %v2729_v37, %v1438_v53 }
 0x1ef   : > { %v1409_v32 = vadd.f32 %v2720_v40, %v1365_v18  ;;  %v1366_v33 = vadd.f32 %v1315_v27, %v1142_v21  ;;  %v1144_v47 = vadd.f32 %v1143_v14, %v2679_v5  ;;  %v1440_v38 = vmax.f32 %v1408_v60, 0.0 }
 0x1f0   : > { %1521 = vadd.xlane.f32.xlu1 %v1520_v1  ;;  %1611 = vadd.xlane.f32.xlu0 %v1610_v6  ;;  %v1147_v28 = vpop.f32.mrf.mxu1  ;;  %v1321_v39 = vpop.f32.mrf.mxu0  ;;  %v1483_v3 = vmul.f32 %v2736_v56, %v1439_v58  ;;  %v1576_v35 = vmul.f32 %v2732_v54, %v1439_v58 }
 0x1f1   : > { %v1441_v29 = vmax.f32 %v1409_v32, 0.0  ;;  %v1410_v57 = vadd.f32 %v2718_v34, %v1366_v33  ;;  %v1367_v8 = vadd.f32 %v1317_v31, %v1144_v47  ;;  %v1148_v41 = vadd.f32 %v1147_v28, %v2683_v7 }
 0x1f2   : > { %v1149_v0 = vpop.f32.mrf.mxu1  ;;  %v1323_v44 = vpop.f32.mrf.mxu0  ;;  %v1523_v5 = vadd.f32 %v1483_v3, %v1482_v19  ;;  %v1484_v2 = vmul.f32 %v2734_v52, %v1440_v38  ;;  %v1616_v51 = vadd.f32 %v1576_v35, %v1575_v49  ;;  %v1577_v58 = vmul.f32 %v2729_v37, %v1440_v38 }
 0x1f3   : > { %v1411_v45 = vadd.f32 %v2720_v40, %v1367_v8  ;;  %v1368_v46 = vadd.f32 %v1321_v39, %v1148_v41  ;;  %v1150_v59 = vadd.f32 %v1149_v0, %v2687_v9  ;;  %v1442_v48 = vmax.f32 %v1410_v57, 0.0 }
 0x1f4   : > { %1524 = vadd.xlane.f32.xlu1 %v1523_v5  ;;  %1614 = vadd.xlane.f32.xlu0 %v1613_v43  ;;  %v1153_v22 = vpop.f32.mrf.mxu1  ;;  %v1327_v10 = vpop.f32.mrf.mxu0  ;;  %v1485_v7 = vmul.f32 %v2736_v56, %v1441_v29  ;;  %v1578_v12 = vmul.f32 %v2732_v54, %v1441_v29 }
 0x1f5   : > { %v1443_v50 = vmax.f32 %v1411_v45, 0.0  ;;  %v1412_v17 = vadd.f32 %v2718_v34, %v1368_v46  ;;  %v1369_v24 = vadd.f32 %v1323_v44, %v1150_v59  ;;  %v1154_v61 = vadd.f32 %v1153_v22, %v2691_v11 }
 0x1f6   : > { %v1155_v36 = vpop.f32.mrf.mxu1  ;;  %v1329_v16 = vpop.f32.mrf.mxu0  ;;  %v1526_v9 = vadd.f32 %v1485_v7, %v1484_v2  ;;  %v1486_v30 = vmul.f32 %v2734_v52, %v1442_v48  ;;  %v1579_v3 = vmul.f32 %v2729_v37, %v1442_v48 }
 0x1f7   : > { %v1413_v42 = vadd.f32 %v2720_v40, %v1369_v24  ;;  %v1370_v62 = vadd.f32 %v1327_v10, %v1154_v61  ;;  %v1156_v27 = vadd.f32 %v1155_v36, %v2695_v13  ;;  %v1444_v4 = vmax.f32 %v1412_v17, 0.0 }
 0x1f8   : > { %1527 = vadd.xlane.f32.xlu1 %v1526_v9  ;;  %1617 = vadd.xlane.f32.xlu0 %v1616_v51  ;;  %v1159_v53 = vpop.f32.mrf.mxu1  ;;  %v1333_v63 = vpop.f32.mrf.mxu0  ;;  %v1487_v11 = vmul.f32 %v2736_v56, %v1443_v50  ;;  %v1619_v13 = vadd.f32 %v1578_v12, %v1577_v58  ;;  %v1580_v55 = vmul.f32 %v2732_v54, %v1443_v50 }
 0x1f9   : > { %v1445_v60 = vmax.f32 %v1413_v42, 0.0  ;;  %v1414_v18 = vadd.f32 %v2718_v34, %v1370_v62  ;;  %v1371_v21 = vadd.f32 %v1329_v16, %v1156_v27  ;;  %v1160_v14 = vadd.f32 %v1159_v53, %v2699_v15 }
 0x1fa   : > { %v1161_v31 = vpop.f32.mrf.mxu1  ;;  %v1529_v1 = vadd.f32 %v1487_v11, %v1486_v30  ;;  %v1335_v6 = vpop.f32.mrf.mxu0  ;;  %v1488_v19 = vmul.f32 %v2734_v52, %v1444_v4  ;;  %v1622_v0 = vadd.f32 %v1580_v55, %v1579_v3 }
 0x1fb   : > { %v1415_v32 = vadd.f32 %v2720_v40, %v1371_v21  ;;  %v1162_v33 = vadd.f32 %v1161_v31, %v2703_v20  ;;  %v1372_v47 = vadd.f32 %v1333_v63, %v1160_v14  ;;  %v1446_v28 = vmax.f32 %v1414_v18, 0.0 }
 0x1fc   : > { %1530 = vadd.xlane.f32.xlu1 %v1529_v1  ;;  %1620 = vadd.xlane.f32.xlu0 %v1619_v13  ;;  %v1165_v38 = vpop.f32.mrf.mxu1  ;;  %v1339_v39 = vpop.f32.mrf.mxu0  ;;  %v1489_v15 = vmul.f32 %v2736_v56, %v1445_v60  ;;  %v1582_v5 = vmul.f32 %v2732_v54, %v1445_v60 }
 0x1fd   : > { %v1447_v25 = vmax.f32 %v1415_v32, 0.0  ;;  %v1416_v29 = vadd.f32 %v2718_v34, %v1372_v47  ;;  %v1166_v57 = vadd.f32 %v1165_v38, %v2707_v23  ;;  %v1373_v8 = vadd.f32 %v1335_v6, %v1162_v33 }
 0x1fe   : > { %v1167_v41 = vpop.f32.mrf.mxu1  ;;  %v1532_v20 = vadd.f32 %v1489_v15, %v1488_v19  ;;  %v1341_v44 = vpop.f32.mrf.mxu0  ;;  %v1490_v59 = vmul.f32 %v2734_v52, %v1446_v28  ;;  %v1581_v23 = vmul.f32 %v2729_v37, %v1444_v4  ;;  %v1583_v36 = vmul.f32 %v2729_v37, %v1446_v28 }
 0x1ff   : > { %v1448_v43 = vmax.f32 %v1416_v29, 0.0  ;;  %v1417_v35 = vadd.f32 %v2720_v40, %v1373_v8  ;;  %v1168_v45 = vadd.f32 %v1167_v41, %v2711_v26  ;;  %v1374_v46 = vadd.f32 %v1339_v39, %v1166_v57 }
 0x200   : > { %1533 = vadd.xlane.f32.xlu1 %v1532_v20  ;;  %1623 = vadd.xlane.f32.xlu0 %v1622_v0  ;;  %v1491_v48 = vmul.f32 %v2736_v56, %v1447_v25  ;;  %v1625_v49 = vadd.f32 %v1582_v5, %v1581_v23  ;;  %v1584_v50 = vmul.f32 %v2732_v54, %v1447_v25 }
 0x201   : > { %v1449_v22 = vmax.f32 %v1417_v35, 0.0  ;;  %v1418_v10 = vadd.f32 %v2718_v34, %v1374_v46  ;;  %v1375_v2 = vadd.f32 %v1341_v44, %v1168_v45  ;;  %v1492_v24 = vmul.f32 %v2734_v52, %v1448_v43 }
 0x202   : > { %v1535_v7 = vadd.f32 %v1491_v48, %v1490_v59  ;;  %v1628_v51 = vadd.f32 %v1584_v50, %v1583_v36  ;;  %v1585_v27 = vmul.f32 %v2729_v37, %v1448_v43 }
 0x203   : > { %v1450_v17 = vmax.f32 %v1418_v10, 0.0  ;;  %v1419_v26 = vadd.f32 %v2720_v40, %v1375_v2  ;;  %v1493_v61 = vmul.f32 %v2736_v56, %v1449_v22  ;;  %v1586_v34 = vmul.f32 %v2732_v54, %v1449_v22 }
 0x204   : > { %1536 = vadd.xlane.f32.xlu1 %v1535_v7  ;;  %1626 = vadd.xlane.f32.xlu0 %v1625_v49 }
 0x205   : > { %v1451_v16 = vmax.f32 %v1419_v26, 0.0  ;;  %v1538_v9 = vadd.f32 %v1493_v61, %v1492_v24  ;;  %v1494_v12 = vmul.f32 %v2734_v52, %v1450_v17  ;;  %v1587_v62 = vmul.f32 %v2729_v37, %v1450_v17  ;;  %v1686_v52 = vld [vmem:[%s2934_s6] sm:$0x3] }
 0x206   : > { %v1631_v63 = vadd.f32 %v1586_v34, %v1585_v27 }
 0x207   : > { %v1495_v42 = vmul.f32 %v2736_v56, %v1451_v16  ;;  %v1588_v40 = vmul.f32 %v2732_v54, %v1451_v16 }
 0x208   : > { %1539 = vadd.xlane.f32.xlu1 %v1538_v9  ;;  %1629 = vadd.xlane.f32.xlu0 %v1628_v51 }
 0x209   : > { %v1541_v4 = vadd.f32 %v1495_v42, %v1494_v12  ;;  %v1634_v53 = vadd.f32 %v1588_v40, %v1587_v62 }
 0x20c   : > { %1542 = vadd.xlane.f32.xlu1 %v1541_v4  ;;  %1632 = vadd.xlane.f32.xlu0 %v1631_v63 }
 0x210   : > { %1635 = vadd.xlane.f32.xlu0 %v1634_v53 }
 0x226   : > { %1689 = vperm.xlu0 %2027, %v1686_v52  }
 0x259   : > { %v1591_v56 = vpop.xlane.xlu1 %1590  ;;  %v1498_v30 = vpop.xlane.xlu0 %1497 }
 0x25a   : > { %v1638_v54 = vsel %vm1637_vm4, %v1498_v30, %v1591_v56 }
 0x25b   : > { %1654 = vxpose.xlu1.b32.start [1/16] (narrow) %v1638_v54, 8 }
 0x25d   : > { %v1501_v11 = vpop.xlane.xlu0 %1500 }
 0x261   : > { %v1504_v58 = vpop.xlane.xlu1 %1503  ;;  %v1594_v37 = vpop.xlane.xlu0 %1593 }
 0x262   : > { %v1639_v60 = vsel %vm1637_vm4, %v1501_v11, %v1594_v37 }
 0x263   : > { %1655 = vxpose.xlu1.b32.cont [2/16] (narrow) %v1639_v60, 8 }
 0x265   : > { %v1507_v18 = vpop.xlane.xlu1 %1506  ;;  %v1597_v21 = vpop.xlane.xlu0 %1596 }
 0x266   : > { %v1640_v14 = vsel %vm1637_vm4, %v1504_v58, %v1597_v21 }
 0x267   : > { %1656 = vxpose.xlu1.b32.cont [3/16] (narrow) %v1640_v14, 8 }
 0x269   : > { %v1510_v31 = vpop.xlane.xlu1 %1509  ;;  %v1600_v1 = vpop.xlane.xlu0 %1599 }
 0x26a   : > { %v1641_v13 = vsel %vm1637_vm4, %v1507_v18, %v1600_v1 }
 0x26b   : > { %1657 = vxpose.xlu1.b32.cont [4/16] (narrow) %v1641_v13, 8 }
 0x26d   : > { %v1513_v6 = vpop.xlane.xlu1 %1512  ;;  %v1603_v55 = vpop.xlane.xlu0 %1602 }
 0x26e   : > { %v1642_v32 = vsel %vm1637_vm4, %v1510_v31, %v1603_v55 }
 0x26f   : > { %1658 = vxpose.xlu1.b32.cont [5/16] (narrow) %v1642_v32, 8 }
 0x271   : > { %v1516_v33 = vpop.xlane.xlu1 %1515  ;;  %v1606_v47 = vpop.xlane.xlu0 %1605 }
 0x272   : > { %v1643_v28 = vsel %vm1637_vm4, %v1513_v6, %v1606_v47 }
 0x273   : > { %1659 = vxpose.xlu1.b32.cont [6/16] (narrow) %v1643_v28, 8 }
 0x275   : > { %v1519_v38 = vpop.xlane.xlu1 %1518  ;;  %v1609_v39 = vpop.xlane.xlu0 %1608 }
 0x276   : > { %v1644_v19 = vsel %vm1637_vm4, %v1516_v33, %v1609_v39 }
 0x277   : > { %1660 = vxpose.xlu1.b32.cont [7/16] (narrow) %v1644_v19, 8 }
 0x279   : > { %v1522_v15 = vpop.xlane.xlu1 %1521  ;;  %v1612_v3 = vpop.xlane.xlu0 %1611 }
 0x27a   : > { %v1645_v25 = vsel %vm1637_vm4, %v1519_v38, %v1612_v3 }
 0x27b   : > { %1661 = vxpose.xlu1.b32.cont [8/16] (narrow) %v1645_v25, 8 }
 0x27d   : > { %v1525_v29 = vpop.xlane.xlu1 %1524  ;;  %v1615_v57 = vpop.xlane.xlu0 %1614 }
 0x27e   : > { %v1646_v8 = vsel %vm1637_vm4, %v1522_v15, %v1615_v57 }
 0x27f   : > { %1662 = vxpose.xlu1.b32.cont [9/16] (narrow) %v1646_v8, 8 }
 0x281   : > { %v1528_v41 = vpop.xlane.xlu1 %1527  ;;  %v1618_v20 = vpop.xlane.xlu0 %1617 }
 0x282   : > { %v1647_v0 = vsel %vm1637_vm4, %v1525_v29, %v1618_v20 }
 0x283   : > { %1663 = vxpose.xlu1.b32.cont [10/16] (narrow) %v1647_v0, 8 }
 0x285   : > { %v1531_v44 = vpop.xlane.xlu1 %1530  ;;  %v1621_v5 = vpop.xlane.xlu0 %1620 }
 0x286   : > { %v1648_v43 = vsel %vm1637_vm4, %v1528_v41, %v1621_v5 }
 0x287   : > { %1664 = vxpose.xlu1.b32.cont [11/16] (narrow) %v1648_v43, 8 }
 0x289   : > { %v1534_v35 = vpop.xlane.xlu1 %1533  ;;  %v1624_v45 = vpop.xlane.xlu0 %1623 }
 0x28a   : > { %v1649_v46 = vsel %vm1637_vm4, %v1531_v44, %v1624_v45 }
 0x28b   : > { %1665 = vxpose.xlu1.b32.cont [12/16] (narrow) %v1649_v46, 8 }
 0x28d   : > { %v1537_v59 = vpop.xlane.xlu1 %1536  ;;  %v1627_v48 = vpop.xlane.xlu0 %1626 }
 0x28e   : > { %v1650_v23 = vsel %vm1637_vm4, %v1534_v35, %v1627_v48 }
 0x28f   : > { %1666 = vxpose.xlu1.b32.cont [13/16] (narrow) %v1650_v23, 8 }
 0x291   : > { %v1630_v22 = vpop.xlane.xlu0 %1629  ;;  %v1540_v2 = vpop.xlane.xlu1 %1539 }
 0x292   : > { %v1651_v10 = vsel %vm1637_vm4, %v1537_v59, %v1630_v22 }
 0x293   : > { %1667 = vxpose.xlu1.b32.cont [14/16] (narrow) %v1651_v10, 8 }
 0x295   : > { %v1633_v7 = vpop.xlane.xlu0 %1632  ;;  %v1543_v50 = vpop.xlane.xlu1 %1542 }
 0x296   : > { %v1652_v49 = vsel %vm1637_vm4, %v1540_v2, %v1633_v7 }
 0x297   : > { %1668 = vxpose.xlu1.b32.cont [15/16] (narrow) %v1652_v49, 8 }
 0x299   : > { %v1636_v17 = vpop.xlane.xlu0 %1635 }
 0x29a   : > { %v1653_v26 = vsel %vm1637_vm4, %v1543_v50, %v1636_v17 }
 0x29b   : > { %1669 = vxpose.xlu1.b32.end [16/16] (narrow) %v1653_v26, 8 }
 0x2a1   : > { %v1690_v24 = vpop.permute.xlu0 %1689 }
 0x2db   : > { %v1670_v61 = vpop.trf.xlu1 }
 0x2dc   : > { %v1692_v36 = vadd.f32 %v1690_v24, %v1670_v61 }
 0x2de   : > { %1693 = vst [vmem:[%s388_s11] sm:$0x3] %v1692_v36 }
 0x2df   : > { %2041 = shalt.err (!%p2038_p1)
}
 0x2e0   : > { %s2042_s0 = scalar_lea.hbm %s1708_s30, 32  ;;  %s2046_s29 = scalar_lea.hbm %s2935_s7, 128 }
 0x2e1   : > { %p2043_p2 = scmp.ne.s32.totalorder %s1708_s30, %s2042_s0  ;;  %p2047_p6 = scmp.lt.s32.totalorder %s1708_s30, %s2935_s7 }
 0x2e2   : > { %p2048_p7 = scmp.lt.s32.totalorder %s2046_s29, %s2042_s0 }
 0x2e3   : > { %p2044_p4 = pnand %p2043_p2, %p2220_p3 }
 0x2e4   : > { %p2049_p9 = por %p2048_p7, %p2047_p6 }
 0x2e5   : > { %p2045_p5 = pneg %p2044_p4 }
 0x2e7   : > { %p2050_p10 = pnand %p2049_p9, %p2045_p5 }
 0x2e9   : > { %2053 = shalt.err (!%p2050_p10)
}
 0x2ea   : > { %1950 = dma.vmem_to_hbm [thread:$0]  (%p2220_p3), %s1711_s23, 32, %s1708_s30, %s1695_s12  }
 0x2eb PF: > { %p1956_p11 = scmp.ge.s32.totalorder %s2120_s8, 2  ;;  %s1722_s18 = sand.u32 1, %s2092_s24  }
 0x2ec   : > { %s1723_s9 = scalar_lea.sflag [#allocation4], %s1722_s18 }
 0x2ed   : > { %p1953_p12 = pnand %p1956_p11, %p2229_p8 }
 0x2ef   : > { %p1954_p13 = pneg %p1953_p12 }
 0x2f1   : > { %2087 = dma.done.wait (%p1954_p13), %s1723_s9, 32  }
 0x2f2   : > { %2089 = vsyncadd (%p1954_p13), %s1723_s9, 4294967264  ;;  %s20_s8 = sadd.s32 1, %s2120_s8   ;;  %s2951_s27 = sld [smem:[#allocation6_spill]] }
 0x2f3   : > { %p17_p0 = scmp.ge.s32.totalorder %s20_s8, 6   ;;  %s2952_s28 = sld [smem:[#allocation7_spill]] }
 0x2f4   : > { %s2953_s29 = sld [smem:[#allocation8_spill]]  ;;  %s2955_s24 = smov %s2096_s25 }
 0x2f5   : > { %s2954_s30 = sld [smem:[#allocation9_spill]]  ;;  %s2956_s25 = smov %s2100_s26 }
 0x2f6   : > { %s2957_s26 = smov %s2238_s19  ;;  %19 = sbr.rel (!%p17_p0) target bundleno = 7 (0x7), region = 111 }
 0x2fb   :  { %1728 = vsyncpa [#allocation4], 1 }
 0x2fc   :  { %1730 = vsyncpa [#allocation4 + $0x1], 1 }

</bundles_post_ra>
